<compile_context>
chip_gen: v7x
topology: tpu7x:2x2x1
jax: 0.10.0
libtpu: 0.0.40
codegen_flags: <defaults>
</compile_context>

<pallas_src>
import functools

import jax
import jax.numpy as jnp
from jax.experimental import pallas as pl
from jax.experimental.pallas import tpu as pltpu


# ----------------------------------------------------------------------------
# Fused Pallas kernel: 2-layer LSTM over the full sequence + final Linear.
# ----------------------------------------------------------------------------
def _embed_rnn_kernel(x_ref, h0_ref, c0_ref, w_ref, b_ref,
                      out_ref, hn_ref, cn_ref,
                      *, seq_len, input_size, hidden_dim, output_size):
    H = hidden_dim
    D = input_size
    S = seq_len
    B = x_ref.shape[0]

    # Static, tile-aligned slices into the single packed bf16 weight slab.
    # Rows: [wih1 (D) | whh1 (H) | wih2;whh2 stacked (2H) | wfc (H, col-padded)]
    wih1 = w_ref[0:D, :]                              # (D, 4H)
    whh1 = w_ref[D:D + H, :]                          # (H, 4H)
    w2 = w_ref[D + H:D + 3 * H, :]                    # (2H, 4H)
    wfc = w_ref[D + 3 * H:D + 4 * H, 0:output_size]   # (H, O)

    # Bias slab (f32): row 0 = b1 (bih+bhh l0), row 1 = b2 (l1), row 2 = fc.
    b1 = b_ref[0:1, :]                                         # (1, 4H)
    b2 = jnp.broadcast_to(b_ref[1:2, :], (B, 4 * H))           # hoisted bcast
    bfc = b_ref[2:3, 0:output_size]                            # (1, O)

    # One-shot layer-1 input projection for every timestep (bias folded in).
    x_all = x_ref[...].reshape(B * S, D).astype(jnp.bfloat16)
    xg1_all = (jnp.dot(x_all, wih1, preferred_element_type=jnp.float32)
               + b1).reshape(B, S, 4 * H)

    def lstm_cell(gates, c):
        # Gate order i|f|o|g: one sigmoid over (B,3H), one tanh over (B,H).
        sig = jax.nn.sigmoid(gates[:, :3 * H])
        i = sig[:, 0:H]
        f = sig[:, H:2 * H]
        o = sig[:, 2 * H:3 * H]
        g = jnp.tanh(gates[:, 3 * H:])
        c_new = f * c + i * g
        h_new = o * jnp.tanh(c_new)
        return h_new, c_new

    h0_all = h0_ref[...]                              # (B, 2, H) f32
    c0_all = c0_ref[...]
    h1, c1 = h0_all[:, 0, :], c0_all[:, 0, :]
    h2, c2 = h0_all[:, 1, :], c0_all[:, 1, :]

    # seq_len is a compile-time constant -> fully unrolled, static slices only.
    for t in range(S):
        # Layer 1: only the recurrent matmul remains on the per-step path.
        gates1 = xg1_all[:, t, :] + jnp.dot(
            h1.astype(jnp.bfloat16), whh1, preferred_element_type=jnp.float32)
        h1, c1 = lstm_cell(gates1, c1)
        # Layer 2: single fused matmul over [h1_new, h2_prev] @ [wih2; whh2].
        # (Inter-layer dropout is training-only in nn.LSTM -> identity here.)
        h_cat = jnp.concatenate([h1, h2], axis=-1).astype(jnp.bfloat16)
        gates2 = jnp.dot(h_cat, w2, preferred_element_type=jnp.float32) + b2
        h2, c2 = lstm_cell(gates2, c2)

    # fc(lstm_out)[:, -1]  ==  fc applied to layer-2 h at the last timestep.
    out_ref[...] = (jnp.dot(h2.astype(jnp.bfloat16), wfc,
                            preferred_element_type=jnp.float32) + bfc)
    # Hidden returned directly in the PyTorch layout (B, n_layers, H).
    hn_ref[...] = jnp.stack([h1, h2], axis=1)
    cn_ref[...] = jnp.stack([c1, c2], axis=1)


# ----------------------------------------------------------------------------
# Wrapper (matches the PyTorch forward signature / return convention)
# ----------------------------------------------------------------------------
def embed_rnn_forward(packed, x, hidden, *, output_size):
    """x: (B, seq, input_size) f32; hidden = (h, c), each (B, n_layers, H).

    Returns (out (B, output_size), (h_n, c_n) each (B, n_layers, H)),
    identical to EmbedRNN.forward (eval mode).  No wrapper-side transposes,
    casts or reshapes -- everything is folded into the single pallas_call.
    """
    h0, c0 = hidden
    B, S, D = x.shape
    H = h0.shape[-1]
    assert h0.shape[1] == 2, "kernel implements the module default n_layers=2"

    vmem = pl.BlockSpec(memory_space=pltpu.MemorySpace.VMEM)
    out, hn, cn = pl.pallas_call(
        functools.partial(_embed_rnn_kernel, seq_len=S, input_size=D,
                          hidden_dim=H, output_size=output_size),
        out_shape=(jax.ShapeDtypeStruct((B, output_size), jnp.float32),
                   jax.ShapeDtypeStruct((B, 2, H), jnp.float32),
                   jax.ShapeDtypeStruct((B, 2, H), jnp.float32)),
        in_specs=[vmem] * 5,
        out_specs=(vmem, vmem, vmem),
    )(x, h0, c0, packed["w"], packed["b"])

    return out, (hn, cn)


# ----------------------------------------------------------------------------
# Parameters: PyTorch-like init (raw, f32) + one-time pre-packing for the kernel
# ----------------------------------------------------------------------------
def init_params(key, input_size, hidden_dim, output_size, n_layers=2):
    ks = jax.random.split(key, 4 * n_layers + 2)
    bound = 1.0 / jnp.sqrt(float(hidden_dim))

    def u(kk, shape):
        return jax.random.uniform(kk, shape, jnp.float32, -bound, bound)

    raw = {}
    for l in range(n_layers):
        in_dim = input_size if l == 0 else hidden_dim
        raw[f"wih_l{l}"] = u(ks[4 * l + 0], (4 * hidden_dim, in_dim))
        raw[f"whh_l{l}"] = u(ks[4 * l + 1], (4 * hidden_dim, hidden_dim))
        raw[f"bih_l{l}"] = u(ks[4 * l + 2], (4 * hidden_dim,))
        raw[f"bhh_l{l}"] = u(ks[4 * l + 3], (4 * hidden_dim,))
    raw["fc_w"] = u(ks[-2], (output_size, hidden_dim))
    raw["fc_b"] = u(ks[-1], (output_size,))
    return raw


def pack_params(raw, input_size, hidden_dim, output_size):
    """One-time re-layout into 2 slabs:
       * one bf16 (D+4H, 4H) weight slab (RHS matrices, gates i|f|o|g,
         layer-2 wih/whh pre-stacked, fc column-padded to 4H),
       * one f32 (3, 4H) bias slab (b_ih+b_hh fused, gates reordered).
    """
    H = hidden_dim
    assert output_size <= 4 * H, "fc output must fit the 4H-wide slab columns"

    def reorder_cols(w_t):  # (K, 4H), columns i|f|g|o -> i|f|o|g
        return jnp.concatenate(
            [w_t[:, 0:2 * H], w_t[:, 3 * H:4 * H], w_t[:, 2 * H:3 * H]], axis=1)

    def reorder_vec(b):     # (4H,), i|f|g|o -> i|f|o|g
        return jnp.concatenate([b[0:2 * H], b[3 * H:4 * H], b[2 * H:3 * H]])

    wih1 = reorder_cols(raw["wih_l0"].T)                        # (D, 4H)
    whh1 = reorder_cols(raw["whh_l0"].T)                        # (H, 4H)
    w2 = jnp.concatenate([reorder_cols(raw["wih_l1"].T),
                          reorder_cols(raw["whh_l1"].T)], axis=0)  # (2H, 4H)
    wfc_pad = jnp.zeros((H, 4 * H), jnp.float32).at[:, :output_size].set(
        raw["fc_w"].T)                                          # (H, 4H)
    w_slab = jnp.concatenate([wih1, whh1, w2, wfc_pad],
                             axis=0).astype(jnp.bfloat16)       # (D+4H, 4H)

    b1 = reorder_vec(raw["bih_l0"] + raw["bhh_l0"])
    b2 = reorder_vec(raw["bih_l1"] + raw["bhh_l1"])
    bfc = jnp.zeros((4 * H,), jnp.float32).at[:output_size].set(raw["fc_b"])
    b_slab = jnp.stack([b1, b2, bfc]).astype(jnp.float32)       # (3, 4H)

    return {"w": w_slab, "b": b_slab}


# ----------------------------------------------------------------------------
# Pure-JAX f32 reference (same semantics, for a correctness check)
# ----------------------------------------------------------------------------
def reference_forward(raw, x, hidden, n_layers=2):
    h0, c0 = hidden
    _, S, _ = x.shape
    h = [h0[:, l] for l in range(n_layers)]
    c = [c0[:, l] for l in range(n_layers)]

    def cell(xt, h_, c_, wih, whh, bih, bhh):
        gates = xt @ wih.T + bih + h_ @ whh.T + bhh
        i, f, g, o = jnp.split(gates, 4, axis=1)
        c_new = jax.nn.sigmoid(f) * c_ + jax.nn.sigmoid(i) * jnp.tanh(g)
        h_new = jax.nn.sigmoid(o) * jnp.tanh(c_new)
        return h_new, c_new

    for t in range(S):
        inp = x[:, t]
        for l in range(n_layers):
            h[l], c[l] = cell(inp, h[l], c[l],
                              raw[f"wih_l{l}"], raw[f"whh_l{l}"],
                              raw[f"bih_l{l}"], raw[f"bhh_l{l}"])
            inp = h[l]
    out = h[-1] @ raw["fc_w"].T + raw["fc_b"]
    return out, (jnp.stack(h, axis=1), jnp.stack(c, axis=1))


# ----------------------------------------------------------------------------
if __name__ == "__main__":
    INPUT_SIZE, HIDDEN, OUTPUT, N_LAYERS = 64, 128, 256, 2
    BATCH, SEQ = 2, 8

    key = jax.random.PRNGKey(0)
    k_p, k_x = jax.random.split(key)
    raw = init_params(k_p, INPUT_SIZE, HIDDEN, OUTPUT, N_LAYERS)
    packed = pack_params(raw, INPUT_SIZE, HIDDEN, OUTPUT)  # one-time re-layout

    x = jax.random.normal(k_x, (BATCH, SEQ, INPUT_SIZE), jnp.float32)
    # init_hidden(): zeros of shape (batch, n_layers, hidden_dim)
    h0 = jnp.zeros((BATCH, N_LAYERS, HIDDEN), jnp.float32)
    c0 = jnp.zeros((BATCH, N_LAYERS, HIDDEN), jnp.float32)

    fwd = jax.jit(functools.partial(embed_rnn_forward, output_size=OUTPUT))
    out, (hn, cn) = fwd(packed, x, (h0, c0))
    jax.block_until_ready((out, hn, cn))

    assert out.shape == (BATCH, OUTPUT)
    assert hn.shape == (BATCH, N_LAYERS, HIDDEN)
    assert cn.shape == (BATCH, N_LAYERS, HIDDEN)
    assert bool(jnp.all(jnp.isfinite(out)))

    # Compare against the f32 reference (bf16 MXU operands => loose tolerance).
    ro, (rh, rc) = reference_forward(raw, x, (h0, c0), N_LAYERS)
    assert float(jnp.max(jnp.abs(out - ro))) < 1e-1
    assert float(jnp.max(jnp.abs(hn - rh))) < 1e-1
    assert float(jnp.max(jnp.abs(cn - rc))) < 1e-1

    print("KERNEL_OK")
</pallas_src>

<mosaic_0001>
module attributes {stable_mosaic.version = 11 : i64} {
  func.func @_embed_rnn_kernel(%arg0: memref<2x8x64xf32, #tpu.memory_space<vmem>>, %arg1: memref<2x2x128xf32, #tpu.memory_space<vmem>>, %arg2: memref<2x2x128xf32, #tpu.memory_space<vmem>>, %arg3: memref<576x512xbf16, #tpu.memory_space<vmem>>, %arg4: memref<3x512xf32, #tpu.memory_space<vmem>>, %arg5: memref<2x256xf32, #tpu.memory_space<vmem>>, %arg6: memref<2x2x128xf32, #tpu.memory_space<vmem>>, %arg7: memref<2x2x128xf32, #tpu.memory_space<vmem>>) attributes {dimension_semantics = [], scalar_prefetch = 0 : i64, scratch_operands = 0 : i64, tpu.core_type = #tpu.core_type<tc>} {
    %c0 = arith.constant 0 : index
    %c0_0 = arith.constant 0 : index
    %0 = vector.load %arg3[%c0, %c0_0] : memref<576x512xbf16, #tpu.memory_space<vmem>>, vector<64x512xbf16>
    %c64 = arith.constant 64 : index
    %c0_1 = arith.constant 0 : index
    %1 = vector.load %arg3[%c64, %c0_1] : memref<576x512xbf16, #tpu.memory_space<vmem>>, vector<128x512xbf16>
    %c192 = arith.constant 192 : index
    %c0_2 = arith.constant 0 : index
    %2 = vector.load %arg3[%c192, %c0_2] : memref<576x512xbf16, #tpu.memory_space<vmem>>, vector<256x512xbf16>
    %c448 = arith.constant 448 : index
    %c0_3 = arith.constant 0 : index
    %3 = vector.load %arg3[%c448, %c0_3] : memref<576x512xbf16, #tpu.memory_space<vmem>>, vector<128x256xbf16>
    %c0_4 = arith.constant 0 : index
    %c0_5 = arith.constant 0 : index
    %4 = vector.load %arg4[%c0_4, %c0_5] : memref<3x512xf32, #tpu.memory_space<vmem>>, vector<1x512xf32>
    %c1 = arith.constant 1 : index
    %c0_6 = arith.constant 0 : index
    %5 = vector.load %arg4[%c1, %c0_6] : memref<3x512xf32, #tpu.memory_space<vmem>>, vector<1x512xf32>
    %6 = vector.shape_cast %5 : vector<1x512xf32> to vector<1x512xf32>
    %7 = vector.broadcast %6 : vector<1x512xf32> to vector<2x512xf32>
    %c2 = arith.constant 2 : index
    %c0_7 = arith.constant 0 : index
    %8 = vector.load %arg4[%c2, %c0_7] : memref<3x512xf32, #tpu.memory_space<vmem>>, vector<1x256xf32>
    %c0_8 = arith.constant 0 : index
    %c0_9 = arith.constant 0 : index
    %c0_10 = arith.constant 0 : index
    %9 = vector.load %arg0[%c0_8, %c0_9, %c0_10] : memref<2x8x64xf32, #tpu.memory_space<vmem>>, vector<2x8x64xf32>
    %10 = vector.shape_cast %9 : vector<2x8x64xf32> to vector<16x64xf32>
    %11 = arith.truncf %10 : vector<16x64xf32> to vector<16x64xbf16>
    %cst = arith.constant dense<0.000000e+00> : vector<16x512xf32>
    %12 = tpu.matmul %11, %0, %cst {dimension_numbers = #tpu.dot_dimension_numbers<[1], [0], [0], [1], [0, 0, 1, 1], [], []>} : vector<16x64xbf16>, vector<64x512xbf16>, vector<16x512xf32> -> vector<16x512xf32>
    %13 = vector.broadcast %4 : vector<1x512xf32> to vector<16x512xf32>
    %14 = arith.addf %12, %13 : vector<16x512xf32>
    %15 = vector.shape_cast %14 : vector<16x512xf32> to vector<2x8x512xf32>
    %c0_11 = arith.constant 0 : index
    %c0_12 = arith.constant 0 : index
    %c0_13 = arith.constant 0 : index
    %16 = vector.load %arg1[%c0_11, %c0_12, %c0_13] : memref<2x2x128xf32, #tpu.memory_space<vmem>>, vector<2x2x128xf32>
    %c0_14 = arith.constant 0 : index
    %c0_15 = arith.constant 0 : index
    %c0_16 = arith.constant 0 : index
    %17 = vector.load %arg2[%c0_14, %c0_15, %c0_16] : memref<2x2x128xf32, #tpu.memory_space<vmem>>, vector<2x2x128xf32>
    %18 = vector.extract_strided_slice %16 {offsets = [0, 0, 0], sizes = [2, 1, 128], strides = [1, 1, 1]} : vector<2x2x128xf32> to vector<2x1x128xf32>
    %19 = vector.shape_cast %18 : vector<2x1x128xf32> to vector<2x128xf32>
    %20 = vector.extract_strided_slice %17 {offsets = [0, 0, 0], sizes = [2, 1, 128], strides = [1, 1, 1]} : vector<2x2x128xf32> to vector<2x1x128xf32>
    %21 = vector.shape_cast %20 : vector<2x1x128xf32> to vector<2x128xf32>
    %22 = vector.extract_strided_slice %16 {offsets = [0, 1, 0], sizes = [2, 1, 128], strides = [1, 1, 1]} : vector<2x2x128xf32> to vector<2x1x128xf32>
    %23 = vector.shape_cast %22 : vector<2x1x128xf32> to vector<2x128xf32>
    %24 = vector.extract_strided_slice %17 {offsets = [0, 1, 0], sizes = [2, 1, 128], strides = [1, 1, 1]} : vector<2x2x128xf32> to vector<2x1x128xf32>
    %25 = vector.shape_cast %24 : vector<2x1x128xf32> to vector<2x128xf32>
    %26 = vector.extract_strided_slice %15 {offsets = [0, 0, 0], sizes = [2, 1, 512], strides = [1, 1, 1]} : vector<2x8x512xf32> to vector<2x1x512xf32>
    %27 = vector.shape_cast %26 : vector<2x1x512xf32> to vector<2x512xf32>
    %28 = arith.truncf %19 : vector<2x128xf32> to vector<2x128xbf16>
    %cst_17 = arith.constant dense<0.000000e+00> : vector<2x512xf32>
    %29 = tpu.matmul %28, %1, %cst_17 {dimension_numbers = #tpu.dot_dimension_numbers<[1], [0], [0], [1], [0, 0, 1, 1], [], []>} : vector<2x128xbf16>, vector<128x512xbf16>, vector<2x512xf32> -> vector<2x512xf32>
    %30 = arith.addf %27, %29 : vector<2x512xf32>
    %31 = vector.extract_strided_slice %30 {offsets = [0, 0], sizes = [2, 384], strides = [1, 1]} : vector<2x512xf32> to vector<2x384xf32>
    %32 = arith.negf %31 : vector<2x384xf32>
    %33 = math.exp %32 : vector<2x384xf32>
    %cst_18 = arith.constant 1.000000e+00 : f32
    %34 = vector.broadcast %cst_18 : f32 to vector<2x384xf32>
    %35 = arith.addf %34, %33 : vector<2x384xf32>
    %36 = arith.divf %34, %35 : vector<2x384xf32>
    %37 = vector.extract_strided_slice %36 {offsets = [0, 0], sizes = [2, 128], strides = [1, 1]} : vector<2x384xf32> to vector<2x128xf32>
    %38 = vector.extract_strided_slice %36 {offsets = [0, 128], sizes = [2, 128], strides = [1, 1]} : vector<2x384xf32> to vector<2x128xf32>
    %39 = vector.extract_strided_slice %36 {offsets = [0, 256], sizes = [2, 128], strides = [1, 1]} : vector<2x384xf32> to vector<2x128xf32>
    %40 = vector.extract_strided_slice %30 {offsets = [0, 384], sizes = [2, 128], strides = [1, 1]} : vector<2x512xf32> to vector<2x128xf32>
    %41 = math.tanh %40 : vector<2x128xf32>
    %42 = arith.mulf %38, %21 : vector<2x128xf32>
    %43 = arith.mulf %37, %41 : vector<2x128xf32>
    %44 = arith.addf %42, %43 : vector<2x128xf32>
    %45 = math.tanh %44 : vector<2x128xf32>
    %46 = arith.mulf %39, %45 : vector<2x128xf32>
    %47 = tpu.concatenate %46, %23 in 1 : vector<2x128xf32>, vector<2x128xf32> -> vector<2x256xf32>
    %48 = arith.truncf %47 : vector<2x256xf32> to vector<2x256xbf16>
    %cst_19 = arith.constant dense<0.000000e+00> : vector<2x512xf32>
    %49 = tpu.matmul %48, %2, %cst_19 {dimension_numbers = #tpu.dot_dimension_numbers<[1], [0], [0], [1], [0, 0, 1, 1], [], []>} : vector<2x256xbf16>, vector<256x512xbf16>, vector<2x512xf32> -> vector<2x512xf32>
    %50 = arith.addf %49, %7 : vector<2x512xf32>
    %51 = vector.extract_strided_slice %50 {offsets = [0, 0], sizes = [2, 384], strides = [1, 1]} : vector<2x512xf32> to vector<2x384xf32>
    %52 = arith.negf %51 : vector<2x384xf32>
    %53 = math.exp %52 : vector<2x384xf32>
    %cst_20 = arith.constant 1.000000e+00 : f32
    %54 = vector.broadcast %cst_20 : f32 to vector<2x384xf32>
    %55 = arith.addf %54, %53 : vector<2x384xf32>
    %56 = arith.divf %54, %55 : vector<2x384xf32>
    %57 = vector.extract_strided_slice %56 {offsets = [0, 0], sizes = [2, 128], strides = [1, 1]} : vector<2x384xf32> to vector<2x128xf32>
    %58 = vector.extract_strided_slice %56 {offsets = [0, 128], sizes = [2, 128], strides = [1, 1]} : vector<2x384xf32> to vector<2x128xf32>
    %59 = vector.extract_strided_slice %56 {offsets = [0, 256], sizes = [2, 128], strides = [1, 1]} : vector<2x384xf32> to vector<2x128xf32>
    %60 = vector.extract_strided_slice %50 {offsets = [0, 384], sizes = [2, 128], strides = [1, 1]} : vector<2x512xf32> to vector<2x128xf32>
    %61 = math.tanh %60 : vector<2x128xf32>
    %62 = arith.mulf %58, %25 : vector<2x128xf32>
    %63 = arith.mulf %57, %61 : vector<2x128xf32>
    %64 = arith.addf %62, %63 : vector<2x128xf32>
    %65 = math.tanh %64 : vector<2x128xf32>
    %66 = arith.mulf %59, %65 : vector<2x128xf32>
    %67 = vector.extract_strided_slice %15 {offsets = [0, 1, 0], sizes = [2, 1, 512], strides = [1, 1, 1]} : vector<2x8x512xf32> to vector<2x1x512xf32>
    %68 = vector.shape_cast %67 : vector<2x1x512xf32> to vector<2x512xf32>
    %69 = arith.truncf %46 : vector<2x128xf32> to vector<2x128xbf16>
    %cst_21 = arith.constant dense<0.000000e+00> : vector<2x512xf32>
    %70 = tpu.matmul %69, %1, %cst_21 {dimension_numbers = #tpu.dot_dimension_numbers<[1], [0], [0], [1], [0, 0, 1, 1], [], []>} : vector<2x128xbf16>, vector<128x512xbf16>, vector<2x512xf32> -> vector<2x512xf32>
    %71 = arith.addf %68, %70 : vector<2x512xf32>
    %72 = vector.extract_strided_slice %71 {offsets = [0, 0], sizes = [2, 384], strides = [1, 1]} : vector<2x512xf32> to vector<2x384xf32>
    %73 = arith.negf %72 : vector<2x384xf32>
    %74 = math.exp %73 : vector<2x384xf32>
    %cst_22 = arith.constant 1.000000e+00 : f32
    %75 = vector.broadcast %cst_22 : f32 to vector<2x384xf32>
    %76 = arith.addf %75, %74 : vector<2x384xf32>
    %77 = arith.divf %75, %76 : vector<2x384xf32>
    %78 = vector.extract_strided_slice %77 {offsets = [0, 0], sizes = [2, 128], strides = [1, 1]} : vector<2x384xf32> to vector<2x128xf32>
    %79 = vector.extract_strided_slice %77 {offsets = [0, 128], sizes = [2, 128], strides = [1, 1]} : vector<2x384xf32> to vector<2x128xf32>
    %80 = vector.extract_strided_slice %77 {offsets = [0, 256], sizes = [2, 128], strides = [1, 1]} : vector<2x384xf32> to vector<2x128xf32>
    %81 = vector.extract_strided_slice %71 {offsets = [0, 384], sizes = [2, 128], strides = [1, 1]} : vector<2x512xf32> to vector<2x128xf32>
    %82 = math.tanh %81 : vector<2x128xf32>
    %83 = arith.mulf %79, %44 : vector<2x128xf32>
    %84 = arith.mulf %78, %82 : vector<2x128xf32>
    %85 = arith.addf %83, %84 : vector<2x128xf32>
    %86 = math.tanh %85 : vector<2x128xf32>
    %87 = arith.mulf %80, %86 : vector<2x128xf32>
    %88 = tpu.concatenate %87, %66 in 1 : vector<2x128xf32>, vector<2x128xf32> -> vector<2x256xf32>
    %89 = arith.truncf %88 : vector<2x256xf32> to vector<2x256xbf16>
    %cst_23 = arith.constant dense<0.000000e+00> : vector<2x512xf32>
    %90 = tpu.matmul %89, %2, %cst_23 {dimension_numbers = #tpu.dot_dimension_numbers<[1], [0], [0], [1], [0, 0, 1, 1], [], []>} : vector<2x256xbf16>, vector<256x512xbf16>, vector<2x512xf32> -> vector<2x512xf32>
    %91 = arith.addf %90, %7 : vector<2x512xf32>
    %92 = vector.extract_strided_slice %91 {offsets = [0, 0], sizes = [2, 384], strides = [1, 1]} : vector<2x512xf32> to vector<2x384xf32>
    %93 = arith.negf %92 : vector<2x384xf32>
    %94 = math.exp %93 : vector<2x384xf32>
    %cst_24 = arith.constant 1.000000e+00 : f32
    %95 = vector.broadcast %cst_24 : f32 to vector<2x384xf32>
    %96 = arith.addf %95, %94 : vector<2x384xf32>
    %97 = arith.divf %95, %96 : vector<2x384xf32>
    %98 = vector.extract_strided_slice %97 {offsets = [0, 0], sizes = [2, 128], strides = [1, 1]} : vector<2x384xf32> to vector<2x128xf32>
    %99 = vector.extract_strided_slice %97 {offsets = [0, 128], sizes = [2, 128], strides = [1, 1]} : vector<2x384xf32> to vector<2x128xf32>
    %100 = vector.extract_strided_slice %97 {offsets = [0, 256], sizes = [2, 128], strides = [1, 1]} : vector<2x384xf32> to vector<2x128xf32>
    %101 = vector.extract_strided_slice %91 {offsets = [0, 384], sizes = [2, 128], strides = [1, 1]} : vector<2x512xf32> to vector<2x128xf32>
    %102 = math.tanh %101 : vector<2x128xf32>
    %103 = arith.mulf %99, %64 : vector<2x128xf32>
    %104 = arith.mulf %98, %102 : vector<2x128xf32>
    %105 = arith.addf %103, %104 : vector<2x128xf32>
    %106 = math.tanh %105 : vector<2x128xf32>
    %107 = arith.mulf %100, %106 : vector<2x128xf32>
    %108 = vector.extract_strided_slice %15 {offsets = [0, 2, 0], sizes = [2, 1, 512], strides = [1, 1, 1]} : vector<2x8x512xf32> to vector<2x1x512xf32>
    %109 = vector.shape_cast %108 : vector<2x1x512xf32> to vector<2x512xf32>
    %110 = arith.truncf %87 : vector<2x128xf32> to vector<2x128xbf16>
    %cst_25 = arith.constant dense<0.000000e+00> : vector<2x512xf32>
    %111 = tpu.matmul %110, %1, %cst_25 {dimension_numbers = #tpu.dot_dimension_numbers<[1], [0], [0], [1], [0, 0, 1, 1], [], []>} : vector<2x128xbf16>, vector<128x512xbf16>, vector<2x512xf32> -> vector<2x512xf32>
    %112 = arith.addf %109, %111 : vector<2x512xf32>
    %113 = vector.extract_strided_slice %112 {offsets = [0, 0], sizes = [2, 384], strides = [1, 1]} : vector<2x512xf32> to vector<2x384xf32>
    %114 = arith.negf %113 : vector<2x384xf32>
    %115 = math.exp %114 : vector<2x384xf32>
    %cst_26 = arith.constant 1.000000e+00 : f32
    %116 = vector.broadcast %cst_26 : f32 to vector<2x384xf32>
    %117 = arith.addf %116, %115 : vector<2x384xf32>
    %118 = arith.divf %116, %117 : vector<2x384xf32>
    %119 = vector.extract_strided_slice %118 {offsets = [0, 0], sizes = [2, 128], strides = [1, 1]} : vector<2x384xf32> to vector<2x128xf32>
    %120 = vector.extract_strided_slice %118 {offsets = [0, 128], sizes = [2, 128], strides = [1, 1]} : vector<2x384xf32> to vector<2x128xf32>
    %121 = vector.extract_strided_slice %118 {offsets = [0, 256], sizes = [2, 128], strides = [1, 1]} : vector<2x384xf32> to vector<2x128xf32>
    %122 = vector.extract_strided_slice %112 {offsets = [0, 384], sizes = [2, 128], strides = [1, 1]} : vector<2x512xf32> to vector<2x128xf32>
    %123 = math.tanh %122 : vector<2x128xf32>
    %124 = arith.mulf %120, %85 : vector<2x128xf32>
    %125 = arith.mulf %119, %123 : vector<2x128xf32>
    %126 = arith.addf %124, %125 : vector<2x128xf32>
    %127 = math.tanh %126 : vector<2x128xf32>
    %128 = arith.mulf %121, %127 : vector<2x128xf32>
    %129 = tpu.concatenate %128, %107 in 1 : vector<2x128xf32>, vector<2x128xf32> -> vector<2x256xf32>
    %130 = arith.truncf %129 : vector<2x256xf32> to vector<2x256xbf16>
    %cst_27 = arith.constant dense<0.000000e+00> : vector<2x512xf32>
    %131 = tpu.matmul %130, %2, %cst_27 {dimension_numbers = #tpu.dot_dimension_numbers<[1], [0], [0], [1], [0, 0, 1, 1], [], []>} : vector<2x256xbf16>, vector<256x512xbf16>, vector<2x512xf32> -> vector<2x512xf32>
    %132 = arith.addf %131, %7 : vector<2x512xf32>
    %133 = vector.extract_strided_slice %132 {offsets = [0, 0], sizes = [2, 384], strides = [1, 1]} : vector<2x512xf32> to vector<2x384xf32>
    %134 = arith.negf %133 : vector<2x384xf32>
    %135 = math.exp %134 : vector<2x384xf32>
    %cst_28 = arith.constant 1.000000e+00 : f32
    %136 = vector.broadcast %cst_28 : f32 to vector<2x384xf32>
    %137 = arith.addf %136, %135 : vector<2x384xf32>
    %138 = arith.divf %136, %137 : vector<2x384xf32>
    %139 = vector.extract_strided_slice %138 {offsets = [0, 0], sizes = [2, 128], strides = [1, 1]} : vector<2x384xf32> to vector<2x128xf32>
    %140 = vector.extract_strided_slice %138 {offsets = [0, 128], sizes = [2, 128], strides = [1, 1]} : vector<2x384xf32> to vector<2x128xf32>
    %141 = vector.extract_strided_slice %138 {offsets = [0, 256], sizes = [2, 128], strides = [1, 1]} : vector<2x384xf32> to vector<2x128xf32>
    %142 = vector.extract_strided_slice %132 {offsets = [0, 384], sizes = [2, 128], strides = [1, 1]} : vector<2x512xf32> to vector<2x128xf32>
    %143 = math.tanh %142 : vector<2x128xf32>
    %144 = arith.mulf %140, %105 : vector<2x128xf32>
    %145 = arith.mulf %139, %143 : vector<2x128xf32>
    %146 = arith.addf %144, %145 : vector<2x128xf32>
    %147 = math.tanh %146 : vector<2x128xf32>
    %148 = arith.mulf %141, %147 : vector<2x128xf32>
    %149 = vector.extract_strided_slice %15 {offsets = [0, 3, 0], sizes = [2, 1, 512], strides = [1, 1, 1]} : vector<2x8x512xf32> to vector<2x1x512xf32>
    %150 = vector.shape_cast %149 : vector<2x1x512xf32> to vector<2x512xf32>
    %151 = arith.truncf %128 : vector<2x128xf32> to vector<2x128xbf16>
    %cst_29 = arith.constant dense<0.000000e+00> : vector<2x512xf32>
    %152 = tpu.matmul %151, %1, %cst_29 {dimension_numbers = #tpu.dot_dimension_numbers<[1], [0], [0], [1], [0, 0, 1, 1], [], []>} : vector<2x128xbf16>, vector<128x512xbf16>, vector<2x512xf32> -> vector<2x512xf32>
    %153 = arith.addf %150, %152 : vector<2x512xf32>
    %154 = vector.extract_strided_slice %153 {offsets = [0, 0], sizes = [2, 384], strides = [1, 1]} : vector<2x512xf32> to vector<2x384xf32>
    %155 = arith.negf %154 : vector<2x384xf32>
    %156 = math.exp %155 : vector<2x384xf32>
    %cst_30 = arith.constant 1.000000e+00 : f32
    %157 = vector.broadcast %cst_30 : f32 to vector<2x384xf32>
    %158 = arith.addf %157, %156 : vector<2x384xf32>
    %159 = arith.divf %157, %158 : vector<2x384xf32>
    %160 = vector.extract_strided_slice %159 {offsets = [0, 0], sizes = [2, 128], strides = [1, 1]} : vector<2x384xf32> to vector<2x128xf32>
    %161 = vector.extract_strided_slice %159 {offsets = [0, 128], sizes = [2, 128], strides = [1, 1]} : vector<2x384xf32> to vector<2x128xf32>
    %162 = vector.extract_strided_slice %159 {offsets = [0, 256], sizes = [2, 128], strides = [1, 1]} : vector<2x384xf32> to vector<2x128xf32>
    %163 = vector.extract_strided_slice %153 {offsets = [0, 384], sizes = [2, 128], strides = [1, 1]} : vector<2x512xf32> to vector<2x128xf32>
    %164 = math.tanh %163 : vector<2x128xf32>
    %165 = arith.mulf %161, %126 : vector<2x128xf32>
    %166 = arith.mulf %160, %164 : vector<2x128xf32>
    %167 = arith.addf %165, %166 : vector<2x128xf32>
    %168 = math.tanh %167 : vector<2x128xf32>
    %169 = arith.mulf %162, %168 : vector<2x128xf32>
    %170 = tpu.concatenate %169, %148 in 1 : vector<2x128xf32>, vector<2x128xf32> -> vector<2x256xf32>
    %171 = arith.truncf %170 : vector<2x256xf32> to vector<2x256xbf16>
    %cst_31 = arith.constant dense<0.000000e+00> : vector<2x512xf32>
    %172 = tpu.matmul %171, %2, %cst_31 {dimension_numbers = #tpu.dot_dimension_numbers<[1], [0], [0], [1], [0, 0, 1, 1], [], []>} : vector<2x256xbf16>, vector<256x512xbf16>, vector<2x512xf32> -> vector<2x512xf32>
    %173 = arith.addf %172, %7 : vector<2x512xf32>
    %174 = vector.extract_strided_slice %173 {offsets = [0, 0], sizes = [2, 384], strides = [1, 1]} : vector<2x512xf32> to vector<2x384xf32>
    %175 = arith.negf %174 : vector<2x384xf32>
    %176 = math.exp %175 : vector<2x384xf32>
    %cst_32 = arith.constant 1.000000e+00 : f32
    %177 = vector.broadcast %cst_32 : f32 to vector<2x384xf32>
    %178 = arith.addf %177, %176 : vector<2x384xf32>
    %179 = arith.divf %177, %178 : vector<2x384xf32>
    %180 = vector.extract_strided_slice %179 {offsets = [0, 0], sizes = [2, 128], strides = [1, 1]} : vector<2x384xf32> to vector<2x128xf32>
    %181 = vector.extract_strided_slice %179 {offsets = [0, 128], sizes = [2, 128], strides = [1, 1]} : vector<2x384xf32> to vector<2x128xf32>
    %182 = vector.extract_strided_slice %179 {offsets = [0, 256], sizes = [2, 128], strides = [1, 1]} : vector<2x384xf32> to vector<2x128xf32>
    %183 = vector.extract_strided_slice %173 {offsets = [0, 384], sizes = [2, 128], strides = [1, 1]} : vector<2x512xf32> to vector<2x128xf32>
    %184 = math.tanh %183 : vector<2x128xf32>
    %185 = arith.mulf %181, %146 : vector<2x128xf32>
    %186 = arith.mulf %180, %184 : vector<2x128xf32>
    %187 = arith.addf %185, %186 : vector<2x128xf32>
    %188 = math.tanh %187 : vector<2x128xf32>
    %189 = arith.mulf %182, %188 : vector<2x128xf32>
    %190 = vector.extract_strided_slice %15 {offsets = [0, 4, 0], sizes = [2, 1, 512], strides = [1, 1, 1]} : vector<2x8x512xf32> to vector<2x1x512xf32>
    %191 = vector.shape_cast %190 : vector<2x1x512xf32> to vector<2x512xf32>
    %192 = arith.truncf %169 : vector<2x128xf32> to vector<2x128xbf16>
    %cst_33 = arith.constant dense<0.000000e+00> : vector<2x512xf32>
    %193 = tpu.matmul %192, %1, %cst_33 {dimension_numbers = #tpu.dot_dimension_numbers<[1], [0], [0], [1], [0, 0, 1, 1], [], []>} : vector<2x128xbf16>, vector<128x512xbf16>, vector<2x512xf32> -> vector<2x512xf32>
    %194 = arith.addf %191, %193 : vector<2x512xf32>
    %195 = vector.extract_strided_slice %194 {offsets = [0, 0], sizes = [2, 384], strides = [1, 1]} : vector<2x512xf32> to vector<2x384xf32>
    %196 = arith.negf %195 : vector<2x384xf32>
    %197 = math.exp %196 : vector<2x384xf32>
    %cst_34 = arith.constant 1.000000e+00 : f32
    %198 = vector.broadcast %cst_34 : f32 to vector<2x384xf32>
    %199 = arith.addf %198, %197 : vector<2x384xf32>
    %200 = arith.divf %198, %199 : vector<2x384xf32>
    %201 = vector.extract_strided_slice %200 {offsets = [0, 0], sizes = [2, 128], strides = [1, 1]} : vector<2x384xf32> to vector<2x128xf32>
    %202 = vector.extract_strided_slice %200 {offsets = [0, 128], sizes = [2, 128], strides = [1, 1]} : vector<2x384xf32> to vector<2x128xf32>
    %203 = vector.extract_strided_slice %200 {offsets = [0, 256], sizes = [2, 128], strides = [1, 1]} : vector<2x384xf32> to vector<2x128xf32>
    %204 = vector.extract_strided_slice %194 {offsets = [0, 384], sizes = [2, 128], strides = [1, 1]} : vector<2x512xf32> to vector<2x128xf32>
    %205 = math.tanh %204 : vector<2x128xf32>
    %206 = arith.mulf %202, %167 : vector<2x128xf32>
    %207 = arith.mulf %201, %205 : vector<2x128xf32>
    %208 = arith.addf %206, %207 : vector<2x128xf32>
    %209 = math.tanh %208 : vector<2x128xf32>
    %210 = arith.mulf %203, %209 : vector<2x128xf32>
    %211 = tpu.concatenate %210, %189 in 1 : vector<2x128xf32>, vector<2x128xf32> -> vector<2x256xf32>
    %212 = arith.truncf %211 : vector<2x256xf32> to vector<2x256xbf16>
    %cst_35 = arith.constant dense<0.000000e+00> : vector<2x512xf32>
    %213 = tpu.matmul %212, %2, %cst_35 {dimension_numbers = #tpu.dot_dimension_numbers<[1], [0], [0], [1], [0, 0, 1, 1], [], []>} : vector<2x256xbf16>, vector<256x512xbf16>, vector<2x512xf32> -> vector<2x512xf32>
    %214 = arith.addf %213, %7 : vector<2x512xf32>
    %215 = vector.extract_strided_slice %214 {offsets = [0, 0], sizes = [2, 384], strides = [1, 1]} : vector<2x512xf32> to vector<2x384xf32>
    %216 = arith.negf %215 : vector<2x384xf32>
    %217 = math.exp %216 : vector<2x384xf32>
    %cst_36 = arith.constant 1.000000e+00 : f32
    %218 = vector.broadcast %cst_36 : f32 to vector<2x384xf32>
    %219 = arith.addf %218, %217 : vector<2x384xf32>
    %220 = arith.divf %218, %219 : vector<2x384xf32>
    %221 = vector.extract_strided_slice %220 {offsets = [0, 0], sizes = [2, 128], strides = [1, 1]} : vector<2x384xf32> to vector<2x128xf32>
    %222 = vector.extract_strided_slice %220 {offsets = [0, 128], sizes = [2, 128], strides = [1, 1]} : vector<2x384xf32> to vector<2x128xf32>
    %223 = vector.extract_strided_slice %220 {offsets = [0, 256], sizes = [2, 128], strides = [1, 1]} : vector<2x384xf32> to vector<2x128xf32>
    %224 = vector.extract_strided_slice %214 {offsets = [0, 384], sizes = [2, 128], strides = [1, 1]} : vector<2x512xf32> to vector<2x128xf32>
    %225 = math.tanh %224 : vector<2x128xf32>
    %226 = arith.mulf %222, %187 : vector<2x128xf32>
    %227 = arith.mulf %221, %225 : vector<2x128xf32>
    %228 = arith.addf %226, %227 : vector<2x128xf32>
    %229 = math.tanh %228 : vector<2x128xf32>
    %230 = arith.mulf %223, %229 : vector<2x128xf32>
    %231 = vector.extract_strided_slice %15 {offsets = [0, 5, 0], sizes = [2, 1, 512], strides = [1, 1, 1]} : vector<2x8x512xf32> to vector<2x1x512xf32>
    %232 = vector.shape_cast %231 : vector<2x1x512xf32> to vector<2x512xf32>
    %233 = arith.truncf %210 : vector<2x128xf32> to vector<2x128xbf16>
    %cst_37 = arith.constant dense<0.000000e+00> : vector<2x512xf32>
    %234 = tpu.matmul %233, %1, %cst_37 {dimension_numbers = #tpu.dot_dimension_numbers<[1], [0], [0], [1], [0, 0, 1, 1], [], []>} : vector<2x128xbf16>, vector<128x512xbf16>, vector<2x512xf32> -> vector<2x512xf32>
    %235 = arith.addf %232, %234 : vector<2x512xf32>
    %236 = vector.extract_strided_slice %235 {offsets = [0, 0], sizes = [2, 384], strides = [1, 1]} : vector<2x512xf32> to vector<2x384xf32>
    %237 = arith.negf %236 : vector<2x384xf32>
    %238 = math.exp %237 : vector<2x384xf32>
    %cst_38 = arith.constant 1.000000e+00 : f32
    %239 = vector.broadcast %cst_38 : f32 to vector<2x384xf32>
    %240 = arith.addf %239, %238 : vector<2x384xf32>
    %241 = arith.divf %239, %240 : vector<2x384xf32>
    %242 = vector.extract_strided_slice %241 {offsets = [0, 0], sizes = [2, 128], strides = [1, 1]} : vector<2x384xf32> to vector<2x128xf32>
    %243 = vector.extract_strided_slice %241 {offsets = [0, 128], sizes = [2, 128], strides = [1, 1]} : vector<2x384xf32> to vector<2x128xf32>
    %244 = vector.extract_strided_slice %241 {offsets = [0, 256], sizes = [2, 128], strides = [1, 1]} : vector<2x384xf32> to vector<2x128xf32>
    %245 = vector.extract_strided_slice %235 {offsets = [0, 384], sizes = [2, 128], strides = [1, 1]} : vector<2x512xf32> to vector<2x128xf32>
    %246 = math.tanh %245 : vector<2x128xf32>
    %247 = arith.mulf %243, %208 : vector<2x128xf32>
    %248 = arith.mulf %242, %246 : vector<2x128xf32>
    %249 = arith.addf %247, %248 : vector<2x128xf32>
    %250 = math.tanh %249 : vector<2x128xf32>
    %251 = arith.mulf %244, %250 : vector<2x128xf32>
    %252 = tpu.concatenate %251, %230 in 1 : vector<2x128xf32>, vector<2x128xf32> -> vector<2x256xf32>
    %253 = arith.truncf %252 : vector<2x256xf32> to vector<2x256xbf16>
    %cst_39 = arith.constant dense<0.000000e+00> : vector<2x512xf32>
    %254 = tpu.matmul %253, %2, %cst_39 {dimension_numbers = #tpu.dot_dimension_numbers<[1], [0], [0], [1], [0, 0, 1, 1], [], []>} : vector<2x256xbf16>, vector<256x512xbf16>, vector<2x512xf32> -> vector<2x512xf32>
    %255 = arith.addf %254, %7 : vector<2x512xf32>
    %256 = vector.extract_strided_slice %255 {offsets = [0, 0], sizes = [2, 384], strides = [1, 1]} : vector<2x512xf32> to vector<2x384xf32>
    %257 = arith.negf %256 : vector<2x384xf32>
    %258 = math.exp %257 : vector<2x384xf32>
    %cst_40 = arith.constant 1.000000e+00 : f32
    %259 = vector.broadcast %cst_40 : f32 to vector<2x384xf32>
    %260 = arith.addf %259, %258 : vector<2x384xf32>
    %261 = arith.divf %259, %260 : vector<2x384xf32>
    %262 = vector.extract_strided_slice %261 {offsets = [0, 0], sizes = [2, 128], strides = [1, 1]} : vector<2x384xf32> to vector<2x128xf32>
    %263 = vector.extract_strided_slice %261 {offsets = [0, 128], sizes = [2, 128], strides = [1, 1]} : vector<2x384xf32> to vector<2x128xf32>
    %264 = vector.extract_strided_slice %261 {offsets = [0, 256], sizes = [2, 128], strides = [1, 1]} : vector<2x384xf32> to vector<2x128xf32>
    %265 = vector.extract_strided_slice %255 {offsets = [0, 384], sizes = [2, 128], strides = [1, 1]} : vector<2x512xf32> to vector<2x128xf32>
    %266 = math.tanh %265 : vector<2x128xf32>
    %267 = arith.mulf %263, %228 : vector<2x128xf32>
    %268 = arith.mulf %262, %266 : vector<2x128xf32>
    %269 = arith.addf %267, %268 : vector<2x128xf32>
    %270 = math.tanh %269 : vector<2x128xf32>
    %271 = arith.mulf %264, %270 : vector<2x128xf32>
    %272 = vector.extract_strided_slice %15 {offsets = [0, 6, 0], sizes = [2, 1, 512], strides = [1, 1, 1]} : vector<2x8x512xf32> to vector<2x1x512xf32>
    %273 = vector.shape_cast %272 : vector<2x1x512xf32> to vector<2x512xf32>
    %274 = arith.truncf %251 : vector<2x128xf32> to vector<2x128xbf16>
    %cst_41 = arith.constant dense<0.000000e+00> : vector<2x512xf32>
    %275 = tpu.matmul %274, %1, %cst_41 {dimension_numbers = #tpu.dot_dimension_numbers<[1], [0], [0], [1], [0, 0, 1, 1], [], []>} : vector<2x128xbf16>, vector<128x512xbf16>, vector<2x512xf32> -> vector<2x512xf32>
    %276 = arith.addf %273, %275 : vector<2x512xf32>
    %277 = vector.extract_strided_slice %276 {offsets = [0, 0], sizes = [2, 384], strides = [1, 1]} : vector<2x512xf32> to vector<2x384xf32>
    %278 = arith.negf %277 : vector<2x384xf32>
    %279 = math.exp %278 : vector<2x384xf32>
    %cst_42 = arith.constant 1.000000e+00 : f32
    %280 = vector.broadcast %cst_42 : f32 to vector<2x384xf32>
    %281 = arith.addf %280, %279 : vector<2x384xf32>
    %282 = arith.divf %280, %281 : vector<2x384xf32>
    %283 = vector.extract_strided_slice %282 {offsets = [0, 0], sizes = [2, 128], strides = [1, 1]} : vector<2x384xf32> to vector<2x128xf32>
    %284 = vector.extract_strided_slice %282 {offsets = [0, 128], sizes = [2, 128], strides = [1, 1]} : vector<2x384xf32> to vector<2x128xf32>
    %285 = vector.extract_strided_slice %282 {offsets = [0, 256], sizes = [2, 128], strides = [1, 1]} : vector<2x384xf32> to vector<2x128xf32>
    %286 = vector.extract_strided_slice %276 {offsets = [0, 384], sizes = [2, 128], strides = [1, 1]} : vector<2x512xf32> to vector<2x128xf32>
    %287 = math.tanh %286 : vector<2x128xf32>
    %288 = arith.mulf %284, %249 : vector<2x128xf32>
    %289 = arith.mulf %283, %287 : vector<2x128xf32>
    %290 = arith.addf %288, %289 : vector<2x128xf32>
    %291 = math.tanh %290 : vector<2x128xf32>
    %292 = arith.mulf %285, %291 : vector<2x128xf32>
    %293 = tpu.concatenate %292, %271 in 1 : vector<2x128xf32>, vector<2x128xf32> -> vector<2x256xf32>
    %294 = arith.truncf %293 : vector<2x256xf32> to vector<2x256xbf16>
    %cst_43 = arith.constant dense<0.000000e+00> : vector<2x512xf32>
    %295 = tpu.matmul %294, %2, %cst_43 {dimension_numbers = #tpu.dot_dimension_numbers<[1], [0], [0], [1], [0, 0, 1, 1], [], []>} : vector<2x256xbf16>, vector<256x512xbf16>, vector<2x512xf32> -> vector<2x512xf32>
    %296 = arith.addf %295, %7 : vector<2x512xf32>
    %297 = vector.extract_strided_slice %296 {offsets = [0, 0], sizes = [2, 384], strides = [1, 1]} : vector<2x512xf32> to vector<2x384xf32>
    %298 = arith.negf %297 : vector<2x384xf32>
    %299 = math.exp %298 : vector<2x384xf32>
    %cst_44 = arith.constant 1.000000e+00 : f32
    %300 = vector.broadcast %cst_44 : f32 to vector<2x384xf32>
    %301 = arith.addf %300, %299 : vector<2x384xf32>
    %302 = arith.divf %300, %301 : vector<2x384xf32>
    %303 = vector.extract_strided_slice %302 {offsets = [0, 0], sizes = [2, 128], strides = [1, 1]} : vector<2x384xf32> to vector<2x128xf32>
    %304 = vector.extract_strided_slice %302 {offsets = [0, 128], sizes = [2, 128], strides = [1, 1]} : vector<2x384xf32> to vector<2x128xf32>
    %305 = vector.extract_strided_slice %302 {offsets = [0, 256], sizes = [2, 128], strides = [1, 1]} : vector<2x384xf32> to vector<2x128xf32>
    %306 = vector.extract_strided_slice %296 {offsets = [0, 384], sizes = [2, 128], strides = [1, 1]} : vector<2x512xf32> to vector<2x128xf32>
    %307 = math.tanh %306 : vector<2x128xf32>
    %308 = arith.mulf %304, %269 : vector<2x128xf32>
    %309 = arith.mulf %303, %307 : vector<2x128xf32>
    %310 = arith.addf %308, %309 : vector<2x128xf32>
    %311 = math.tanh %310 : vector<2x128xf32>
    %312 = arith.mulf %305, %311 : vector<2x128xf32>
    %313 = vector.extract_strided_slice %15 {offsets = [0, 7, 0], sizes = [2, 1, 512], strides = [1, 1, 1]} : vector<2x8x512xf32> to vector<2x1x512xf32>
    %314 = vector.shape_cast %313 : vector<2x1x512xf32> to vector<2x512xf32>
    %315 = arith.truncf %292 : vector<2x128xf32> to vector<2x128xbf16>
    %cst_45 = arith.constant dense<0.000000e+00> : vector<2x512xf32>
    %316 = tpu.matmul %315, %1, %cst_45 {dimension_numbers = #tpu.dot_dimension_numbers<[1], [0], [0], [1], [0, 0, 1, 1], [], []>} : vector<2x128xbf16>, vector<128x512xbf16>, vector<2x512xf32> -> vector<2x512xf32>
    %317 = arith.addf %314, %316 : vector<2x512xf32>
    %318 = vector.extract_strided_slice %317 {offsets = [0, 0], sizes = [2, 384], strides = [1, 1]} : vector<2x512xf32> to vector<2x384xf32>
    %319 = arith.negf %318 : vector<2x384xf32>
    %320 = math.exp %319 : vector<2x384xf32>
    %cst_46 = arith.constant 1.000000e+00 : f32
    %321 = vector.broadcast %cst_46 : f32 to vector<2x384xf32>
    %322 = arith.addf %321, %320 : vector<2x384xf32>
    %323 = arith.divf %321, %322 : vector<2x384xf32>
    %324 = vector.extract_strided_slice %323 {offsets = [0, 0], sizes = [2, 128], strides = [1, 1]} : vector<2x384xf32> to vector<2x128xf32>
    %325 = vector.extract_strided_slice %323 {offsets = [0, 128], sizes = [2, 128], strides = [1, 1]} : vector<2x384xf32> to vector<2x128xf32>
    %326 = vector.extract_strided_slice %323 {offsets = [0, 256], sizes = [2, 128], strides = [1, 1]} : vector<2x384xf32> to vector<2x128xf32>
    %327 = vector.extract_strided_slice %317 {offsets = [0, 384], sizes = [2, 128], strides = [1, 1]} : vector<2x512xf32> to vector<2x128xf32>
    %328 = math.tanh %327 : vector<2x128xf32>
    %329 = arith.mulf %325, %290 : vector<2x128xf32>
    %330 = arith.mulf %324, %328 : vector<2x128xf32>
    %331 = arith.addf %329, %330 : vector<2x128xf32>
    %332 = math.tanh %331 : vector<2x128xf32>
    %333 = arith.mulf %326, %332 : vector<2x128xf32>
    %334 = tpu.concatenate %333, %312 in 1 : vector<2x128xf32>, vector<2x128xf32> -> vector<2x256xf32>
    %335 = arith.truncf %334 : vector<2x256xf32> to vector<2x256xbf16>
    %cst_47 = arith.constant dense<0.000000e+00> : vector<2x512xf32>
    %336 = tpu.matmul %335, %2, %cst_47 {dimension_numbers = #tpu.dot_dimension_numbers<[1], [0], [0], [1], [0, 0, 1, 1], [], []>} : vector<2x256xbf16>, vector<256x512xbf16>, vector<2x512xf32> -> vector<2x512xf32>
    %337 = arith.addf %336, %7 : vector<2x512xf32>
    %338 = vector.extract_strided_slice %337 {offsets = [0, 0], sizes = [2, 384], strides = [1, 1]} : vector<2x512xf32> to vector<2x384xf32>
    %339 = arith.negf %338 : vector<2x384xf32>
    %340 = math.exp %339 : vector<2x384xf32>
    %cst_48 = arith.constant 1.000000e+00 : f32
    %341 = vector.broadcast %cst_48 : f32 to vector<2x384xf32>
    %342 = arith.addf %341, %340 : vector<2x384xf32>
    %343 = arith.divf %341, %342 : vector<2x384xf32>
    %344 = vector.extract_strided_slice %343 {offsets = [0, 0], sizes = [2, 128], strides = [1, 1]} : vector<2x384xf32> to vector<2x128xf32>
    %345 = vector.extract_strided_slice %343 {offsets = [0, 128], sizes = [2, 128], strides = [1, 1]} : vector<2x384xf32> to vector<2x128xf32>
    %346 = vector.extract_strided_slice %343 {offsets = [0, 256], sizes = [2, 128], strides = [1, 1]} : vector<2x384xf32> to vector<2x128xf32>
    %347 = vector.extract_strided_slice %337 {offsets = [0, 384], sizes = [2, 128], strides = [1, 1]} : vector<2x512xf32> to vector<2x128xf32>
    %348 = math.tanh %347 : vector<2x128xf32>
    %349 = arith.mulf %345, %310 : vector<2x128xf32>
    %350 = arith.mulf %344, %348 : vector<2x128xf32>
    %351 = arith.addf %349, %350 : vector<2x128xf32>
    %352 = math.tanh %351 : vector<2x128xf32>
    %353 = arith.mulf %346, %352 : vector<2x128xf32>
    %354 = arith.truncf %353 : vector<2x128xf32> to vector<2x128xbf16>
    %cst_49 = arith.constant dense<0.000000e+00> : vector<2x256xf32>
    %355 = tpu.matmul %354, %3, %cst_49 {dimension_numbers = #tpu.dot_dimension_numbers<[1], [0], [0], [1], [0, 0, 1, 1], [], []>} : vector<2x128xbf16>, vector<128x256xbf16>, vector<2x256xf32> -> vector<2x256xf32>
    %356 = vector.broadcast %8 : vector<1x256xf32> to vector<2x256xf32>
    %357 = arith.addf %355, %356 : vector<2x256xf32>
    %c0_50 = arith.constant 0 : index
    %c0_51 = arith.constant 0 : index
    %358 = vector.load %arg5[%c0_50, %c0_51] : memref<2x256xf32, #tpu.memory_space<vmem>>, vector<2x256xf32>
    tpu.vector_store %arg5[%c0_50, %c0_51], %357 {strides = array<i32>} : memref<2x256xf32, #tpu.memory_space<vmem>>, vector<2x256xf32>,
    %359 = vector.shape_cast %333 : vector<2x128xf32> to vector<2x1x128xf32>
    %360 = vector.shape_cast %353 : vector<2x128xf32> to vector<2x1x128xf32>
    %361 = tpu.concatenate %359, %360 in 1 : vector<2x1x128xf32>, vector<2x1x128xf32> -> vector<2x2x128xf32>
    %c0_52 = arith.constant 0 : index
    %c0_53 = arith.constant 0 : index
    %c0_54 = arith.constant 0 : index
    %362 = vector.load %arg6[%c0_52, %c0_53, %c0_54] : memref<2x2x128xf32, #tpu.memory_space<vmem>>, vector<2x2x128xf32>
    tpu.vector_store %arg6[%c0_52, %c0_53, %c0_54], %361 {strides = array<i32>} : memref<2x2x128xf32, #tpu.memory_space<vmem>>, vector<2x2x128xf32>,
    %363 = vector.shape_cast %331 : vector<2x128xf32> to vector<2x1x128xf32>
    %364 = vector.shape_cast %351 : vector<2x128xf32> to vector<2x1x128xf32>
    %365 = tpu.concatenate %363, %364 in 1 : vector<2x1x128xf32>, vector<2x1x128xf32> -> vector<2x2x128xf32>
    %c0_55 = arith.constant 0 : index
    %c0_56 = arith.constant 0 : index
    %c0_57 = arith.constant 0 : index
    %366 = vector.load %arg7[%c0_55, %c0_56, %c0_57] : memref<2x2x128xf32, #tpu.memory_space<vmem>>, vector<2x2x128xf32>
    tpu.vector_store %arg7[%c0_55, %c0_56, %c0_57], %365 {strides = array<i32>} : memref<2x2x128xf32, #tpu.memory_space<vmem>>, vector<2x2x128xf32>,
    return
  }
}

</mosaic_0001>

<bundles_post_ra>
// kernel: embed_rnn_forward.1
= control target key start
LH: loop header
LB: loop body
LE: loop exit
PB: predicated region body
PF: predicated region fallthrough
CT: control target
= control target key end

     0   :  { %13 = vsyncpa [#allocation3], 0  ;;  %s6506_s0 = inlined_call_operand.hbm [shape: f32[2,8,64], index: 0, kind: input, shape index: {}]   ;;  %s6507_s1 = inlined_call_operand.vmem [shape: f32[2,2,128], index: 1, kind: input, shape index: {}]   ;;  %s6508_s2 = inlined_call_operand.vmem [shape: f32[2,2,128], index: 2, kind: input, shape index: {}]   ;;  %s6509_s3 = inlined_call_operand.hbm [shape: bf16[576,512], index: 3, kind: input, shape index: {}]   ;;  %s6510_s4 = inlined_call_operand.hbm [shape: f32[3,512], index: 4, kind: input, shape index: {}]   ;;  %s6511_s5 = inlined_call_operand.hbm [shape: f32[2,256], index: 5, kind: output, shape index: {0}]   ;;  %s6512_s6 = inlined_call_operand.hbm [shape: f32[2,2,128], index: 6, kind: output, shape index: {1}]   ;;  %s6513_s7 = inlined_call_operand.hbm [shape: f32[2,2,128], index: 7, kind: output, shape index: {2}]  }
   0x1   :  { %14 = vsyncpa [#allocation6], 0 }
   0x2   :  { %15 = vsyncpa [#allocation4], 0 }
   0x3   :  { %16 = vsyncpa [#allocation10], 0  ;;  %s4710_s24 = smov [#allocation5]   ;;  %s4570_s28 = scalar_lea.hbm %s6509_s3, 18432 }
   0x4   :  { %s38_s25 = sshll.u32 %s4710_s24, 4  ;;  %p4571_p0 = scmp.ne.s32.totalorder %s6509_s3, %s4570_s28  ;;  %s39_s25 = int_to_ptr.vmem [resolvable:$true] %s38_s25 }
   0x5   :  { %p4574_p1 = scmp.lt.u32.totalorder %s4570_s28, %s6509_s3 }
   0x7   :  { %p4576_p2 = pnand %p4574_p1, %p4571_p0 }
   0x9   :  { %4579 = shalt.err (!%p4576_p2)
}
   0xa   :  { %s4580_s10 = scalar_lea.vmem %s39_s25, 18432  ;;  %p4585_p4 = scmp.lt.s32.totalorder %s39_s25, %s39_s25 }
   0xb   :  { %p4581_p3 = scmp.ne.s32.totalorder %s39_s25, %s4580_s10  ;;  %p4586_p5 = scmp.lt.s32.totalorder %s4580_s10, %s4580_s10 }
   0xd   :  { %p4587_p6 = por %p4586_p5, %p4585_p4 }
   0xf   :  { %p4588_p7 = pnand %p4587_p6, %p4581_p3 }
  0x11   :  { %4591 = shalt.err (!%p4588_p7)
}
  0x12   :  { %s4711_s11 = smov 256   ;;  %s4712_s12 = smov 16  }
  0x13   :  { %44 = dma.hbm_to_vmem [thread:$0]  %s6509_s3, 18432, %s39_s25, [#allocation6], %s4711_s11, %s4711_s11, %s4712_s12  }
  0x14   :  { %s4713_s15 = smov [#allocation2]   ;;  %s4592_s19 = scalar_lea.hbm %s6506_s0, 256 }
  0x15   :  { %s22_s16 = sshll.u32 %s4713_s15, 4  ;;  %p4593_p8 = scmp.ne.s32.totalorder %s6506_s0, %s4592_s19  ;;  %s23_s16 = int_to_ptr.vmem [resolvable:$true] %s22_s16 }
  0x16   :  { %p4596_p9 = scmp.lt.u32.totalorder %s4592_s19, %s6506_s0 }
  0x18   :  { %p4598_p10 = pnand %p4596_p9, %p4593_p8 }
  0x1a   :  { %4601 = shalt.err (!%p4598_p10)
}
  0x1b   :  { %s4602_s24 = scalar_lea.vmem %s23_s16, 256  ;;  %p4607_p12 = scmp.lt.s32.totalorder %s23_s16, %s23_s16 }
  0x1c   :  { %p4603_p11 = scmp.ne.s32.totalorder %s23_s16, %s4602_s24  ;;  %p4608_p13 = scmp.lt.s32.totalorder %s4602_s24, %s4602_s24 }
  0x1e   :  { %p4609_p0 = por %p4608_p13, %p4607_p12 }
  0x20   :  { %p4610_p1 = pnand %p4609_p0, %p4603_p11 }
  0x22   :  { %4613 = shalt.err (!%p4610_p1)
}
  0x23   :  { %s4714_s3 = smov 128   ;;  %s4715_s25 = smov 8  }
  0x24   :  { %28 = dma.hbm_to_vmem [thread:$0]  %s6506_s0, 256, %s23_s16, [#allocation3], %s4714_s3, %s4714_s3, %s4715_s25  }
  0x25   :  { %s4716_s28 = smov [#allocation7]   ;;  %s4614_s9 = scalar_lea.hbm %s6510_s4, 256 }
  0x26   :  { %s51_s29 = sshll.u32 %s4716_s28, 4  ;;  %p4615_p2 = scmp.ne.s32.totalorder %s6510_s4, %s4614_s9  ;;  %s52_s29 = int_to_ptr.vmem [resolvable:$true] %s51_s29 }
  0x27   :  { %p4618_p3 = scmp.lt.u32.totalorder %s4614_s9, %s6510_s4 }
  0x29   :  { %p4620_p4 = pnand %p4618_p3, %p4615_p2 }
  0x2b   :  { %4623 = shalt.err (!%p4620_p4)
}
  0x2c   :  { %s4624_s14 = scalar_lea.vmem %s52_s29, 256  ;;  %p4629_p6 = scmp.lt.s32.totalorder %s52_s29, %s52_s29 }
  0x2d   :  { %p4625_p5 = scmp.ne.s32.totalorder %s52_s29, %s4624_s14  ;;  %p4630_p7 = scmp.lt.s32.totalorder %s4624_s14, %s4624_s14 }
  0x2f   :  { %p4631_p8 = por %p4630_p7, %p4629_p6 }
  0x31   :  { %p4632_p9 = pnand %p4631_p8, %p4625_p5 }
  0x33   :  { %4635 = shalt.err (!%p4632_p9)
}
  0x34   :  { %54 = dma.hbm_to_vmem [thread:$0]  %s6510_s4, 256, %s52_s29, [#allocation6]  }
  0x35   :  { %4702 = dma.done.wait [#allocation3], 256  }
  0x36   :  { %4703 = vsyncadd [#allocation3], 4294967040 }
  0x37   :  { %4704 = dma.done.wait [#allocation6], 18688  }
  0x38   :  { %4705 = vsyncadd [#allocation6], 4294948608  ;;  %v6514_v0 = vmov 0   ;;  %v3802_v1 = vld [vmem:[#allocation5 + $0x4] ss:$16 sps:$4 sm:$0xff]   ;;  %v220_v18 = vld [vmem:[#allocation2 + $0x8] sm:$0xff] }
  0x39   :  { %359 = vmatprep.mubr.bf16.mxu1 %v6514_v0  ;;  %620 = vmatprep.mubr.bf16.mxu0 %v6514_v0  ;;  %v4802_v2 = vld [vmem:[#allocation5 + $0x84] ss:$16 sps:$4 sm:$0xff]   ;;  %v3806_v3 = vld [vmem:[#allocation5] ss:$16 sps:$4 sm:$0xff]   ;;  %v3828_v19 = vld [vmem:[#allocation5 + $0xc] ss:$16 sps:$4 sm:$0xff]  }
  0x3a   :  { %327 = vmatprep.subr.bf16.mxu1 %v3802_v1  ;;  %v4804_v4 = vld [vmem:[#allocation5 + $0x80] ss:$16 sps:$4 sm:$0xff]   ;;  %588 = vmatprep.subr.bf16.mxu0 %v4802_v2  ;;  %v3808_v5 = vld [vmem:[#allocation5 + $0x24] ss:$16 sps:$4 sm:$0xff]   ;;  %vm323_vm0 = vcmask 523264   ;;  %vm424_vm1 = vcmask 1041409  }
  0x3b   :  { %328 = vmatpush1.bf16.msra.mxu1 %v3806_v3  ;;  %589 = vmatpush1.bf16.msra.mxu0 %v4804_v4  ;;  %v4808_v6 = vld [vmem:[#allocation5 + $0xa4] ss:$16 sps:$4 sm:$0xff]   ;;  %v3812_v7 = vld [vmem:[#allocation5 + $0x20] ss:$16 sps:$4 sm:$0xff]   ;;  %v3826_v22 = vld [vmem:[#allocation5 + $0x8] ss:$16 sps:$4 sm:$0xff]  }
  0x3c   :  { %329 = vmatprep.subr.bf16.mxu1 %v3808_v5  ;;  %v4810_v8 = vld [vmem:[#allocation5 + $0xa0] ss:$16 sps:$4 sm:$0xff]   ;;  %590 = vmatprep.subr.bf16.mxu0 %v4808_v6  ;;  %v3814_v9 = vld [vmem:[#allocation5 + $0x44] ss:$16 sps:$4 sm:$0xff]   ;;  %v3834_v24 = vld [vmem:[#allocation5 + $0x2c] ss:$16 sps:$4 sm:$0xff]  }
  0x3d   :  { %v4813_v10 = vld [vmem:[#allocation5 + $0xc4] ss:$16 sps:$4 sm:$0xff]   ;;  %v3818_v11 = vld [vmem:[#allocation5 + $0x40] ss:$16 sps:$4 sm:$0xff]   ;;  %v3832_v26 = vld [vmem:[#allocation5 + $0x28] ss:$16 sps:$4 sm:$0xff]  }
  0x3e   :  { %v4815_v12 = vld [vmem:[#allocation5 + $0xc0] ss:$16 sps:$4 sm:$0xff]   ;;  %v3820_v13 = vld [vmem:[#allocation5 + $0x64] ss:$16 sps:$4 sm:$0xff]   ;;  %v3840_v28 = vld [vmem:[#allocation5 + $0x4c] ss:$16 sps:$4 sm:$0xff]  }
  0x3f   :  { %330 = vmatpush1.bf16.msra.mxu1 %v3812_v7  ;;  %591 = vmatpush1.bf16.msra.mxu0 %v4810_v8  ;;  %v4819_v14 = vld [vmem:[#allocation5 + $0xe4] ss:$16 sps:$4 sm:$0xff]   ;;  %v3824_v15 = vld [vmem:[#allocation5 + $0x60] ss:$16 sps:$4 sm:$0xff]   ;;  %v3838_v32 = vld [vmem:[#allocation5 + $0x48] ss:$16 sps:$4 sm:$0xff]  }
  0x40   :  { %331 = vmatprep.subr.bf16.mxu1 %v3814_v9  ;;  %592 = vmatprep.subr.bf16.mxu0 %v4813_v10  ;;  %v4821_v16 = vld [vmem:[#allocation5 + $0xe0] ss:$16 sps:$4 sm:$0xff]   ;;  %v4825_v20 = vld [vmem:[#allocation5 + $0x104] ss:$16 sps:$4 sm:$0xff]   ;;  %v3846_v36 = vld [vmem:[#allocation5 + $0x6c] ss:$16 sps:$4 sm:$0xff]  }
  0x41   :  { %v219_v17 = vld [vmem:[#allocation2] sm:$0xff]  ;;  %v3844_v40 = vld [vmem:[#allocation5 + $0x68] ss:$16 sps:$4 sm:$0xff]   ;;  %v4866_v44 = vld [vmem:[#allocation5 + $0x8c] ss:$16 sps:$4 sm:$0xff]   ;;  %vm1358_vm2 = vcmask 1042434  }
  0x42   :  { %v221_v21 = vpack.c.bf16 %v220_v18, %v219_v17  ;;  %v4828_v23 = vld [vmem:[#allocation5 + $0x100] ss:$16 sps:$4 sm:$0xff]   ;;  %v4831_v25 = vld [vmem:[#allocation5 + $0x124] ss:$16 sps:$4 sm:$0xff]   ;;  %6922 = vst [vmem:[#allocation16_spill] sm:$0xff] %v4866_v44  ;;  %vm1665_vm3 = vcmask 1043459  }
  0x43   :  { %332 = vmatpush1.bf16.msra.mxu1 %v3818_v11  ;;  %593 = vmatpush1.bf16.msra.mxu0 %v4815_v12  ;;  %v4835_v27 = vld [vmem:[#allocation5 + $0x120] ss:$16 sps:$4 sm:$0xff]   ;;  %v4838_v29 = vld [vmem:[#allocation5 + $0x144] ss:$16 sps:$4 sm:$0xff]   ;;  %v4869_v46 = vld [vmem:[#allocation5 + $0x88] ss:$16 sps:$4 sm:$0xff]  }
  0x44   :  { %333 = vmatprep.subr.bf16.mxu1 %v3820_v13  ;;  %594 = vmatprep.subr.bf16.mxu0 %v4819_v14  ;;  %v4844_v30 = vld [vmem:[%s6507_s1] sm:$0x3]  ;;  %v4849_v31 = vld [vmem:[%s6507_s1 + $0x2] sm:$0x3]  ;;  %v4859_v37 = vld [vmem:[#allocation5 + $0x164] ss:$16 sps:$4 sm:$0xff]  }
  0x45   :  { %v4851_v33 = vld [vmem:[#allocation5 + $0x140] ss:$16 sps:$4 sm:$0xff]   ;;  %v417_v34 = vpack.c.bf16 %v4844_v30, %v4844_v30  ;;  %v418_v35 = vpack.c.bf16 %v4849_v31, %v4849_v31  ;;  %v4872_v47 = vld [vmem:[#allocation5 + $0xac] ss:$16 sps:$4 sm:$0xff]   ;;  %v4874_v48 = vld [vmem:[#allocation5 + $0xa8] ss:$16 sps:$4 sm:$0xff]  }
  0x46   :  { %v4862_v42 = vld [vmem:[#allocation5 + $0x160] ss:$16 sps:$4 sm:$0xff]   ;;  %v4877_v49 = vld [vmem:[#allocation5 + $0xcc] ss:$16 sps:$4 sm:$0xff]   ;;  %v4882_v50 = vld [vmem:[#allocation5 + $0xc8] ss:$16 sps:$4 sm:$0xff]  }
  0x47   :  { %334 = vmatpush1.bf16.msra.mxu1 %v3824_v15  ;;  %595 = vmatpush1.bf16.msra.mxu0 %v4821_v16  ;;  %v421_v38 = vunpack.c.l.b16 %v417_v34  ;;  %v422_v39 = vunpack.c.l.b16 %v418_v35  ;;  %v4884_v51 = vld [vmem:[#allocation5 + $0xec] ss:$16 sps:$4 sm:$0xff]   ;;  %v4888_v52 = vld [vmem:[#allocation5 + $0xe8] ss:$16 sps:$4 sm:$0xff]   ;;  %v4917_v61 = vld [vmem:[#allocation5 + $0x184] ss:$16 sps:$4 sm:$0xff]  }
  0x48   :  { %370 = vmatprep.subr.bf16.mxu1 %v3828_v19  ;;  %596 = vmatprep.subr.bf16.mxu0 %v4825_v20  ;;  %v4890_v53 = vld [vmem:[#allocation5 + $0x10c] ss:$16 sps:$4 sm:$0xff]   ;;  %v4894_v54 = vld [vmem:[#allocation5 + $0x108] ss:$16 sps:$4 sm:$0xff]   ;;  %v4921_v63 = vld [vmem:[#allocation5 + $0x180] ss:$16 sps:$4 sm:$0xff]  }
  0x49   :  { %v423_v41 = vrot.slane %v422_v39, 7  ;;  %v4896_v55 = vld [vmem:[#allocation5 + $0x12c] ss:$16 sps:$4 sm:$0xff]   ;;  %v4900_v56 = vld [vmem:[#allocation5 + $0x128] ss:$16 sps:$4 sm:$0xff]   ;;  %vm1963_vm4 = vcmask 1044484  }
  0x4a   :  { %3601 = vmatmul.mubr.msk.bf16.vlgmr.msra.gmra.mrb[0].mxu1 %vm323_vm0, %v221_v21  ;;  %v4902_v57 = vld [vmem:[#allocation5 + $0x14c] ss:$16 sps:$4 sm:$0xff]   ;;  %v4906_v58 = vld [vmem:[#allocation5 + $0x148] ss:$16 sps:$4 sm:$0xff]   ;;  %v4929_v3 = vld [vmem:[#allocation5 + $0x1a4] ss:$16 sps:$4 sm:$0xff]  }
  0x4b   :  { %371 = vmatpush1.bf16.msra.mxu1 %v3826_v22  ;;  %597 = vmatpush1.bf16.msra.mxu0 %v4828_v23  ;;  %v425_v43 = vsel %vm424_vm1, %v423_v41, %v421_v38  ;;  %v4908_v59 = vld [vmem:[#allocation5 + $0x16c] ss:$16 sps:$4 sm:$0xff]   ;;  %v4913_v60 = vld [vmem:[#allocation5 + $0x168] ss:$16 sps:$4 sm:$0xff]   ;;  %v4933_v7 = vld [vmem:[#allocation5 + $0x1a0] ss:$16 sps:$4 sm:$0xff]  }
  0x4c   :  { %372 = vmatprep.subr.bf16.mxu1 %v3834_v24  ;;  %598 = vmatprep.subr.bf16.mxu0 %v4831_v25  ;;  %v426_v45 = vpack.c.b16 %v425_v43, %v425_v43  ;;  %v4919_v62 = vld [vmem:[#allocation5 + $0x18c] ss:$16 sps:$4 sm:$0xff]   ;;  %v4923_v1 = vld [vmem:[#allocation5 + $0x188] ss:$16 sps:$4 sm:$0xff]   ;;  %v4941_v11 = vld [vmem:[#allocation5 + $0x1c4] ss:$16 sps:$4 sm:$0xff]  }
  0x4d   :  { %402 = vmatprep.mubr.bf16.mxu1 %v6514_v0  ;;  %v4931_v5 = vld [vmem:[#allocation5 + $0x1ac] ss:$16 sps:$4 sm:$0xff]   ;;  %v4935_v9 = vld [vmem:[#allocation5 + $0x1a8] ss:$16 sps:$4 sm:$0xff]   ;;  %6924 = vst [vmem:[#allocation18_spill] sm:$0xff] %v4941_v11  ;;  %vm2273_vm5 = vcmask 1045509  }
  0x4e   :  { %6923 = vst [vmem:[#allocation17_spill] sm:$0xff] %v4935_v9  ;;  %v4943_v13 = vld [vmem:[#allocation5 + $0x1cc] ss:$16 sps:$4 sm:$0xff]   ;;  %v4945_v15 = vld [vmem:[#allocation5 + $0x1c0] ss:$16 sps:$4 sm:$0xff]   ;;  %vm2571_vm6 = vcmask 1046534  }
  0x4f   :  { %373 = vmatpush1.bf16.msra.mxu1 %v3832_v26  ;;  %599 = vmatpush1.bf16.msra.mxu0 %v4835_v27  ;;  %6925 = vst [vmem:[#allocation19_spill] sm:$0xff] %v4943_v13  ;;  %6926 = vst [vmem:[#allocation20_spill] sm:$0xff] %v4945_v15  ;;  %v4947_v17 = vld [vmem:[#allocation5 + $0x1c8] ss:$16 sps:$4 sm:$0xff]   ;;  %v4953_v18 = vld [vmem:[#allocation5 + $0x1e4] ss:$16 sps:$4 sm:$0xff]  }
  0x50   :  { %374 = vmatprep.subr.bf16.mxu1 %v3840_v28  ;;  %600 = vmatprep.subr.bf16.mxu0 %v4838_v29  ;;  %6927 = vst [vmem:[#allocation21_spill] sm:$0xff] %v4947_v17  ;;  %6928 = vst [vmem:[#allocation22_spill] sm:$0xff] %v4953_v18  ;;  %v4955_v19 = vld [vmem:[#allocation5 + $0x1ec] ss:$16 sps:$4 sm:$0xff]   ;;  %v4959_v22 = vld [vmem:[#allocation5 + $0x1e8] ss:$16 sps:$4 sm:$0xff]  }
  0x51   :  { %6929 = vst [vmem:[#allocation23_spill] sm:$0xff] %v4955_v19  ;;  %6931 = vst [vmem:[#allocation25_spill] sm:$0xff] %v4959_v22  ;;  %v4965_v24 = vld [vmem:[#allocation5 + $0x204] ss:$16 sps:$4 sm:$0xff]   ;;  %v4967_v26 = vld [vmem:[#allocation5 + $0x20c] ss:$16 sps:$4 sm:$0xff]  }
  0x52   :  { %6932 = vst [vmem:[#allocation26_spill] sm:$0xff] %v4965_v24  ;;  %6933 = vst [vmem:[#allocation27_spill] sm:$0xff] %v4967_v26  ;;  %v4969_v28 = vld [vmem:[#allocation5 + $0x200] ss:$16 sps:$4 sm:$0xff]   ;;  %v4977_v34 = vld [vmem:[#allocation5 + $0x224] ss:$16 sps:$4 sm:$0xff]  }
  0x53   :  { %375 = vmatpush1.bf16.msra.mxu1 %v3838_v32  ;;  %601 = vmatpush1.bf16.msra.mxu0 %v4851_v33  ;;  %6934 = vst [vmem:[#allocation28_spill] sm:$0xff] %v4969_v28  ;;  %v4971_v32 = vld [vmem:[#allocation5 + $0x208] ss:$16 sps:$4 sm:$0xff]   ;;  %6936 = vst [vmem:[#allocation30_spill] sm:$0xff] %v4977_v34  ;;  %v4979_v35 = vld [vmem:[#allocation5 + $0x22c] ss:$16 sps:$4 sm:$0xff]  }
  0x54   :  { %376 = vmatprep.subr.bf16.mxu1 %v3846_v36  ;;  %602 = vmatprep.subr.bf16.mxu0 %v4859_v37  ;;  %6935 = vst [vmem:[#allocation29_spill] sm:$0xff] %v4971_v32  ;;  %6937 = vst [vmem:[#allocation31_spill] sm:$0xff] %v4979_v35  ;;  %v4981_v36 = vld [vmem:[#allocation5 + $0x220] ss:$16 sps:$4 sm:$0xff]   ;;  %v4983_v38 = vld [vmem:[#allocation5 + $0x228] ss:$16 sps:$4 sm:$0xff]  }
  0x55   :  { %6938 = vst [vmem:[#allocation32_spill] sm:$0xff] %v4981_v36  ;;  %6939 = vst [vmem:[#allocation33_spill] sm:$0xff] %v4983_v38  ;;  %v4989_v39 = vld [vmem:[#allocation5 + $0x244] ss:$16 sps:$4 sm:$0xff]   ;;  %v4993_v41 = vld [vmem:[#allocation5 + $0x240] ss:$16 sps:$4 sm:$0xff]  }
  0x56   :  { %6940 = vst [vmem:[#allocation34_spill] sm:$0xff] %v4989_v39  ;;  %6942 = vst [vmem:[#allocation36_spill] sm:$0xff] %v4993_v41  ;;  %v4995_v43 = vld [vmem:[#allocation5 + $0x248] ss:$16 sps:$4 sm:$0xff]   ;;  %vm2881_vm7 = vcmask 1047559   ;;  %vm3490_vm8 = vcmask 1040384  }
  0x57   :  { %377 = vmatpush1.bf16.msra.mxu1 %v3844_v40  ;;  %603 = vmatpush1.bf16.msra.mxu0 %v4862_v42  ;;  %v4991_v40 = vld [vmem:[#allocation5 + $0x24c] ss:$16 sps:$4 sm:$0xff]   ;;  %6943 = vst [vmem:[#allocation37_spill] sm:$0xff] %v4995_v43 }
  0x58   :  { %629 = vmatprep.subr.bf16.mxu1 %v4866_v44  ;;  %1074 = vmatprep.subr.bf16.mxu0 %v4917_v61  ;;  %6941 = vst [vmem:[#allocation35_spill] sm:$0xff] %v4991_v40 }
  0x5a   :  { %3602 = vmatmul.mubr.msk.bf16.vlgmr.msra.gmra.mrb[4].mxu1 %vm323_vm0, %v221_v21  ;;  %621 = vmatmul.mubr.bf16.vlgmr.msra.gmra.mrb[0].mxu0 %v426_v45  ;;  %v4957_v21 = vld [vmem:[#allocation5 + $0x1e0] ss:$16 sps:$4 sm:$0xff]  }
  0x5b   :  { %630 = vmatpush1.bf16.msra.mxu1 %v4869_v46  ;;  %661 = vmatprep.mubr.bf16.mxu1 %v6514_v0  ;;  %6930 = vst [vmem:[#allocation24_spill] sm:$0xff] %v4957_v21  ;;  %v5003_v0 = vld [vmem:[#allocation5 + $0x26c] ss:$16 sps:$4 sm:$0xff]  }
  0x5c   :  { %631 = vmatprep.subr.bf16.mxu1 %v4872_v47  ;;  %1075 = vmatpush1.bf16.msra.mxu0 %v4921_v63  ;;  %6945 = vst [vmem:[#allocation39_spill] sm:$0xff] %v5003_v0 }
  0x5d   :  { %1076 = vmatprep.subr.bf16.mxu0 %v4929_v3 }
  0x5f   :  { %632 = vmatpush1.bf16.msra.mxu1 %v4874_v48 }
  0x60   :  { %633 = vmatprep.subr.bf16.mxu1 %v4877_v49  ;;  %1077 = vmatpush1.bf16.msra.mxu0 %v4933_v7 }
  0x61   :  { %1078 = vmatprep.subr.bf16.mxu0 %v4941_v11 }
  0x63   :  { %634 = vmatpush1.bf16.msra.mxu1 %v4882_v50 }
  0x64   :  { %635 = vmatprep.subr.bf16.mxu1 %v4884_v51  ;;  %1079 = vmatpush1.bf16.msra.mxu0 %v4945_v15 }
  0x65   :  { %1080 = vmatprep.subr.bf16.mxu0 %v4953_v18 }
  0x67   :  { %636 = vmatpush1.bf16.msra.mxu1 %v4888_v52 }
  0x68   :  { %637 = vmatprep.subr.bf16.mxu1 %v4890_v53  ;;  %1081 = vmatpush1.bf16.msra.mxu0 %v4957_v21 }
  0x69   :  { %1082 = vmatprep.subr.bf16.mxu0 %v4965_v24 }
  0x6b   :  { %638 = vmatpush1.bf16.msra.mxu1 %v4894_v54 }
  0x6c   :  { %639 = vmatprep.subr.bf16.mxu1 %v4896_v55  ;;  %1083 = vmatpush1.bf16.msra.mxu0 %v4969_v28 }
  0x6d   :  { %1084 = vmatprep.subr.bf16.mxu0 %v4977_v34  ;;  %v5085_v34 = vld [vmem:[#allocation5 + $0x34c] ss:$16 sps:$4 sm:$0xff]  }
  0x6e   :  { %6973 = vst [vmem:[#allocation67_spill] sm:$0xff] %v5085_v34 }
  0x6f   :  { %640 = vmatpush1.bf16.msra.mxu1 %v4900_v56 }
  0x70   :  { %641 = vmatprep.subr.bf16.mxu1 %v4902_v57  ;;  %1085 = vmatpush1.bf16.msra.mxu0 %v4981_v36  ;;  %v5007_v36 = vld [vmem:[#allocation5 + $0x268] ss:$16 sps:$4 sm:$0xff]  }
  0x71   :  { %1086 = vmatprep.subr.bf16.mxu0 %v4989_v39  ;;  %6947 = vst [vmem:[#allocation41_spill] sm:$0xff] %v5007_v36  ;;  %v5019_v39 = vld [vmem:[#allocation5 + $0x288] ss:$16 sps:$4 sm:$0xff]  }
  0x72   :  { %6951 = vst [vmem:[#allocation45_spill] sm:$0xff] %v5019_v39 }
  0x73   :  { %642 = vmatpush1.bf16.msra.mxu1 %v4906_v58 }
  0x74   :  { %643 = vmatprep.subr.bf16.mxu1 %v4908_v59  ;;  %1087 = vmatpush1.bf16.msra.mxu0 %v4993_v41  ;;  %v5015_v41 = vld [vmem:[#allocation5 + $0x28c] ss:$16 sps:$4 sm:$0xff]  }
  0x75   :  { %6949 = vst [vmem:[#allocation43_spill] sm:$0xff] %v5015_v41 }
  0x77   :  { %644 = vmatpush1.bf16.msra.mxu1 %v4913_v60 }
  0x78   :  { %1115 = vmatprep.subr.bf16.mxu1 %v4919_v62 }
  0x7a   :  { %662 = vmatmul.mubr.bf16.vlgmr.msra.gmra.mrb[8].mxu1 %v426_v45  ;;  %v5001_v45 = vld [vmem:[#allocation5 + $0x264] ss:$16 sps:$4 sm:$0xff]  }
  0x7b   :  { %1116 = vmatpush1.bf16.msra.mxu1 %v4923_v1  ;;  %6944 = vst [vmem:[#allocation38_spill] sm:$0xff] %v5001_v45  ;;  %1088 = vmatprep.subr.bf16.mxu0 %v5001_v45  ;;  %v5031_v45 = vld [vmem:[#allocation5 + $0x2a8] ss:$16 sps:$4 sm:$0xff]  }
  0x7c   :  { %1117 = vmatprep.subr.bf16.mxu1 %v4931_v5  ;;  %6955 = vst [vmem:[#allocation49_spill] sm:$0xff] %v5031_v45 }
  0x7f   :  { %1118 = vmatpush1.bf16.msra.mxu1 %v4935_v9 }
  0x80   :  { %1119 = vmatprep.subr.bf16.mxu1 %v4943_v13 }
  0x83   :  { %1120 = vmatpush1.bf16.msra.mxu1 %v4947_v17 }
  0x84   :  { %1121 = vmatprep.subr.bf16.mxu1 %v4955_v19 }
  0x87   :  { %1122 = vmatpush1.bf16.msra.mxu1 %v4959_v22 }
  0x88   :  { %1123 = vmatprep.subr.bf16.mxu1 %v4967_v26 }
  0x8b   :  { %1124 = vmatpush1.bf16.msra.mxu1 %v4971_v32  ;;  %v5100_v32 = vld [vmem:[#allocation5 + $0x36c] ss:$16 sps:$4 sm:$0xff]  }
  0x8c   :  { %1125 = vmatprep.subr.bf16.mxu1 %v4979_v35  ;;  %v5069_v35 = vld [vmem:[#allocation5 + $0x324] ss:$16 sps:$4 sm:$0xff]   ;;  %6977 = vst [vmem:[#allocation71_spill] sm:$0xff] %v5100_v32 }
  0x8d   :  { %6968 = vst [vmem:[#allocation62_spill] sm:$0xff] %v5069_v35 }
  0x8f   :  { %1126 = vmatpush1.bf16.msra.mxu1 %v4983_v38  ;;  %v5005_v38 = vld [vmem:[#allocation5 + $0x260] ss:$16 sps:$4 sm:$0xff]  }
  0x90   :  { %1127 = vmatprep.subr.bf16.mxu1 %v4991_v40  ;;  %6946 = vst [vmem:[#allocation40_spill] sm:$0xff] %v5005_v38  ;;  %1089 = vmatpush1.bf16.msra.mxu0 %v5005_v38  ;;  %v5013_v40 = vld [vmem:[#allocation5 + $0x284] ss:$16 sps:$4 sm:$0xff]   ;;  %v5027_v38 = vld [vmem:[#allocation5 + $0x2ac] ss:$16 sps:$4 sm:$0xff]  }
  0x91   :  { %6948 = vst [vmem:[#allocation42_spill] sm:$0xff] %v5013_v40  ;;  %1090 = vmatprep.subr.bf16.mxu0 %v5013_v40  ;;  %6953 = vst [vmem:[#allocation47_spill] sm:$0xff] %v5027_v38  ;;  %v5043_v40 = vld [vmem:[#allocation5 + $0x2c8] ss:$16 sps:$4 sm:$0xff]  }
  0x92   :  { %6959 = vst [vmem:[#allocation53_spill] sm:$0xff] %v5043_v40 }
  0x93   :  { %1128 = vmatpush1.bf16.msra.mxu1 %v4995_v43  ;;  %v5017_v43 = vld [vmem:[#allocation5 + $0x280] ss:$16 sps:$4 sm:$0xff]  }
  0x94   :  { %1129 = vmatprep.subr.bf16.mxu1 %v5003_v0  ;;  %6950 = vst [vmem:[#allocation44_spill] sm:$0xff] %v5017_v43  ;;  %1091 = vmatpush1.bf16.msra.mxu0 %v5017_v43  ;;  %v5025_v0 = vld [vmem:[#allocation5 + $0x2a4] ss:$16 sps:$4 sm:$0xff]   ;;  %v5039_v43 = vld [vmem:[#allocation5 + $0x2cc] ss:$16 sps:$4 sm:$0xff]  }
  0x95   :  { %6952 = vst [vmem:[#allocation46_spill] sm:$0xff] %v5025_v0  ;;  %1092 = vmatprep.subr.bf16.mxu0 %v5025_v0  ;;  %6957 = vst [vmem:[#allocation51_spill] sm:$0xff] %v5039_v43  ;;  %v5055_v0 = vld [vmem:[#allocation5 + $0x2e8] ss:$16 sps:$4 sm:$0xff]  }
  0x96   :  { %6963 = vst [vmem:[#allocation57_spill] sm:$0xff] %v5055_v0 }
  0x97   :  { %1130 = vmatpush1.bf16.msra.mxu1 %v5007_v36  ;;  %v5029_v36 = vld [vmem:[#allocation5 + $0x2a0] ss:$16 sps:$4 sm:$0xff]  }
  0x98   :  { %1131 = vmatprep.subr.bf16.mxu1 %v5015_v41  ;;  %6954 = vst [vmem:[#allocation48_spill] sm:$0xff] %v5029_v36  ;;  %1093 = vmatpush1.bf16.msra.mxu0 %v5029_v36  ;;  %v5037_v41 = vld [vmem:[#allocation5 + $0x2c4] ss:$16 sps:$4 sm:$0xff]   ;;  %v5051_v36 = vld [vmem:[#allocation5 + $0x2ec] ss:$16 sps:$4 sm:$0xff]  }
  0x99   :  { %6956 = vst [vmem:[#allocation50_spill] sm:$0xff] %v5037_v41  ;;  %1094 = vmatprep.subr.bf16.mxu0 %v5037_v41  ;;  %6961 = vst [vmem:[#allocation55_spill] sm:$0xff] %v5051_v36  ;;  %v5067_v41 = vld [vmem:[#allocation5 + $0x308] ss:$16 sps:$4 sm:$0xff]  }
  0x9a   :  { %6967 = vst [vmem:[#allocation61_spill] sm:$0xff] %v5067_v41 }
  0x9b   :  { %1132 = vmatpush1.bf16.msra.mxu1 %v5019_v39  ;;  %v5041_v39 = vld [vmem:[#allocation5 + $0x2c0] ss:$16 sps:$4 sm:$0xff]  }
  0x9c   :  { %1133 = vmatprep.subr.bf16.mxu1 %v5027_v38  ;;  %6958 = vst [vmem:[#allocation52_spill] sm:$0xff] %v5041_v39  ;;  %1095 = vmatpush1.bf16.msra.mxu0 %v5041_v39  ;;  %v5049_v38 = vld [vmem:[#allocation5 + $0x2e4] ss:$16 sps:$4 sm:$0xff]   ;;  %v5063_v39 = vld [vmem:[#allocation5 + $0x30c] ss:$16 sps:$4 sm:$0xff]  }
  0x9d   :  { %6960 = vst [vmem:[#allocation54_spill] sm:$0xff] %v5049_v38  ;;  %1096 = vmatprep.subr.bf16.mxu0 %v5049_v38  ;;  %6965 = vst [vmem:[#allocation59_spill] sm:$0xff] %v5063_v39  ;;  %v5073_v38 = vld [vmem:[#allocation5 + $0x32c] ss:$16 sps:$4 sm:$0xff]  }
  0x9e   :  { %6969 = vst [vmem:[#allocation63_spill] sm:$0xff] %v5073_v38 }
  0x9f   :  { %1134 = vmatpush1.bf16.msra.mxu1 %v5031_v45  ;;  %v5053_v45 = vld [vmem:[#allocation5 + $0x2e0] ss:$16 sps:$4 sm:$0xff]  }
  0xa0   :  { %1135 = vmatprep.subr.bf16.mxu1 %v5039_v43  ;;  %6962 = vst [vmem:[#allocation56_spill] sm:$0xff] %v5053_v45  ;;  %1097 = vmatpush1.bf16.msra.mxu0 %v5053_v45  ;;  %v5061_v43 = vld [vmem:[#allocation5 + $0x304] ss:$16 sps:$4 sm:$0xff]   ;;  %v5076_v45 = vld [vmem:[#allocation5 + $0x320] ss:$16 sps:$4 sm:$0xff]  }
  0xa1   :  { %6964 = vst [vmem:[#allocation58_spill] sm:$0xff] %v5061_v43  ;;  %1098 = vmatprep.subr.bf16.mxu0 %v5061_v43  ;;  %6970 = vst [vmem:[#allocation64_spill] sm:$0xff] %v5076_v45  ;;  %v5089_v43 = vld [vmem:[#allocation5 + $0x340] ss:$16 sps:$4 sm:$0xff]  }
  0xa2   :  { %6974 = vst [vmem:[#allocation68_spill] sm:$0xff] %v5089_v43 }
  0xa3   :  { %1136 = vmatpush1.bf16.msra.mxu1 %v5043_v40  ;;  %v5065_v40 = vld [vmem:[#allocation5 + $0x300] ss:$16 sps:$4 sm:$0xff]  }
  0xa4   :  { %1137 = vmatprep.subr.bf16.mxu1 %v5051_v36  ;;  %6966 = vst [vmem:[#allocation60_spill] sm:$0xff] %v5065_v40  ;;  %1099 = vmatpush1.bf16.msra.mxu0 %v5065_v40  ;;  %v5082_v36 = vld [vmem:[#allocation5 + $0x344] ss:$16 sps:$4 sm:$0xff]  }
  0xa5   :  { %1100 = vmatprep.subr.bf16.mxu0 %v5069_v35  ;;  %6972 = vst [vmem:[#allocation66_spill] sm:$0xff] %v5082_v36  ;;  %v5095_v35 = vld [vmem:[#allocation5 + $0x348] ss:$16 sps:$4 sm:$0xff]  }
  0xa6   :  { %6975 = vst [vmem:[#allocation69_spill] sm:$0xff] %v5095_v35 }
  0xa7   :  { %1138 = vmatpush1.bf16.msra.mxu1 %v5055_v0  ;;  %v5080_v0 = vld [vmem:[#allocation5 + $0x328] ss:$16 sps:$4 sm:$0xff]  }
  0xa8   :  { %1139 = vmatprep.subr.bf16.mxu1 %v5063_v39  ;;  %6971 = vst [vmem:[#allocation65_spill] sm:$0xff] %v5080_v0  ;;  %v749_v39 = vrot.slane %v4844_v30, 1  ;;  %1101 = vmatpush1.bf16.msra.mxu0 %v5076_v45  ;;  %v5103_v30 = vld [vmem:[#allocation5 + $0x360] ss:$16 sps:$4 sm:$0xff]  }
  0xa9   :  { %1102 = vmatprep.subr.bf16.mxu0 %v5082_v36  ;;  %6978 = vst [vmem:[#allocation72_spill] sm:$0xff] %v5103_v30  ;;  %v193_v36 = vld [vmem:[#allocation7] ss:$4 sm:$0xf] }
  0xaa   :  { %v750_v40 = vsel %vm424_vm1, %v4849_v31, %v749_v39  ;;  %v5107_v31 = vld [vmem:[#allocation5 + $0x368] ss:$16 sps:$4 sm:$0xff]  }
  0xab   :  { %1140 = vmatpush1.bf16.msra.mxu1 %v5067_v41  ;;  %v5097_v41 = vld [vmem:[#allocation5 + $0x364] ss:$16 sps:$4 sm:$0xff]   ;;  %6979 = vst [vmem:[#allocation73_spill] sm:$0xff] %v5107_v31 }
  0xac   :  { %1141 = vmatprep.subr.bf16.mxu1 %v5073_v38  ;;  %6976 = vst [vmem:[#allocation70_spill] sm:$0xff] %v5097_v41  ;;  %v753_v38 = vpack.c.bf16 %v750_v40, %v750_v40  ;;  %1103 = vmatpush1.bf16.msra.mxu0 %v5089_v43 }
  0xad   :  { %1104 = vmatprep.subr.bf16.mxu0 %v5097_v41 }
  0xae   :  { %1106 = vmatprep.mubr.bf16.mxu0 %v753_v38  ;;  %1147 = vmatprep.mubr.bf16.mxu1 %v753_v38 }
  0xaf   :  { %1142 = vmatpush1.bf16.msra.mxu1 %v5080_v0 }
  0xb0   :  { %1143 = vmatprep.subr.bf16.mxu1 %v5085_v34  ;;  %1105 = vmatpush1.bf16.msra.mxu0 %v5103_v30  ;;  %v197_v34 = vlaneseq }
  0xb1   :  { %1195 = vmatprep.subr.bf16.mxu0 %v4802_v2 }
  0xb3   :  { %1144 = vmatpush1.bf16.msra.mxu1 %v5095_v35  ;;  %v5114_v35 = vshrl.u32 %v197_v34, 7 }
  0xb4   :  { %1145 = vmatprep.subr.bf16.mxu1 %v5100_v32 }
  0xb5   :  { %6980 = vst [vmem:[#allocation74_spill] sm:$0xff] %v5114_v35  ;;  %v5117_v41 = vsub.s32 0, %v5114_v35  ;;  %v5120_v32 = vsub.s32 1, %v5114_v35 }
  0xb7   :  { %1146 = vmatpush1.bf16.msra.mxu1 %v5107_v31  ;;  %6981 = vst [vmem:[#allocation75_spill] sm:$0xff] %v5117_v41  ;;  %6982 = vst [vmem:[#allocation76_spill] sm:$0xff] %v5120_v32  ;;  %v226_v2 = vrot.slane %v193_v36, %v5117_v41  ;;  %v230_v45 = vrot.slane %v193_v36, %v5120_v32 }
  0xb8   :  { %1236 = vmatprep.subr.bf16.mxu1 %v4866_v44 }
 0x11d   :  { %v361_v38 = vpop.f32.mrb[0].mxu1 }
 0x11e   :  { %v363_v39 = vpop.f32.mrb[1].mxu1  ;;  %v5124_v22 = vadd.f32 %v361_v38, %v226_v2 }
 0x11f   :  { %v365_v40 = vpop.f32.mrb[2].mxu1  ;;  %v5126_v19 = vadd.f32 %v363_v39, %v230_v45  ;;  %v6626_v39 = vsub.s32 2, %v5114_v35 }
 0x120   :  { %v367_v43 = vpop.f32.mrb[3].mxu1  ;;  %6983 = vst [vmem:[#allocation77_spill] sm:$0xff] %v5124_v22  ;;  %v5128_v17 = vadd.f32 %v365_v40, %v226_v2 }
 0x121   :  { %6984 = vst [vmem:[#allocation78_spill] sm:$0xff] %v5126_v19  ;;  %v5131_v13 = vadd.f32 %v367_v43, %v230_v45 }
 0x122   :  { %6985 = vst [vmem:[#allocation79_spill] sm:$0xff] %v5128_v17 }
 0x123   :  { %6986 = vst [vmem:[#allocation80_spill] sm:$0xff] %v5131_v13 }
 0x12d   :  { %v404_v30 = vpop.f32.mrb[4].mxu1  ;;  %v622_v31 = vpop.f32.mrb[0].mxu0 }
 0x12e   :  { %v406_v0 = vpop.f32.mrb[5].mxu1  ;;  %v624_v44 = vpop.f32.mrb[1].mxu0  ;;  %v674_v21 = vrot.slane %v622_v31, 1  ;;  %v686_v15 = vadd.f32 %v622_v31, %v5124_v22  ;;  %v6629_v31 = vsub.s32 3, %v5114_v35 }
 0x12f   :  { %v408_v28 = vpop.f32.mrb[6].mxu1  ;;  %v626_v26 = vpop.f32.mrb[2].mxu0  ;;  %v675_v18 = vrot.slane %v624_v44, 1  ;;  %v687_v41 = vadd.f32 %v624_v44, %v5126_v19  ;;  %v234_v44 = vrot.slane %v193_v36, %v6626_v39 }
 0x130   :  { %v410_v24 = vpop.f32.mrb[7].mxu1  ;;  %v627_v34 = vpop.f32.mrb[3].mxu0  ;;  %v690_v32 = vadd.f32 %v674_v21, %v5128_v17  ;;  %v3635_v11 = vmul.f32 -1.442695, %v686_v15  ;;  %v238_v15 = vrot.slane %v193_v36, %v6629_v31 }
 0x131   :  { %v691_v26 = vadd.f32 %v675_v18, %v5131_v13  ;;  %v3636_v34 = vmul.f32 -1.442695, %v687_v41  ;;  %v5142_v41 = vadd.f32 %v404_v30, %v234_v44 }
 0x132   :  { %v3638_v38 = vmul.f32 -1.442695, %v690_v32  ;;  %3994 = vpow2.f32 %v3635_v11  ;;  %v5144_v2 = vadd.f32 %v406_v0, %v238_v15 }
 0x133   :  { %v3639_v9 = vmul.f32 -1.442695, %v691_v26  ;;  %3996 = vpow2.f32 %v3636_v34  ;;  %v5146_v34 = vadd.f32 %v408_v28, %v234_v44 }
 0x134   :  { %3998 = vpow2.f32 %v3638_v38  ;;  %6987 = vst [vmem:[#allocation81_spill] sm:$0xff] %v5144_v2 }
 0x135   :  { %4000 = vpow2.f32 %v3639_v9 }
 0x13c   :  { %v3995_v43 = vpop.eup %3994 }
 0x13d   :  { %v3997_v45 = vpop.eup %3996  ;;  %v712_v18 = vadd.f32 1.0, %v3995_v43  ;;  %v5149_v43 = vadd.f32 %v410_v24, %v238_v15 }
 0x13e   :  { %v3999_v40 = vpop.eup %3998  ;;  %v713_v32 = vadd.f32 1.0, %v3997_v45 }
 0x13f   :  { %v4001_v21 = vpop.eup %4000  ;;  %v715_v11 = vadd.f32 1.0, %v3999_v40  ;;  %4002 = vrcp.f32 %v712_v18  ;;  %6988 = vst [vmem:[#allocation82_spill] sm:$0xff] %v5149_v43 }
 0x140   :  { %v716_v9 = vadd.f32 1.0, %v4001_v21  ;;  %4004 = vrcp.f32 %v713_v32 }
 0x141   :  { %4006 = vrcp.f32 %v715_v11 }
 0x142   :  { %4008 = vrcp.f32 %v716_v9 }
 0x149   :  { %v4003_v44 = vpop.eup %4002 }
 0x14a   :  { %v4005_v32 = vpop.eup %4004 }
 0x14b   :  { %v4007_v24 = vpop.eup %4006 }
 0x14c   :  { %v4009_v15 = vpop.eup %4008 }
 0x14d   :  { %v663_v26 = vpop.f32.mrb[8].mxu1 }
 0x14e   :  { %v676_v38 = vrot.slane %v663_v26, 1  ;;  %v688_v39 = vadd.f32 %v663_v26, %v5142_v41  ;;  %v665_v19 = vpop.f32.mrb[9].mxu1 }
 0x14f   :  { %v677_v36 = vrot.slane %v665_v19, 1  ;;  %v689_v45 = vadd.f32 %v665_v19, %v5144_v2  ;;  %v667_v30 = vpop.f32.mrb[10].mxu1  ;;  %v5157_v19 = vld [vmem:[%s6508_s2] sm:$0x3] }
 0x150   :  { %v692_v40 = vadd.f32 %v676_v38, %v5146_v34  ;;  %v3637_v0 = vmul.f32 -1.442695, %v688_v39  ;;  %v668_v21 = vpop.f32.mrb[11].mxu1  ;;  %v5162_v39 = vld [vmem:[%s6508_s2 + $0x2] sm:$0x3]  ;;  %v732_v26 = vmul.f32 %v4005_v32, %v5157_v19  ;;  %s4719_s2 = smov [#allocation9]  }
 0x151   :  { %v693_v18 = vadd.f32 %v677_v36, %v5149_v43  ;;  %4010 = vtanh.f32 %v689_v45  ;;  %s3553_s22 = sshll.u32 %s4719_s2, 4  ;;  %s3554_s22 = int_to_ptr.vmem [resolvable:$true] %s3553_s22 }
 0x152   :  { %4012 = vpow2.f32 %v3637_v0  ;;  %v3640_v28 = vmul.f32 -1.442695, %v692_v40  ;;  %v733_v40 = vmul.f32 %v4009_v15, %v5162_v39  ;;  %s4636_s23 = scalar_lea.vmem %s3554_s22, 64  ;;  %p4641_p11 = scmp.lt.s32.totalorder %s3554_s22, %s3554_s22 }
 0x153   :  { %4014 = vtanh.f32 %v693_v18  ;;  %p4637_p10 = scmp.ne.s32.totalorder %s3554_s22, %s4636_s23  ;;  %p4642_p12 = scmp.lt.s32.totalorder %s4636_s23, %s4636_s23 }
 0x154   :  { %4016 = vpow2.f32 %v3640_v28 }
 0x155   :  { %p4643_p13 = por %p4642_p12, %p4641_p11 }
 0x157   :  { %p4644_p0 = pnand %p4643_p13, %p4637_p10 }
 0x15b   :  { %v4011_v11 = vpop.eup %4010 }
 0x15c   :  { %v4013_v9 = vpop.eup %4012  ;;  %v734_v38 = vmul.f32 %v4011_v11, %v4003_v44 }
 0x15d   :  { %v4015_v36 = vpop.eup %4014  ;;  %v714_v45 = vadd.f32 1.0, %v4013_v9 }
 0x15e   :  { %v4017_v30 = vpop.eup %4016  ;;  %v735_v0 = vmul.f32 %v4015_v36, %v4007_v24  ;;  %v5166_v21 = vadd.f32 %v734_v38, %v732_v26 }
 0x15f   :  { %v717_v18 = vadd.f32 1.0, %v4017_v30  ;;  %4018 = vrcp.f32 %v714_v45 }
 0x160   :  { %v5168_v28 = vadd.f32 %v735_v0, %v733_v40  ;;  %4020 = vtanh.f32 %v5166_v21  ;;  %v7028_v0 = vld [vmem:[#allocation55_spill] sm:$0xff] }
 0x161   :  { %4022 = vrcp.f32 %v717_v18  ;;  %v7029_v18 = vld [vmem:[#allocation56_spill] sm:$0xff] }
 0x162   :  { %4024 = vtanh.f32 %v5168_v28 }
 0x169   :  { %v4019_v31 = vpop.eup %4018 }
 0x16a   :  { %v4021_v32 = vpop.eup %4020 }
 0x16b   :  { %v4023_v44 = vpop.eup %4022  ;;  %v740_v11 = vmul.f32 %v4021_v32, %v4019_v31  ;;  %v6989_v31 = vmov 0   ;;  %v7030_v32 = vld [vmem:[#allocation57_spill] sm:$0xff] }
 0x16c   :  { %v4025_v9 = vpop.eup %4024 }
 0x16d   :  { %v741_v2 = vmul.f32 %v4025_v9, %v4023_v44  ;;  %v1185_v15 = vpack.c.bf16 %v740_v11, %v740_v11  ;;  %v7031_v44 = vld [vmem:[#allocation58_spill] sm:$0xff]  ;;  %v7033_v9 = vld [vmem:[#allocation60_spill] sm:$0xff] }
 0x16f   :  { %v744_v43 = vrot.slane %v741_v2, 7  ;;  %v1186_v24 = vpack.c.bf16 %v741_v2, %v741_v2  ;;  %v1189_v45 = vunpack.c.l.b16 %v1185_v15  ;;  %v7026_v2 = vld [vmem:[#allocation53_spill] sm:$0xff] }
 0x170   :  { %v7034_v15 = vld [vmem:[#allocation61_spill] sm:$0xff] }
 0x171   :  { %v745_v26 = vsel %vm424_vm1, %v744_v43, %v740_v11  ;;  %v1190_v38 = vunpack.c.l.b16 %v1186_v24  ;;  %v7027_v43 = vld [vmem:[#allocation54_spill] sm:$0xff]  ;;  %v7032_v11 = vld [vmem:[#allocation59_spill] sm:$0xff] }
 0x172   :  { %v752_v36 = vpack.c.bf16 %v745_v26, %v745_v26  ;;  %v7035_v24 = vld [vmem:[#allocation62_spill] sm:$0xff]  ;;  %v7036_v26 = vld [vmem:[#allocation63_spill] sm:$0xff] }
 0x173   :  { %v1191_v30 = vrot.slane %v1190_v38, 7  ;;  %v7037_v38 = vld [vmem:[#allocation64_spill] sm:$0xff] }
 0x174   :  { %1107 = vmatmul.mubr.bf16.vlgmr.msra.gmra.mrb[4].mxu0 %v752_v36  ;;  %1148 = vmatmul.mubr.bf16.vlgmr.msra.gmra.mrb[12].mxu1 %v752_v36  ;;  %v7038_v36 = vld [vmem:[#allocation65_spill] sm:$0xff] }
 0x175   :  { %1196 = vmatpush1.bf16.msra.mxu0 %v4804_v4  ;;  %1237 = vmatpush1.bf16.msra.mxu1 %v4869_v46  ;;  %v1192_v40 = vsel %vm424_vm1, %v1191_v30, %v1189_v45  ;;  %v7004_v46 = vld [vmem:[#allocation31_spill] sm:$0xff]  ;;  %v7039_v45 = vld [vmem:[#allocation66_spill] sm:$0xff] }
 0x176   :  { %1197 = vmatprep.subr.bf16.mxu0 %v4808_v6  ;;  %1238 = vmatprep.subr.bf16.mxu1 %v4872_v47  ;;  %v1193_v4 = vpack.c.b16 %v1192_v40, %v1192_v40  ;;  %v6990_v6 = vld [vmem:[#allocation17_spill] sm:$0xff]  ;;  %v7005_v47 = vld [vmem:[#allocation32_spill] sm:$0xff]  ;;  %v7040_v30 = vld [vmem:[#allocation67_spill] sm:$0xff] }
 0x177   :  { %1227 = vmatprep.mubr.bf16.mxu0 %v6989_v31  ;;  %1268 = vmatprep.mubr.bf16.mxu1 %v6989_v31  ;;  %v7041_v40 = vld [vmem:[#allocation68_spill] sm:$0xff] }
 0x179   :  { %1198 = vmatpush1.bf16.msra.mxu0 %v4810_v8  ;;  %1239 = vmatpush1.bf16.msra.mxu1 %v4874_v48  ;;  %v6991_v8 = vld [vmem:[#allocation18_spill] sm:$0xff]  ;;  %v7006_v48 = vld [vmem:[#allocation33_spill] sm:$0xff] }
 0x17a   :  { %1199 = vmatprep.subr.bf16.mxu0 %v4813_v10  ;;  %1240 = vmatprep.subr.bf16.mxu1 %v4877_v49  ;;  %v6992_v10 = vld [vmem:[#allocation19_spill] sm:$0xff]  ;;  %v7007_v49 = vld [vmem:[#allocation34_spill] sm:$0xff] }
 0x17d   :  { %1200 = vmatpush1.bf16.msra.mxu0 %v4815_v12  ;;  %1241 = vmatpush1.bf16.msra.mxu1 %v4882_v50  ;;  %v6993_v12 = vld [vmem:[#allocation20_spill] sm:$0xff]  ;;  %v7008_v50 = vld [vmem:[#allocation35_spill] sm:$0xff] }
 0x17e   :  { %1201 = vmatprep.subr.bf16.mxu0 %v4819_v14  ;;  %1242 = vmatprep.subr.bf16.mxu1 %v4884_v51  ;;  %v6994_v14 = vld [vmem:[#allocation21_spill] sm:$0xff]  ;;  %v7009_v51 = vld [vmem:[#allocation36_spill] sm:$0xff] }
 0x181   :  { %1202 = vmatpush1.bf16.msra.mxu0 %v4821_v16  ;;  %1243 = vmatpush1.bf16.msra.mxu1 %v4888_v52  ;;  %v6995_v16 = vld [vmem:[#allocation22_spill] sm:$0xff]  ;;  %v7010_v52 = vld [vmem:[#allocation37_spill] sm:$0xff] }
 0x182   :  { %1203 = vmatprep.subr.bf16.mxu0 %v4825_v20  ;;  %1244 = vmatprep.subr.bf16.mxu1 %v4890_v53  ;;  %v6996_v20 = vld [vmem:[#allocation23_spill] sm:$0xff]  ;;  %v7011_v53 = vld [vmem:[#allocation38_spill] sm:$0xff] }
 0x185   :  { %1204 = vmatpush1.bf16.msra.mxu0 %v4828_v23  ;;  %1245 = vmatpush1.bf16.msra.mxu1 %v4894_v54  ;;  %v6997_v23 = vld [vmem:[#allocation24_spill] sm:$0xff]  ;;  %v7012_v54 = vld [vmem:[#allocation39_spill] sm:$0xff] }
 0x186   :  { %1205 = vmatprep.subr.bf16.mxu0 %v4831_v25  ;;  %1246 = vmatprep.subr.bf16.mxu1 %v4896_v55  ;;  %v6998_v25 = vld [vmem:[#allocation25_spill] sm:$0xff]  ;;  %v7013_v55 = vld [vmem:[#allocation40_spill] sm:$0xff] }
 0x189   :  { %1206 = vmatpush1.bf16.msra.mxu0 %v4835_v27  ;;  %1247 = vmatpush1.bf16.msra.mxu1 %v4900_v56  ;;  %v6999_v27 = vld [vmem:[#allocation26_spill] sm:$0xff]  ;;  %v7014_v56 = vld [vmem:[#allocation41_spill] sm:$0xff] }
 0x18a   :  { %1207 = vmatprep.subr.bf16.mxu0 %v4838_v29  ;;  %1248 = vmatprep.subr.bf16.mxu1 %v4902_v57  ;;  %v7000_v29 = vld [vmem:[#allocation27_spill] sm:$0xff]  ;;  %v7015_v57 = vld [vmem:[#allocation42_spill] sm:$0xff] }
 0x18d   :  { %1208 = vmatpush1.bf16.msra.mxu0 %v4851_v33  ;;  %1249 = vmatpush1.bf16.msra.mxu1 %v4906_v58  ;;  %v7001_v33 = vld [vmem:[#allocation28_spill] sm:$0xff]  ;;  %v7016_v58 = vld [vmem:[#allocation43_spill] sm:$0xff] }
 0x18e   :  { %1209 = vmatprep.subr.bf16.mxu0 %v4859_v37  ;;  %1250 = vmatprep.subr.bf16.mxu1 %v4908_v59  ;;  %v7002_v37 = vld [vmem:[#allocation29_spill] sm:$0xff]  ;;  %v7017_v59 = vld [vmem:[#allocation44_spill] sm:$0xff] }
 0x191   :  { %1210 = vmatpush1.bf16.msra.mxu0 %v4862_v42  ;;  %1251 = vmatpush1.bf16.msra.mxu1 %v4913_v60  ;;  %v7003_v42 = vld [vmem:[#allocation30_spill] sm:$0xff]  ;;  %v7018_v60 = vld [vmem:[#allocation45_spill] sm:$0xff] }
 0x192   :  { %1382 = vmatprep.subr.bf16.mxu0 %v4917_v61  ;;  %1423 = vmatprep.subr.bf16.mxu1 %v4919_v62  ;;  %v7019_v61 = vld [vmem:[#allocation46_spill] sm:$0xff]  ;;  %v7020_v62 = vld [vmem:[#allocation47_spill] sm:$0xff] }
 0x194   :  { %1228 = vmatmul.mubr.bf16.vlgmr.msra.gmra.mrb[8].mxu0 %v1193_v4  ;;  %1269 = vmatmul.mubr.bf16.vlgmr.msra.gmra.mrb[16].mxu1 %v1193_v4  ;;  %v7042_v4 = vld [vmem:[#allocation69_spill] sm:$0xff] }
 0x195   :  { %1383 = vmatpush1.bf16.msra.mxu0 %v4921_v63  ;;  %1424 = vmatpush1.bf16.msra.mxu1 %v4923_v1  ;;  %v7021_v63 = vld [vmem:[#allocation48_spill] sm:$0xff]  ;;  %v7022_v1 = vld [vmem:[#allocation49_spill] sm:$0xff] }
 0x196   :  { %1384 = vmatprep.subr.bf16.mxu0 %v4929_v3  ;;  %1425 = vmatprep.subr.bf16.mxu1 %v4931_v5  ;;  %v7023_v3 = vld [vmem:[#allocation50_spill] sm:$0xff]  ;;  %v7024_v5 = vld [vmem:[#allocation51_spill] sm:$0xff] }
 0x199   :  { %1385 = vmatpush1.bf16.msra.mxu0 %v4933_v7  ;;  %1426 = vmatpush1.bf16.msra.mxu1 %v6990_v6  ;;  %v7025_v7 = vld [vmem:[#allocation52_spill] sm:$0xff]  ;;  %v7043_v6 = vld [vmem:[#allocation70_spill] sm:$0xff] }
 0x19a   :  { %1386 = vmatprep.subr.bf16.mxu0 %v6991_v8  ;;  %1427 = vmatprep.subr.bf16.mxu1 %v6992_v10  ;;  %v7044_v8 = vld [vmem:[#allocation71_spill] sm:$0xff]  ;;  %v7045_v10 = vld [vmem:[#allocation72_spill] sm:$0xff] }
 0x19d   :  { %1387 = vmatpush1.bf16.msra.mxu0 %v6993_v12  ;;  %1428 = vmatpush1.bf16.msra.mxu1 %v6994_v14  ;;  %v7046_v12 = vld [vmem:[#allocation73_spill] sm:$0xff] }
 0x19e   :  { %1388 = vmatprep.subr.bf16.mxu0 %v6995_v16  ;;  %1429 = vmatprep.subr.bf16.mxu1 %v6996_v20  ;;  %v5270_v14 = vld [vmem:[#allocation5 + $0x84] ss:$16 sps:$4 sm:$0xff]   ;;  %v7048_v16 = vld [vmem:[#allocation16_spill] sm:$0xff] }
 0x19f   :  { %7047 = vst [vmem:[#allocation17_spill] sm:$0xff] %v5270_v14  ;;  %v195_v20 = vld [vmem:[#allocation7 + $0x1] ss:$4 sm:$0xf] }
 0x1a1   :  { %1389 = vmatpush1.bf16.msra.mxu0 %v6997_v23  ;;  %1430 = vmatpush1.bf16.msra.mxu1 %v6998_v25  ;;  %v7049_v23 = vld [vmem:[#allocation75_spill] sm:$0xff] }
 0x1a2   :  { %1390 = vmatprep.subr.bf16.mxu0 %v6999_v27  ;;  %1431 = vmatprep.subr.bf16.mxu1 %v7000_v29  ;;  %v5275_v25 = vrot.slane %v195_v20, %v7049_v23  ;;  %v7053_v23 = vsub.s32 2, %v5114_v35 }
 0x1a4   :  { %7050 = vst [vmem:[#allocation18_spill] sm:$0xff] %v5275_v25 }
 0x1a5   :  { %1391 = vmatpush1.bf16.msra.mxu0 %v7001_v33  ;;  %1432 = vmatpush1.bf16.msra.mxu1 %v7002_v37 }
 0x1a6   :  { %1392 = vmatprep.subr.bf16.mxu0 %v7003_v42  ;;  %1433 = vmatprep.subr.bf16.mxu1 %v7004_v46 }
 0x1a9   :  { %1393 = vmatpush1.bf16.msra.mxu0 %v7005_v47  ;;  %1434 = vmatpush1.bf16.msra.mxu1 %v7006_v48 }
 0x1aa   :  { %1394 = vmatprep.subr.bf16.mxu0 %v7007_v49  ;;  %1435 = vmatprep.subr.bf16.mxu1 %v7008_v50 }
 0x1ad   :  { %1395 = vmatpush1.bf16.msra.mxu0 %v7009_v51  ;;  %1436 = vmatpush1.bf16.msra.mxu1 %v7010_v52 }
 0x1ae   :  { %1396 = vmatprep.subr.bf16.mxu0 %v7011_v53  ;;  %1437 = vmatprep.subr.bf16.mxu1 %v7012_v54 }
 0x1b1   :  { %1397 = vmatpush1.bf16.msra.mxu0 %v7013_v55  ;;  %1438 = vmatpush1.bf16.msra.mxu1 %v7014_v56 }
 0x1b2   :  { %1398 = vmatprep.subr.bf16.mxu0 %v7015_v57  ;;  %1439 = vmatprep.subr.bf16.mxu1 %v7016_v58 }
 0x1b5   :  { %1399 = vmatpush1.bf16.msra.mxu0 %v7017_v59  ;;  %1440 = vmatpush1.bf16.msra.mxu1 %v7018_v60 }
 0x1b6   :  { %1400 = vmatprep.subr.bf16.mxu0 %v7019_v61  ;;  %1441 = vmatprep.subr.bf16.mxu1 %v7020_v62 }
 0x1b9   :  { %1401 = vmatpush1.bf16.msra.mxu0 %v7021_v63  ;;  %1442 = vmatpush1.bf16.msra.mxu1 %v7022_v1 }
 0x1ba   :  { %1402 = vmatprep.subr.bf16.mxu0 %v7023_v3  ;;  %1443 = vmatprep.subr.bf16.mxu1 %v7024_v5 }
 0x1bd   :  { %1403 = vmatpush1.bf16.msra.mxu0 %v7025_v7  ;;  %1444 = vmatpush1.bf16.msra.mxu1 %v7026_v2 }
 0x1be   :  { %1404 = vmatprep.subr.bf16.mxu0 %v7027_v43  ;;  %1445 = vmatprep.subr.bf16.mxu1 %v7028_v0 }
 0x1c1   :  { %1405 = vmatpush1.bf16.msra.mxu0 %v7029_v18  ;;  %1446 = vmatpush1.bf16.msra.mxu1 %v7030_v32 }
 0x1c2   :  { %1406 = vmatprep.subr.bf16.mxu0 %v7031_v44  ;;  %1447 = vmatprep.subr.bf16.mxu1 %v7032_v11 }
 0x1c5   :  { %1407 = vmatpush1.bf16.msra.mxu0 %v7033_v9  ;;  %1448 = vmatpush1.bf16.msra.mxu1 %v7034_v15  ;;  %v5284_v15 = vrot.slane %v195_v20, %v7053_v23 }
 0x1c6   :  { %1408 = vmatprep.subr.bf16.mxu0 %v7035_v24  ;;  %1449 = vmatprep.subr.bf16.mxu1 %v7036_v26 }
 0x1c7   :  { %7054 = vst [vmem:[#allocation20_spill] sm:$0xff] %v5284_v15 }
 0x1c9   :  { %1409 = vmatpush1.bf16.msra.mxu0 %v7037_v38  ;;  %1450 = vmatpush1.bf16.msra.mxu1 %v7038_v36 }
 0x1ca   :  { %1410 = vmatprep.subr.bf16.mxu0 %v7039_v45  ;;  %1451 = vmatprep.subr.bf16.mxu1 %v7040_v30 }
 0x1cd   :  { %1411 = vmatpush1.bf16.msra.mxu0 %v7041_v40  ;;  %1452 = vmatpush1.bf16.msra.mxu1 %v7042_v4  ;;  %v7051_v40 = vld [vmem:[#allocation76_spill] sm:$0xff] }
 0x1ce   :  { %1412 = vmatprep.subr.bf16.mxu0 %v7043_v6  ;;  %1453 = vmatprep.subr.bf16.mxu1 %v7044_v8  ;;  %v5278_v4 = vrot.slane %v195_v20, %v7051_v40  ;;  %v7055_v40 = vsub.s32 3, %v5114_v35 }
 0x1d0   :  { %7052 = vst [vmem:[#allocation19_spill] sm:$0xff] %v5278_v4  ;;  %v5288_v9 = vrot.slane %v195_v20, %v7055_v40 }
 0x1d1   :  { %1413 = vmatpush1.bf16.msra.mxu0 %v7045_v10  ;;  %1454 = vmatpush1.bf16.msra.mxu1 %v7046_v12 }
 0x1d2   :  { %1498 = vmatprep.subr.bf16.mxu0 %v5270_v14  ;;  %1539 = vmatprep.subr.bf16.mxu1 %v7048_v16  ;;  %7056 = vst [vmem:[#allocation21_spill] sm:$0xff] %v5288_v9 }
 0x247   :  { %v1108_v6 = vpop.f32.mrb[4].mxu0  ;;  %v1149_v30 = vpop.f32.mrb[12].mxu1 }
 0x248   :  { %v1109_v8 = vadd.f32 %v1108_v6, %v5275_v25  ;;  %v1110_v10 = vpop.f32.mrb[5].mxu0  ;;  %v1151_v45 = vpop.f32.mrb[13].mxu1  ;;  %v1150_v6 = vadd.f32 %v1149_v30, %v5284_v15 }
 0x249   :  { %v1111_v12 = vadd.f32 %v1110_v10, %v5278_v4  ;;  %v1112_v36 = vpop.f32.mrb[6].mxu0  ;;  %v1153_v38 = vpop.f32.mrb[14].mxu1  ;;  %v1152_v10 = vadd.f32 %v1151_v45, %v5288_v9 }
 0x24a   :  { %v3705_v14 = vmul.f32 -1.442695, %v1109_v8  ;;  %v1113_v26 = vpop.f32.mrb[7].mxu0  ;;  %v1154_v16 = vpop.f32.mrb[15].mxu1  ;;  %v3707_v36 = vmul.f32 -1.442695, %v1150_v6 }
 0x24b   :  { %v3706_v24 = vmul.f32 -1.442695, %v1111_v12 }
 0x24c   :  { %4026 = vpow2.f32 %v3705_v14  ;;  %v1177_v14 = vrot.slane %v5157_v19, 1 }
 0x24d   :  { %4028 = vpow2.f32 %v3706_v24 }
 0x24e   :  { %4030 = vtanh.f32 %v1152_v10  ;;  %v1178_v40 = vsel %vm424_vm1, %v5162_v39, %v1177_v14 }
 0x24f   :  { %4032 = vpow2.f32 %v3707_v36 }
 0x256   :  { %v4027_v38 = vpop.eup %4026 }
 0x257   :  { %v1165_v8 = vadd.f32 1.0, %v4027_v38  ;;  %v4029_v26 = vpop.eup %4028 }
 0x258   :  { %v1166_v12 = vadd.f32 1.0, %v4029_v26  ;;  %v4031_v24 = vpop.eup %4030 }
 0x259   :  { %4034 = vrcp.f32 %v1165_v8  ;;  %v4033_v23 = vpop.eup %4032 }
 0x25a   :  { %4036 = vrcp.f32 %v1166_v12  ;;  %v1167_v45 = vadd.f32 1.0, %v4033_v23 }
 0x25c   :  { %4038 = vrcp.f32 %v1167_v45 }
 0x263   :  { %v4035_v16 = vpop.eup %4034 }
 0x264   :  { %v1181_v30 = vmul.f32 %v4035_v16, %v4031_v24  ;;  %v4037_v20 = vpop.eup %4036 }
 0x265   :  { %v1180_v6 = vmul.f32 %v4037_v20, %v1178_v40  ;;  %v7057_v40 = vld [vmem:[#allocation78_spill] sm:$0xff] }
 0x267   :  { %v1229_v35 = vpop.f32.mrb[8].mxu0  ;;  %v1270_v38 = vpop.f32.mrb[16].mxu1  ;;  %v5295_v10 = vadd.f32 %v1181_v30, %v1180_v6 }
 0x268   :  { %v1281_v36 = vrot.slane %v1229_v35, 7  ;;  %v1297_v8 = vadd.f32 %v1229_v35, %v5128_v17  ;;  %v1231_v26 = vpop.f32.mrb[9].mxu0  ;;  %v1272_v12 = vpop.f32.mrb[17].mxu1  ;;  %v1283_v16 = vrot.slane %v1270_v38, 7  ;;  %v1299_v45 = vadd.f32 %v1270_v38, %v5146_v34 }
 0x269   :  { %v1282_v19 = vrot.slane %v1231_v26, 7  ;;  %v1298_v9 = vadd.f32 %v1231_v26, %v5131_v13  ;;  %v1233_v15 = vpop.f32.mrb[10].mxu0  ;;  %v1274_v4 = vpop.f32.mrb[18].mxu1  ;;  %4040 = vtanh.f32 %v5295_v10  ;;  %v1284_v26 = vrot.slane %v1272_v12, 7 }
 0x26a   :  { %v1293_v39 = vadd.f32 %v1281_v36, %v5124_v22  ;;  %v3711_v14 = vmul.f32 -1.442695, %v1297_v8  ;;  %v1234_v24 = vpop.f32.mrb[11].mxu0  ;;  %v1275_v23 = vpop.f32.mrb[19].mxu1  ;;  %v1295_v15 = vadd.f32 %v1283_v16, %v5142_v41  ;;  %v3713_v4 = vmul.f32 -1.442695, %v1299_v45 }
 0x26b   :  { %v1294_v30 = vadd.f32 %v1282_v19, %v7057_v40  ;;  %v3712_v6 = vmul.f32 -1.442695, %v1298_v9  ;;  %v4039_v36 = vpop.eup %4038  ;;  %v7058_v23 = vld [vmem:[#allocation82_spill] sm:$0xff] }
 0x26c   :  { %v3708_v20 = vmul.f32 -1.442695, %v1293_v39  ;;  %4042 = vpow2.f32 %v3711_v14  ;;  %v3710_v8 = vmul.f32 -1.442695, %v1295_v15  ;;  %v1300_v13 = vadd.f32 %v1272_v12, %v7058_v23  ;;  %v7059_v39 = vld [vmem:[#allocation81_spill] sm:$0xff] }
 0x26d   :  { %v3709_v35 = vmul.f32 -1.442695, %v1294_v30  ;;  %v1296_v14 = vadd.f32 %v1284_v26, %v7059_v39 }
 0x26e   :  { %4044 = vpow2.f32 %v3708_v20 }
 0x26f   :  { %4046 = vpow2.f32 %v3709_v35 }
 0x270   :  { %4048 = vpow2.f32 %v3712_v6 }
 0x271   :  { %4050 = vpow2.f32 %v3713_v4 }
 0x272   :  { %4052 = vpow2.f32 %v3710_v8 }
 0x273   :  { %v4041_v24 = vpop.eup %4040  ;;  %4054 = vtanh.f32 %v1300_v13 }
 0x274   :  { %v1184_v17 = vmul.f32 %v4041_v24, %v4039_v36 }
 0x276   :  { %v4043_v19 = vpop.eup %4042  ;;  %v1362_v30 = vrot.slane %v1184_v17, 7 }
 0x277   :  { %v1322_v9 = vadd.f32 1.0, %v4043_v19 }
 0x278   :  { %v4045_v38 = vpop.eup %4044  ;;  %v1365_v20 = vpack.c.bf16 %v1362_v30, %v1362_v30 }
 0x279   :  { %v1319_v16 = vadd.f32 1.0, %v4045_v38  ;;  %4056 = vrcp.f32 %v1322_v9  ;;  %v4047_v35 = vpop.eup %4046 }
 0x27a   :  { %4058 = vtanh.f32 %v1296_v14  ;;  %v4049_v6 = vpop.eup %4048  ;;  %v1320_v45 = vadd.f32 1.0, %v4047_v35  ;;  %v1376_v15 = vshll.u32 %v1365_v20, 16  ;;  %v1374_v36 = vshrl.u32 %v1365_v20, 16 }
 0x27b   :  { %4060 = vrcp.f32 %v1319_v16  ;;  %v1323_v12 = vadd.f32 1.0, %v4049_v6  ;;  %v4051_v24 = vpop.eup %4050  ;;  %v1341_v14 = vrot.slane %v5166_v21, 7  ;;  %v1342_v20 = vrot.slane %v5168_v28, 7 }
 0x27c   :  { %4062 = vrcp.f32 %v1320_v45  ;;  %v1378_v4 = vrot.slane %v1376_v15, 1  ;;  %v4053_v8 = vpop.eup %4052  ;;  %v1324_v38 = vadd.f32 1.0, %v4051_v24 }
 0x27d   :  { %4064 = vrcp.f32 %v1323_v12  ;;  %v4055_v13 = vpop.eup %4054  ;;  %v1321_v6 = vadd.f32 1.0, %v4053_v8 }
 0x27e   :  { %v1379_v26 = vor.u32 %v1378_v4, %v1374_v36  ;;  %4066 = vrcp.f32 %v1324_v38 }
 0x27f   :  { %4068 = vrcp.f32 %v1321_v6 }
 0x280   :  { %1414 = vmatprep.mubr.bf16.mxu0 %v1379_v26  ;;  %1455 = vmatprep.mubr.bf16.mxu1 %v1379_v26 }
 0x283   :  { %v4057_v17 = vpop.eup %4056 }
 0x284   :  { %v4059_v19 = vpop.eup %4058  ;;  %v1348_v9 = vmul.f32 %v4057_v17, %v4055_v13 }
 0x285   :  { %v4061_v30 = vpop.eup %4060 }
 0x286   :  { %v1347_v16 = vmul.f32 %v4061_v30, %v4059_v19  ;;  %v4063_v35 = vpop.eup %4062 }
 0x287   :  { %v4065_v45 = vpop.eup %4064  ;;  %v1345_v15 = vmul.f32 %v4063_v35, %v1341_v14 }
 0x288   :  { %v1346_v12 = vmul.f32 %v4065_v45, %v1342_v20  ;;  %v4067_v21 = vpop.eup %4066 }
 0x289   :  { %v5308_v36 = vadd.f32 %v1347_v16, %v1345_v15  ;;  %v4069_v26 = vpop.eup %4068 }
 0x28a   :  { %v5310_v4 = vadd.f32 %v1348_v9, %v1346_v12 }
 0x28b   :  { %4070 = vtanh.f32 %v5308_v36 }
 0x28c   :  { %4072 = vtanh.f32 %v5310_v4 }
 0x295   :  { %v4071_v24 = vpop.eup %4070 }
 0x296   :  { %v4073_v13 = vpop.eup %4072  ;;  %v1353_v8 = vmul.f32 %v4071_v24, %v4069_v26  ;;  %v5317_v26 = vld [vmem:[#allocation5 + $0x80] ss:$16 sps:$4 sm:$0xff]   ;;  %v5323_v24 = vld [vmem:[#allocation5 + $0xa4] ss:$16 sps:$4 sm:$0xff]  }
 0x297   :  { %v1354_v17 = vmul.f32 %v4073_v13, %v4067_v21  ;;  %v5320_v21 = vld [vmem:[#allocation5 + $0x88] ss:$16 sps:$4 sm:$0xff]   ;;  %v5326_v13 = vld [vmem:[#allocation5 + $0xac] ss:$16 sps:$4 sm:$0xff]  }
 0x298   :  { %v1488_v28 = vpack.c.bf16 %v1353_v8, %v1353_v8 }
 0x299   :  { %v1357_v19 = vrot.slane %v1354_v17, 7  ;;  %v1489_v30 = vpack.c.bf16 %v1354_v17, %v1354_v17  ;;  %v5334_v17 = vld [vmem:[#allocation5 + $0xa8] ss:$16 sps:$4 sm:$0xff]  }
 0x29a   :  { %v1492_v14 = vunpack.c.l.b16 %v1488_v28  ;;  %v5337_v28 = vld [vmem:[#allocation5 + $0xc4] ss:$16 sps:$4 sm:$0xff]  }
 0x29b   :  { %v1359_v38 = vsel %vm1358_vm2, %v1357_v19, %v1353_v8  ;;  %v1493_v35 = vunpack.c.l.b16 %v1489_v30  ;;  %v5331_v8 = vld [vmem:[#allocation5 + $0xa0] ss:$16 sps:$4 sm:$0xff]   ;;  %v5340_v19 = vld [vmem:[#allocation5 + $0xcc] ss:$16 sps:$4 sm:$0xff]  }
 0x29c   :  { %v1364_v16 = vpack.c.bf16 %v1359_v38, %v1359_v38  ;;  %v1494_v9 = vrot.slane %v1492_v14, 1  ;;  %v5343_v30 = vld [vmem:[#allocation5 + $0xc0] ss:$16 sps:$4 sm:$0xff]   ;;  %v5346_v14 = vld [vmem:[#allocation5 + $0xc8] ss:$16 sps:$4 sm:$0xff]  }
 0x29d   :  { %v5349_v38 = vld [vmem:[#allocation5 + $0xe4] ss:$16 sps:$4 sm:$0xff]  }
 0x29e   :  { %v1369_v6 = vshll.u32 %v1364_v16, 16  ;;  %v5315_v20 = vsel %vm424_vm1, %v1493_v35, %v1494_v9  ;;  %v1367_v45 = vshrl.u32 %v1364_v16, 16  ;;  %v5352_v16 = vld [vmem:[#allocation5 + $0xec] ss:$16 sps:$4 sm:$0xff]   ;;  %v5355_v35 = vld [vmem:[#allocation5 + $0xe0] ss:$16 sps:$4 sm:$0xff]  }
 0x29f   :  { %7060 = vst [vmem:[#allocation22_spill] sm:$0xff] %v5355_v35  ;;  %v5358_v9 = vld [vmem:[#allocation5 + $0xe8] ss:$16 sps:$4 sm:$0xff]  }
 0x2a0   :  { %v1371_v15 = vrot.slane %v1369_v6, 1  ;;  %7061 = vst [vmem:[#allocation23_spill] sm:$0xff] %v5358_v9  ;;  %v5361_v6 = vld [vmem:[#allocation5 + $0x104] ss:$16 sps:$4 sm:$0xff]  }
 0x2a1   :  { %7062 = vst [vmem:[#allocation24_spill] sm:$0xff] %v5361_v6 }
 0x2a2   :  { %v1372_v12 = vor.u32 %v1371_v15, %v1367_v45  ;;  %v5364_v45 = vld [vmem:[#allocation5 + $0x10c] ss:$16 sps:$4 sm:$0xff]   ;;  %v5367_v15 = vld [vmem:[#allocation5 + $0x100] ss:$16 sps:$4 sm:$0xff]  }
 0x2a3   :  { %7063 = vst [vmem:[#allocation25_spill] sm:$0xff] %v5364_v45  ;;  %7064 = vst [vmem:[#allocation26_spill] sm:$0xff] %v5367_v15 }
 0x2a4   :  { %1415 = vmatmul.mubr.bf16.vlgmr.msra.gmra.mrb[12].mxu0 %v1372_v12  ;;  %1456 = vmatmul.mubr.bf16.vlgmr.msra.gmra.mrb[20].mxu1 %v1372_v12  ;;  %v5370_v12 = vld [vmem:[#allocation5 + $0x108] ss:$16 sps:$4 sm:$0xff]  }
 0x2a5   :  { %1499 = vmatpush1.bf16.msra.mxu0 %v5317_v26  ;;  %1540 = vmatpush1.bf16.msra.mxu1 %v5320_v21  ;;  %7065 = vst [vmem:[#allocation27_spill] sm:$0xff] %v5370_v12 }
 0x2a6   :  { %1500 = vmatprep.subr.bf16.mxu0 %v5323_v24  ;;  %1541 = vmatprep.subr.bf16.mxu1 %v5326_v13 }
 0x2a7   :  { %1530 = vmatprep.mubr.bf16.mxu0 %v6989_v31  ;;  %1571 = vmatprep.mubr.bf16.mxu1 %v6989_v31 }
 0x2a9   :  { %1501 = vmatpush1.bf16.msra.mxu0 %v5331_v8  ;;  %1542 = vmatpush1.bf16.msra.mxu1 %v5334_v17 }
 0x2aa   :  { %1502 = vmatprep.subr.bf16.mxu0 %v5337_v28  ;;  %1543 = vmatprep.subr.bf16.mxu1 %v5340_v19 }
 0x2ad   :  { %1503 = vmatpush1.bf16.msra.mxu0 %v5343_v30  ;;  %1544 = vmatpush1.bf16.msra.mxu1 %v5346_v14 }
 0x2ae   :  { %1504 = vmatprep.subr.bf16.mxu0 %v5349_v38  ;;  %1545 = vmatprep.subr.bf16.mxu1 %v5352_v16 }
 0x2b1   :  { %1505 = vmatpush1.bf16.msra.mxu0 %v5355_v35  ;;  %1546 = vmatpush1.bf16.msra.mxu1 %v5358_v9  ;;  %v5373_v35 = vld [vmem:[#allocation5 + $0x124] ss:$16 sps:$4 sm:$0xff]   ;;  %v5376_v9 = vld [vmem:[#allocation5 + $0x12c] ss:$16 sps:$4 sm:$0xff]  }
 0x2b2   :  { %1506 = vmatprep.subr.bf16.mxu0 %v5361_v6  ;;  %1547 = vmatprep.subr.bf16.mxu1 %v5364_v45  ;;  %7066 = vst [vmem:[#allocation28_spill] sm:$0xff] %v5373_v35  ;;  %7067 = vst [vmem:[#allocation29_spill] sm:$0xff] %v5376_v9  ;;  %v5379_v6 = vld [vmem:[#allocation5 + $0x120] ss:$16 sps:$4 sm:$0xff]   ;;  %v5382_v45 = vld [vmem:[#allocation5 + $0x128] ss:$16 sps:$4 sm:$0xff]  }
 0x2b3   :  { %7068 = vst [vmem:[#allocation30_spill] sm:$0xff] %v5379_v6  ;;  %7069 = vst [vmem:[#allocation31_spill] sm:$0xff] %v5382_v45 }
 0x2b5   :  { %1507 = vmatpush1.bf16.msra.mxu0 %v5367_v15  ;;  %1548 = vmatpush1.bf16.msra.mxu1 %v5370_v12  ;;  %v5385_v15 = vld [vmem:[#allocation5 + $0x144] ss:$16 sps:$4 sm:$0xff]   ;;  %v5388_v12 = vld [vmem:[#allocation5 + $0x14c] ss:$16 sps:$4 sm:$0xff]  }
 0x2b6   :  { %1508 = vmatprep.subr.bf16.mxu0 %v5373_v35  ;;  %1549 = vmatprep.subr.bf16.mxu1 %v5376_v9  ;;  %7070 = vst [vmem:[#allocation32_spill] sm:$0xff] %v5385_v15  ;;  %7071 = vst [vmem:[#allocation33_spill] sm:$0xff] %v5388_v12  ;;  %v5391_v35 = vld [vmem:[#allocation5 + $0x140] ss:$16 sps:$4 sm:$0xff]   ;;  %v5394_v9 = vld [vmem:[#allocation5 + $0x148] ss:$16 sps:$4 sm:$0xff]  }
 0x2b7   :  { %7072 = vst [vmem:[#allocation34_spill] sm:$0xff] %v5391_v35  ;;  %7073 = vst [vmem:[#allocation35_spill] sm:$0xff] %v5394_v9 }
 0x2b9   :  { %1509 = vmatpush1.bf16.msra.mxu0 %v5379_v6  ;;  %1550 = vmatpush1.bf16.msra.mxu1 %v5382_v45  ;;  %v5397_v6 = vld [vmem:[#allocation5 + $0x164] ss:$16 sps:$4 sm:$0xff]   ;;  %v5400_v45 = vld [vmem:[#allocation5 + $0x16c] ss:$16 sps:$4 sm:$0xff]  }
 0x2ba   :  { %1510 = vmatprep.subr.bf16.mxu0 %v5385_v15  ;;  %1551 = vmatprep.subr.bf16.mxu1 %v5388_v12  ;;  %7074 = vst [vmem:[#allocation36_spill] sm:$0xff] %v5397_v6  ;;  %7075 = vst [vmem:[#allocation37_spill] sm:$0xff] %v5400_v45  ;;  %v5403_v15 = vld [vmem:[#allocation5 + $0x160] ss:$16 sps:$4 sm:$0xff]   ;;  %v5406_v12 = vld [vmem:[#allocation5 + $0x168] ss:$16 sps:$4 sm:$0xff]  }
 0x2bb   :  { %7076 = vst [vmem:[#allocation38_spill] sm:$0xff] %v5403_v15  ;;  %7077 = vst [vmem:[#allocation39_spill] sm:$0xff] %v5406_v12 }
 0x2bd   :  { %1511 = vmatpush1.bf16.msra.mxu0 %v5391_v35  ;;  %1552 = vmatpush1.bf16.msra.mxu1 %v5394_v9  ;;  %v1496_v35 = vpack.c.b16 %v5315_v20, %v5315_v20  ;;  %v5411_v9 = vld [vmem:[#allocation5 + $0x184] ss:$16 sps:$4 sm:$0xff]   ;;  %v5426_v20 = vld [vmem:[#allocation5 + $0x1ac] ss:$16 sps:$4 sm:$0xff]  }
 0x2be   :  { %1512 = vmatprep.subr.bf16.mxu0 %v5397_v6  ;;  %1553 = vmatprep.subr.bf16.mxu1 %v5400_v45  ;;  %7078 = vst [vmem:[#allocation40_spill] sm:$0xff] %v5411_v9  ;;  %v5414_v6 = vld [vmem:[#allocation5 + $0x18c] ss:$16 sps:$4 sm:$0xff]   ;;  %v5417_v45 = vld [vmem:[#allocation5 + $0x180] ss:$16 sps:$4 sm:$0xff]   ;;  %7082 = vst [vmem:[#allocation44_spill] sm:$0xff] %v5426_v20 }
 0x2bf   :  { %7079 = vst [vmem:[#allocation41_spill] sm:$0xff] %v5417_v45 }
 0x2c1   :  { %1513 = vmatpush1.bf16.msra.mxu0 %v5403_v15  ;;  %1554 = vmatpush1.bf16.msra.mxu1 %v5406_v12  ;;  %v5420_v15 = vld [vmem:[#allocation5 + $0x188] ss:$16 sps:$4 sm:$0xff]   ;;  %v5423_v12 = vld [vmem:[#allocation5 + $0x1a4] ss:$16 sps:$4 sm:$0xff]  }
 0x2c2   :  { %1679 = vmatprep.subr.bf16.mxu0 %v5411_v9  ;;  %1720 = vmatprep.subr.bf16.mxu1 %v5414_v6  ;;  %7080 = vst [vmem:[#allocation42_spill] sm:$0xff] %v5420_v15  ;;  %7081 = vst [vmem:[#allocation43_spill] sm:$0xff] %v5423_v12  ;;  %v5429_v9 = vld [vmem:[#allocation5 + $0x1a0] ss:$16 sps:$4 sm:$0xff]  }
 0x2c3   :  { %7083 = vst [vmem:[#allocation45_spill] sm:$0xff] %v5429_v9 }
 0x2c4   :  { %1531 = vmatmul.mubr.bf16.vlgmr.msra.gmra.mrb[16].mxu0 %v1496_v35  ;;  %1572 = vmatmul.mubr.bf16.vlgmr.msra.gmra.mrb[24].mxu1 %v1496_v35  ;;  %v5432_v35 = vld [vmem:[#allocation5 + $0x1a8] ss:$16 sps:$4 sm:$0xff]  }
 0x2c5   :  { %1680 = vmatpush1.bf16.msra.mxu0 %v5417_v45  ;;  %1721 = vmatpush1.bf16.msra.mxu1 %v5420_v15  ;;  %7084 = vst [vmem:[#allocation46_spill] sm:$0xff] %v5432_v35  ;;  %v5435_v45 = vld [vmem:[#allocation5 + $0x1c4] ss:$16 sps:$4 sm:$0xff]   ;;  %v5438_v15 = vld [vmem:[#allocation5 + $0x1cc] ss:$16 sps:$4 sm:$0xff]  }
 0x2c6   :  { %1681 = vmatprep.subr.bf16.mxu0 %v5423_v12  ;;  %1722 = vmatprep.subr.bf16.mxu1 %v5426_v20  ;;  %7085 = vst [vmem:[#allocation47_spill] sm:$0xff] %v5435_v45  ;;  %7086 = vst [vmem:[#allocation48_spill] sm:$0xff] %v5438_v15  ;;  %v5441_v12 = vld [vmem:[#allocation5 + $0x1c0] ss:$16 sps:$4 sm:$0xff]   ;;  %v5444_v20 = vld [vmem:[#allocation5 + $0x1c8] ss:$16 sps:$4 sm:$0xff]  }
 0x2c7   :  { %7087 = vst [vmem:[#allocation49_spill] sm:$0xff] %v5441_v12  ;;  %7088 = vst [vmem:[#allocation50_spill] sm:$0xff] %v5444_v20 }
 0x2c9   :  { %1682 = vmatpush1.bf16.msra.mxu0 %v5429_v9  ;;  %1723 = vmatpush1.bf16.msra.mxu1 %v5432_v35  ;;  %v5447_v9 = vld [vmem:[#allocation5 + $0x1e4] ss:$16 sps:$4 sm:$0xff]   ;;  %v5450_v35 = vld [vmem:[#allocation5 + $0x1ec] ss:$16 sps:$4 sm:$0xff]  }
 0x2ca   :  { %1683 = vmatprep.subr.bf16.mxu0 %v5435_v45  ;;  %1724 = vmatprep.subr.bf16.mxu1 %v5438_v15  ;;  %7089 = vst [vmem:[#allocation51_spill] sm:$0xff] %v5447_v9  ;;  %7090 = vst [vmem:[#allocation52_spill] sm:$0xff] %v5450_v35  ;;  %v5453_v45 = vld [vmem:[#allocation5 + $0x1e0] ss:$16 sps:$4 sm:$0xff]   ;;  %v5456_v15 = vld [vmem:[#allocation5 + $0x1e8] ss:$16 sps:$4 sm:$0xff]  }
 0x2cb   :  { %7091 = vst [vmem:[#allocation53_spill] sm:$0xff] %v5453_v45  ;;  %7092 = vst [vmem:[#allocation54_spill] sm:$0xff] %v5456_v15 }
 0x2cd   :  { %1684 = vmatpush1.bf16.msra.mxu0 %v5441_v12  ;;  %1725 = vmatpush1.bf16.msra.mxu1 %v5444_v20 }
 0x2ce   :  { %1685 = vmatprep.subr.bf16.mxu0 %v5447_v9  ;;  %1726 = vmatprep.subr.bf16.mxu1 %v5450_v35 }
 0x2d1   :  { %1686 = vmatpush1.bf16.msra.mxu0 %v5453_v45  ;;  %1727 = vmatpush1.bf16.msra.mxu1 %v5456_v15 }
 0x2d2   :  { %1687 = vmatprep.subr.bf16.mxu0 %v6999_v27  ;;  %1728 = vmatprep.subr.bf16.mxu1 %v7000_v29  ;;  %v7093_v27 = vld [vmem:[#allocation60_spill] sm:$0xff]  ;;  %v7094_v29 = vld [vmem:[#allocation61_spill] sm:$0xff] }
 0x2d5   :  { %1688 = vmatpush1.bf16.msra.mxu0 %v7001_v33  ;;  %1729 = vmatpush1.bf16.msra.mxu1 %v7002_v37  ;;  %v7095_v33 = vld [vmem:[#allocation62_spill] sm:$0xff]  ;;  %v7096_v37 = vld [vmem:[#allocation63_spill] sm:$0xff] }
 0x2d6   :  { %1689 = vmatprep.subr.bf16.mxu0 %v7003_v42  ;;  %1730 = vmatprep.subr.bf16.mxu1 %v7004_v46  ;;  %v7097_v42 = vld [vmem:[#allocation64_spill] sm:$0xff]  ;;  %v7098_v46 = vld [vmem:[#allocation65_spill] sm:$0xff] }
 0x2d9   :  { %1690 = vmatpush1.bf16.msra.mxu0 %v7005_v47  ;;  %1731 = vmatpush1.bf16.msra.mxu1 %v7006_v48  ;;  %v7099_v47 = vld [vmem:[#allocation66_spill] sm:$0xff]  ;;  %v7100_v48 = vld [vmem:[#allocation67_spill] sm:$0xff] }
 0x2da   :  { %1691 = vmatprep.subr.bf16.mxu0 %v7007_v49  ;;  %1732 = vmatprep.subr.bf16.mxu1 %v7008_v50  ;;  %v7101_v49 = vld [vmem:[#allocation68_spill] sm:$0xff]  ;;  %v7102_v50 = vld [vmem:[#allocation69_spill] sm:$0xff] }
 0x2dd   :  { %1692 = vmatpush1.bf16.msra.mxu0 %v7009_v51  ;;  %1733 = vmatpush1.bf16.msra.mxu1 %v7010_v52  ;;  %v7103_v51 = vld [vmem:[#allocation70_spill] sm:$0xff]  ;;  %v7104_v52 = vld [vmem:[#allocation71_spill] sm:$0xff] }
 0x2de   :  { %1693 = vmatprep.subr.bf16.mxu0 %v7011_v53  ;;  %1734 = vmatprep.subr.bf16.mxu1 %v7012_v54  ;;  %v7105_v53 = vld [vmem:[#allocation72_spill] sm:$0xff]  ;;  %v7106_v54 = vld [vmem:[#allocation73_spill] sm:$0xff] }
 0x2e1   :  { %1694 = vmatpush1.bf16.msra.mxu0 %v7013_v55  ;;  %1735 = vmatpush1.bf16.msra.mxu1 %v7014_v56  ;;  %v7107_v55 = vld [vmem:[#allocation17_spill] sm:$0xff]  ;;  %v5508_v56 = vld [vmem:[#allocation5 + $0x8c] ss:$16 sps:$4 sm:$0xff]  }
 0x2e2   :  { %1695 = vmatprep.subr.bf16.mxu0 %v7015_v57  ;;  %1736 = vmatprep.subr.bf16.mxu1 %v7016_v58  ;;  %7108 = vst [vmem:[#allocation55_spill] sm:$0xff] %v5508_v56 }
 0x2e5   :  { %1696 = vmatpush1.bf16.msra.mxu0 %v7017_v59  ;;  %1737 = vmatpush1.bf16.msra.mxu1 %v7018_v60 }
 0x2e6   :  { %1697 = vmatprep.subr.bf16.mxu0 %v7019_v61  ;;  %1738 = vmatprep.subr.bf16.mxu1 %v7020_v62  ;;  %v7109_v62 = vld [vmem:[#allocation19_spill] sm:$0xff] }
 0x2e9   :  { %1698 = vmatpush1.bf16.msra.mxu0 %v7021_v63  ;;  %1739 = vmatpush1.bf16.msra.mxu1 %v7022_v1 }
 0x2ea   :  { %1699 = vmatprep.subr.bf16.mxu0 %v7023_v3  ;;  %1740 = vmatprep.subr.bf16.mxu1 %v7024_v5 }
 0x2ed   :  { %1700 = vmatpush1.bf16.msra.mxu0 %v7025_v7  ;;  %1741 = vmatpush1.bf16.msra.mxu1 %v7026_v2 }
 0x2ee   :  { %1701 = vmatprep.subr.bf16.mxu0 %v7027_v43  ;;  %1742 = vmatprep.subr.bf16.mxu1 %v7028_v0  ;;  %v7110_v0 = vld [vmem:[#allocation20_spill] sm:$0xff] }
 0x2f1   :  { %1702 = vmatpush1.bf16.msra.mxu0 %v7029_v18  ;;  %1743 = vmatpush1.bf16.msra.mxu1 %v7030_v32  ;;  %v7111_v32 = vld [vmem:[#allocation21_spill] sm:$0xff] }
 0x2f2   :  { %1703 = vmatprep.subr.bf16.mxu0 %v7031_v44  ;;  %1744 = vmatprep.subr.bf16.mxu1 %v7032_v11 }
 0x2f5   :  { %1704 = vmatpush1.bf16.msra.mxu0 %v7093_v27  ;;  %1745 = vmatpush1.bf16.msra.mxu1 %v7094_v29 }
 0x2f6   :  { %1705 = vmatprep.subr.bf16.mxu0 %v7095_v33  ;;  %1746 = vmatprep.subr.bf16.mxu1 %v7096_v37 }
 0x2f9   :  { %1706 = vmatpush1.bf16.msra.mxu0 %v7097_v42  ;;  %1747 = vmatpush1.bf16.msra.mxu1 %v7098_v46 }
 0x2fa   :  { %1707 = vmatprep.subr.bf16.mxu0 %v7099_v47  ;;  %1748 = vmatprep.subr.bf16.mxu1 %v7100_v48 }
 0x2fd   :  { %1708 = vmatpush1.bf16.msra.mxu0 %v7101_v49  ;;  %1749 = vmatpush1.bf16.msra.mxu1 %v7102_v50 }
 0x2fe   :  { %1709 = vmatprep.subr.bf16.mxu0 %v7103_v51  ;;  %1750 = vmatprep.subr.bf16.mxu1 %v7104_v52 }
 0x301   :  { %1710 = vmatpush1.bf16.msra.mxu0 %v7105_v53  ;;  %1751 = vmatpush1.bf16.msra.mxu1 %v7106_v54 }
 0x302   :  { %1796 = vmatprep.subr.bf16.mxu0 %v7107_v55  ;;  %1837 = vmatprep.subr.bf16.mxu1 %v5508_v56 }
 0x377   :  { %v1416_v57 = vpop.f32.mrb[12].mxu0  ;;  %v1457_v58 = vpop.f32.mrb[20].mxu1 }
 0x378   :  { %v1417_v59 = vadd.f32 %v1416_v57, %v5275_v25  ;;  %v1418_v60 = vpop.f32.mrb[13].mxu0  ;;  %v1459_v61 = vpop.f32.mrb[21].mxu1  ;;  %v1458_v18 = vadd.f32 %v1457_v58, %v7110_v0 }
 0x379   :  { %v1419_v63 = vadd.f32 %v1418_v60, %v7109_v62  ;;  %v1420_v1 = vpop.f32.mrb[14].mxu0  ;;  %v1461_v3 = vpop.f32.mrb[22].mxu1  ;;  %v1460_v44 = vadd.f32 %v1459_v61, %v7111_v32 }
 0x37a   :  { %v3714_v5 = vmul.f32 -1.442695, %v1417_v59  ;;  %v1421_v7 = vpop.f32.mrb[15].mxu0  ;;  %v1462_v2 = vpop.f32.mrb[23].mxu1  ;;  %v3716_v11 = vmul.f32 -1.442695, %v1458_v18 }
 0x37b   :  { %v3715_v43 = vmul.f32 -1.442695, %v1419_v63  ;;  %v7112_v7 = vld [vmem:[#allocation79_spill] sm:$0xff] }
 0x37c   :  { %4074 = vpow2.f32 %v3714_v5 }
 0x37d   :  { %4076 = vpow2.f32 %v3715_v43 }
 0x37e   :  { %4078 = vtanh.f32 %v1460_v44 }
 0x37f   :  { %4080 = vpow2.f32 %v3716_v11  ;;  %v7113_v11 = vld [vmem:[#allocation80_spill] sm:$0xff] }
 0x386   :  { %v4075_v27 = vpop.eup %4074 }
 0x387   :  { %v1473_v29 = vadd.f32 1.0, %v4075_v27  ;;  %v4077_v33 = vpop.eup %4076 }
 0x388   :  { %v1474_v37 = vadd.f32 1.0, %v4077_v33  ;;  %v4079_v42 = vpop.eup %4078 }
 0x389   :  { %4082 = vrcp.f32 %v1473_v29  ;;  %v4081_v46 = vpop.eup %4080 }
 0x38a   :  { %4084 = vrcp.f32 %v1474_v37  ;;  %v1475_v50 = vadd.f32 1.0, %v4081_v46 }
 0x38c   :  { %4086 = vrcp.f32 %v1475_v50 }
 0x393   :  { %v4083_v47 = vpop.eup %4082 }
 0x394   :  { %v1484_v48 = vmul.f32 %v4083_v47, %v4079_v42  ;;  %v4085_v49 = vpop.eup %4084 }
 0x395   :  { %v1483_v51 = vmul.f32 %v4085_v49, %v5295_v10 }
 0x397   :  { %v1532_v52 = vpop.f32.mrb[16].mxu0  ;;  %v1573_v53 = vpop.f32.mrb[24].mxu1  ;;  %v5516_v54 = vadd.f32 %v1484_v48, %v1483_v51 }
 0x398   :  { %v1584_v57 = vrot.slane %v1532_v52, 6  ;;  %v1588_v58 = vrot.slane %v1532_v52, 7  ;;  %v1534_v59 = vpop.f32.mrb[17].mxu0  ;;  %v1575_v60 = vpop.f32.mrb[25].mxu1  ;;  %v1586_v18 = vrot.slane %v1573_v53, 6  ;;  %v1590_v37 = vrot.slane %v1573_v53, 7 }
 0x399   :  { %v1585_v61 = vrot.slane %v1534_v59, 6  ;;  %v1589_v63 = vrot.slane %v1534_v59, 7  ;;  %v1536_v1 = vpop.f32.mrb[18].mxu0  ;;  %v1577_v3 = vpop.f32.mrb[26].mxu1  ;;  %4088 = vtanh.f32 %v5516_v54  ;;  %v1587_v49 = vrot.slane %v1575_v60, 6 }
 0x39a   :  { %v1600_v5 = vadd.f32 %v1584_v57, %v5124_v22  ;;  %v1604_v2 = vadd.f32 %v1588_v58, %v7112_v7  ;;  %v1537_v10 = vpop.f32.mrb[19].mxu0  ;;  %v1578_v43 = vpop.f32.mrb[27].mxu1  ;;  %v1602_v46 = vadd.f32 %v1586_v18, %v5142_v41  ;;  %v1606_v48 = vadd.f32 %v1590_v37, %v5146_v34 }
 0x39b   :  { %v1601_v44 = vadd.f32 %v1585_v61, %v7057_v40  ;;  %v1605_v27 = vadd.f32 %v1589_v63, %v7113_v11  ;;  %v1591_v50 = vrot.slane %v1575_v60, 7  ;;  %v4087_v51 = vpop.eup %4086  ;;  %v1603_v59 = vadd.f32 %v1587_v49, %v7059_v39 }
 0x39c   :  { %v3717_v29 = vmul.f32 -1.442695, %v1600_v5  ;;  %v3720_v33 = vmul.f32 -1.442695, %v1604_v2  ;;  %v3719_v52 = vmul.f32 -1.442695, %v1602_v46 }
 0x39d   :  { %v3718_v42 = vmul.f32 -1.442695, %v1601_v44  ;;  %v3721_v47 = vmul.f32 -1.442695, %v1605_v27  ;;  %v3722_v58 = vmul.f32 -1.442695, %v1606_v48  ;;  %v1607_v53 = vadd.f32 %v1591_v50, %v7058_v23 }
 0x39e   :  { %4090 = vpow2.f32 %v3717_v29  ;;  %v1648_v50 = vrot.slane %v5308_v36, 7 }
 0x39f   :  { %4092 = vpow2.f32 %v3720_v33 }
 0x3a0   :  { %4094 = vpow2.f32 %v3718_v42 }
 0x3a1   :  { %4096 = vpow2.f32 %v3721_v47 }
 0x3a2   :  { %4098 = vpow2.f32 %v3719_v52 }
 0x3a3   :  { %v4089_v57 = vpop.eup %4088  ;;  %4100 = vpow2.f32 %v3722_v58 }
 0x3a4   :  { %v1487_v61 = vmul.f32 %v4089_v57, %v4087_v51  ;;  %4102 = vtanh.f32 %v1603_v59  ;;  %v1649_v57 = vrot.slane %v5310_v4, 7 }
 0x3a5   :  { %4104 = vtanh.f32 %v1607_v53 }
 0x3a6   :  { %v1669_v63 = vrot.slane %v1487_v61, 6 }
 0x3a8   :  { %v4091_v1 = vpop.eup %4090  ;;  %v1672_v2 = vpack.c.bf16 %v1669_v63, %v1669_v63 }
 0x3a9   :  { %v4093_v3 = vpop.eup %4092  ;;  %v1626_v5 = vadd.f32 1.0, %v4091_v1 }
 0x3aa   :  { %v1629_v10 = vadd.f32 1.0, %v4093_v3  ;;  %v1676_v60 = vrot.slane %v1672_v2, 1  ;;  %v4095_v43 = vpop.eup %4094 }
 0x3ab   :  { %4106 = vrcp.f32 %v1626_v5  ;;  %v4097_v18 = vpop.eup %4096  ;;  %v1627_v44 = vadd.f32 1.0, %v4095_v43 }
 0x3ac   :  { %4108 = vrcp.f32 %v1629_v10  ;;  %1711 = vmatprep.mubr.bf16.mxu0 %v1676_v60  ;;  %1752 = vmatprep.mubr.bf16.mxu1 %v1676_v60  ;;  %v1630_v27 = vadd.f32 1.0, %v4097_v18  ;;  %v4099_v29 = vpop.eup %4098 }
 0x3ad   :  { %4110 = vrcp.f32 %v1627_v44  ;;  %v4101_v33 = vpop.eup %4100  ;;  %v1628_v51 = vadd.f32 1.0, %v4099_v29 }
 0x3ae   :  { %4112 = vrcp.f32 %v1630_v27  ;;  %v4103_v37 = vpop.eup %4102  ;;  %v1631_v58 = vadd.f32 1.0, %v4101_v33 }
 0x3af   :  { %v4105_v42 = vpop.eup %4104  ;;  %4114 = vrcp.f32 %v1628_v51  ;;  %v7117_v51 = vld [vmem:[#allocation25_spill] sm:$0xff] }
 0x3b0   :  { %4116 = vrcp.f32 %v1631_v58  ;;  %v7120_v58 = vld [vmem:[#allocation28_spill] sm:$0xff] }
 0x3b5   :  { %v4107_v46 = vpop.eup %4106 }
 0x3b6   :  { %v4109_v47 = vpop.eup %4108  ;;  %v1654_v48 = vmul.f32 %v4107_v46, %v4103_v37 }
 0x3b7   :  { %v1655_v49 = vmul.f32 %v4109_v47, %v4105_v42  ;;  %v4111_v52 = vpop.eup %4110 }
 0x3b8   :  { %v4113_v59 = vpop.eup %4112  ;;  %v1652_v61 = vmul.f32 %v4111_v52, %v1648_v50  ;;  %v7116_v50 = vld [vmem:[#allocation24_spill] sm:$0xff]  ;;  %v7118_v52 = vld [vmem:[#allocation26_spill] sm:$0xff] }
 0x3b9   :  { %v1653_v53 = vmul.f32 %v4113_v59, %v1649_v57  ;;  %v4115_v3 = vpop.eup %4114  ;;  %v7119_v57 = vld [vmem:[#allocation27_spill] sm:$0xff]  ;;  %v7121_v59 = vld [vmem:[#allocation29_spill] sm:$0xff] }
 0x3ba   :  { %v5529_v63 = vadd.f32 %v1654_v48, %v1652_v61  ;;  %v4117_v36 = vpop.eup %4116  ;;  %v7114_v48 = vld [vmem:[#allocation22_spill] sm:$0xff] }
 0x3bb   :  { %v5531_v1 = vadd.f32 %v1655_v49, %v1653_v53  ;;  %v7115_v49 = vld [vmem:[#allocation23_spill] sm:$0xff]  ;;  %v7122_v61 = vld [vmem:[#allocation30_spill] sm:$0xff] }
 0x3bc   :  { %4118 = vtanh.f32 %v5529_v63  ;;  %v7123_v53 = vld [vmem:[#allocation31_spill] sm:$0xff] }
 0x3bd   :  { %4120 = vtanh.f32 %v5531_v1 }
 0x3c6   :  { %v4119_v5 = vpop.eup %4118 }
 0x3c7   :  { %v4121_v2 = vpop.eup %4120  ;;  %v1660_v10 = vmul.f32 %v4119_v5, %v4115_v3  ;;  %v7124_v3 = vld [vmem:[#allocation32_spill] sm:$0xff]  ;;  %v7126_v5 = vld [vmem:[#allocation34_spill] sm:$0xff] }
 0x3c8   :  { %v1661_v4 = vmul.f32 %v4121_v2, %v4117_v36  ;;  %v7125_v36 = vld [vmem:[#allocation33_spill] sm:$0xff]  ;;  %v7127_v2 = vld [vmem:[#allocation35_spill] sm:$0xff] }
 0x3c9   :  { %v1785_v60 = vpack.c.bf16 %v1660_v10, %v1660_v10 }
 0x3ca   :  { %v1664_v43 = vrot.slane %v1661_v4, 7  ;;  %v1786_v18 = vpack.c.bf16 %v1661_v4, %v1661_v4  ;;  %v7129_v4 = vld [vmem:[#allocation37_spill] sm:$0xff] }
 0x3cb   :  { %v1789_v44 = vunpack.c.l.b16 %v1785_v60  ;;  %v7130_v60 = vld [vmem:[#allocation38_spill] sm:$0xff] }
 0x3cc   :  { %v1666_v27 = vsel %vm1665_vm3, %v1664_v43, %v1660_v10  ;;  %v1790_v29 = vunpack.c.l.b16 %v1786_v18  ;;  %v7128_v10 = vld [vmem:[#allocation36_spill] sm:$0xff]  ;;  %v7131_v43 = vld [vmem:[#allocation39_spill] sm:$0xff] }
 0x3cd   :  { %v1671_v33 = vpack.c.bf16 %v1666_v27, %v1666_v27  ;;  %v1791_v37 = vrot.slane %v1789_v44, 2  ;;  %v7132_v44 = vld [vmem:[#allocation40_spill] sm:$0xff]  ;;  %v7133_v27 = vld [vmem:[#allocation41_spill] sm:$0xff] }
 0x3ce   :  { %v1792_v42 = vrot.slane %v1790_v29, 1  ;;  %v7134_v29 = vld [vmem:[#allocation42_spill] sm:$0xff] }
 0x3cf   :  { %v1675_v46 = vrot.slane %v1671_v33, 1  ;;  %v7135_v33 = vld [vmem:[#allocation43_spill] sm:$0xff] }
 0x3d0   :  { %v1793_v47 = vsel %vm424_vm1, %v1792_v42, %v1791_v37  ;;  %v7136_v37 = vld [vmem:[#allocation44_spill] sm:$0xff]  ;;  %v7137_v42 = vld [vmem:[#allocation45_spill] sm:$0xff] }
 0x3d1   :  { %1712 = vmatmul.mubr.bf16.vlgmr.msra.gmra.mrb[20].mxu0 %v1675_v46  ;;  %1753 = vmatmul.mubr.bf16.vlgmr.msra.gmra.mrb[28].mxu1 %v1675_v46  ;;  %v1794_v18 = vpack.c.b16 %v1793_v47, %v1793_v47  ;;  %v7138_v46 = vld [vmem:[#allocation46_spill] sm:$0xff]  ;;  %v7140_v47 = vld [vmem:[#allocation48_spill] sm:$0xff] }
 0x3d2   :  { %1797 = vmatpush1.bf16.msra.mxu0 %v5317_v26  ;;  %1838 = vmatpush1.bf16.msra.mxu1 %v5320_v21 }
 0x3d3   :  { %1798 = vmatprep.subr.bf16.mxu0 %v5323_v24  ;;  %1839 = vmatprep.subr.bf16.mxu1 %v5326_v13 }
 0x3d4   :  { %1828 = vmatprep.mubr.bf16.mxu0 %v6989_v31  ;;  %1869 = vmatprep.mubr.bf16.mxu1 %v6989_v31 }
 0x3d6   :  { %1799 = vmatpush1.bf16.msra.mxu0 %v5331_v8  ;;  %1840 = vmatpush1.bf16.msra.mxu1 %v5334_v17 }
 0x3d7   :  { %1800 = vmatprep.subr.bf16.mxu0 %v5337_v28  ;;  %1841 = vmatprep.subr.bf16.mxu1 %v5340_v19 }
 0x3da   :  { %1801 = vmatpush1.bf16.msra.mxu0 %v5343_v30  ;;  %1842 = vmatpush1.bf16.msra.mxu1 %v5346_v14 }
 0x3db   :  { %1802 = vmatprep.subr.bf16.mxu0 %v5349_v38  ;;  %1843 = vmatprep.subr.bf16.mxu1 %v5352_v16 }
 0x3de   :  { %1803 = vmatpush1.bf16.msra.mxu0 %v7114_v48  ;;  %1844 = vmatpush1.bf16.msra.mxu1 %v7115_v49 }
 0x3df   :  { %1804 = vmatprep.subr.bf16.mxu0 %v7116_v50  ;;  %1845 = vmatprep.subr.bf16.mxu1 %v7117_v51 }
 0x3e2   :  { %1805 = vmatpush1.bf16.msra.mxu0 %v7118_v52  ;;  %1846 = vmatpush1.bf16.msra.mxu1 %v7119_v57 }
 0x3e3   :  { %1806 = vmatprep.subr.bf16.mxu0 %v7120_v58  ;;  %1847 = vmatprep.subr.bf16.mxu1 %v7121_v59 }
 0x3e6   :  { %1807 = vmatpush1.bf16.msra.mxu0 %v7122_v61  ;;  %1848 = vmatpush1.bf16.msra.mxu1 %v7123_v53 }
 0x3e7   :  { %1808 = vmatprep.subr.bf16.mxu0 %v7124_v3  ;;  %1849 = vmatprep.subr.bf16.mxu1 %v7125_v36 }
 0x3ea   :  { %1809 = vmatpush1.bf16.msra.mxu0 %v7126_v5  ;;  %1850 = vmatpush1.bf16.msra.mxu1 %v7127_v2 }
 0x3eb   :  { %1810 = vmatprep.subr.bf16.mxu0 %v7128_v10  ;;  %1851 = vmatprep.subr.bf16.mxu1 %v7129_v4 }
 0x3ee   :  { %1811 = vmatpush1.bf16.msra.mxu0 %v7130_v60  ;;  %1852 = vmatpush1.bf16.msra.mxu1 %v7131_v43  ;;  %v7139_v43 = vld [vmem:[#allocation47_spill] sm:$0xff] }
 0x3ef   :  { %1989 = vmatprep.subr.bf16.mxu0 %v7132_v44  ;;  %2030 = vmatprep.subr.bf16.mxu1 %v5414_v6 }
 0x3f1   :  { %1829 = vmatmul.mubr.bf16.vlgmr.msra.gmra.mrb[24].mxu0 %v1794_v18  ;;  %1870 = vmatmul.mubr.bf16.vlgmr.msra.gmra.mrb[32].mxu1 %v1794_v18  ;;  %v5584_v18 = vld [vmem:[#allocation5 + $0x204] ss:$16 sps:$4 sm:$0xff]  }
 0x3f2   :  { %1990 = vmatpush1.bf16.msra.mxu0 %v7133_v27  ;;  %2031 = vmatpush1.bf16.msra.mxu1 %v7134_v29  ;;  %7141 = vst [vmem:[#allocation56_spill] sm:$0xff] %v5584_v18 }
 0x3f3   :  { %1991 = vmatprep.subr.bf16.mxu0 %v7135_v33  ;;  %2032 = vmatprep.subr.bf16.mxu1 %v7136_v37 }
 0x3f6   :  { %1992 = vmatpush1.bf16.msra.mxu0 %v7137_v42  ;;  %2033 = vmatpush1.bf16.msra.mxu1 %v7138_v46  ;;  %v5587_v46 = vld [vmem:[#allocation5 + $0x20c] ss:$16 sps:$4 sm:$0xff]  }
 0x3f7   :  { %1993 = vmatprep.subr.bf16.mxu0 %v7139_v43  ;;  %2034 = vmatprep.subr.bf16.mxu1 %v7140_v47  ;;  %7142 = vst [vmem:[#allocation57_spill] sm:$0xff] %v5587_v46  ;;  %v5590_v47 = vld [vmem:[#allocation5 + $0x200] ss:$16 sps:$4 sm:$0xff]  }
 0x3f8   :  { %7143 = vst [vmem:[#allocation58_spill] sm:$0xff] %v5590_v47 }
 0x3fa   :  { %1994 = vmatpush1.bf16.msra.mxu0 %v5441_v12  ;;  %2035 = vmatpush1.bf16.msra.mxu1 %v5444_v20  ;;  %v5593_v20 = vld [vmem:[#allocation5 + $0x208] ss:$16 sps:$4 sm:$0xff]  }
 0x3fb   :  { %1995 = vmatprep.subr.bf16.mxu0 %v5447_v9  ;;  %2036 = vmatprep.subr.bf16.mxu1 %v5450_v35  ;;  %7144 = vst [vmem:[#allocation59_spill] sm:$0xff] %v5593_v20  ;;  %v5596_v35 = vld [vmem:[#allocation5 + $0x224] ss:$16 sps:$4 sm:$0xff]  }
 0x3fc   :  { %7145 = vst [vmem:[#allocation16_spill] sm:$0xff] %v5596_v35 }
 0x3fe   :  { %1996 = vmatpush1.bf16.msra.mxu0 %v5453_v45  ;;  %2037 = vmatpush1.bf16.msra.mxu1 %v5456_v15  ;;  %v5599_v15 = vld [vmem:[#allocation5 + $0x22c] ss:$16 sps:$4 sm:$0xff]  }
 0x3ff   :  { %1997 = vmatprep.subr.bf16.mxu0 %v5584_v18  ;;  %2038 = vmatprep.subr.bf16.mxu1 %v5587_v46  ;;  %7146 = vst [vmem:[#allocation82_spill] sm:$0xff] %v5599_v15  ;;  %v5602_v18 = vld [vmem:[#allocation5 + $0x220] ss:$16 sps:$4 sm:$0xff]   ;;  %v5605_v46 = vld [vmem:[#allocation5 + $0x228] ss:$16 sps:$4 sm:$0xff]  }
 0x400   :  { %7147 = vst [vmem:[#allocation81_spill] sm:$0xff] %v5602_v18  ;;  %7148 = vst [vmem:[#allocation60_spill] sm:$0xff] %v5605_v46 }
 0x402   :  { %1998 = vmatpush1.bf16.msra.mxu0 %v5590_v47  ;;  %2039 = vmatpush1.bf16.msra.mxu1 %v5593_v20  ;;  %v5608_v47 = vld [vmem:[#allocation5 + $0x244] ss:$16 sps:$4 sm:$0xff]   ;;  %v5611_v20 = vld [vmem:[#allocation5 + $0x24c] ss:$16 sps:$4 sm:$0xff]  }
 0x403   :  { %1999 = vmatprep.subr.bf16.mxu0 %v5596_v35  ;;  %2040 = vmatprep.subr.bf16.mxu1 %v5599_v15  ;;  %7149 = vst [vmem:[#allocation61_spill] sm:$0xff] %v5608_v47  ;;  %7150 = vst [vmem:[#allocation62_spill] sm:$0xff] %v5611_v20  ;;  %v5614_v35 = vld [vmem:[#allocation5 + $0x240] ss:$16 sps:$4 sm:$0xff]   ;;  %v5617_v15 = vld [vmem:[#allocation5 + $0x248] ss:$16 sps:$4 sm:$0xff]  }
 0x404   :  { %7151 = vst [vmem:[#allocation63_spill] sm:$0xff] %v5614_v35  ;;  %7152 = vst [vmem:[#allocation64_spill] sm:$0xff] %v5617_v15 }
 0x406   :  { %2000 = vmatpush1.bf16.msra.mxu0 %v5602_v18  ;;  %2041 = vmatpush1.bf16.msra.mxu1 %v5605_v46  ;;  %v5620_v18 = vld [vmem:[#allocation5 + $0x264] ss:$16 sps:$4 sm:$0xff]   ;;  %v5623_v46 = vld [vmem:[#allocation5 + $0x26c] ss:$16 sps:$4 sm:$0xff]  }
 0x407   :  { %2001 = vmatprep.subr.bf16.mxu0 %v5608_v47  ;;  %2042 = vmatprep.subr.bf16.mxu1 %v5611_v20  ;;  %7153 = vst [vmem:[#allocation65_spill] sm:$0xff] %v5620_v18  ;;  %7154 = vst [vmem:[#allocation66_spill] sm:$0xff] %v5623_v46  ;;  %v5626_v47 = vld [vmem:[#allocation5 + $0x260] ss:$16 sps:$4 sm:$0xff]   ;;  %v5629_v20 = vld [vmem:[#allocation5 + $0x268] ss:$16 sps:$4 sm:$0xff]  }
 0x408   :  { %7155 = vst [vmem:[#allocation67_spill] sm:$0xff] %v5626_v47  ;;  %7156 = vst [vmem:[#allocation68_spill] sm:$0xff] %v5629_v20 }
 0x40a   :  { %2002 = vmatpush1.bf16.msra.mxu0 %v5614_v35  ;;  %2043 = vmatpush1.bf16.msra.mxu1 %v5617_v15  ;;  %v5632_v35 = vld [vmem:[#allocation5 + $0x284] ss:$16 sps:$4 sm:$0xff]   ;;  %v5635_v15 = vld [vmem:[#allocation5 + $0x28c] ss:$16 sps:$4 sm:$0xff]  }
 0x40b   :  { %2003 = vmatprep.subr.bf16.mxu0 %v5620_v18  ;;  %2044 = vmatprep.subr.bf16.mxu1 %v5623_v46  ;;  %7157 = vst [vmem:[#allocation69_spill] sm:$0xff] %v5632_v35  ;;  %7158 = vst [vmem:[#allocation70_spill] sm:$0xff] %v5635_v15  ;;  %v5638_v18 = vld [vmem:[#allocation5 + $0x280] ss:$16 sps:$4 sm:$0xff]   ;;  %v5641_v46 = vld [vmem:[#allocation5 + $0x288] ss:$16 sps:$4 sm:$0xff]  }
 0x40c   :  { %7159 = vst [vmem:[#allocation71_spill] sm:$0xff] %v5638_v18  ;;  %7160 = vst [vmem:[#allocation72_spill] sm:$0xff] %v5641_v46 }
 0x40e   :  { %2004 = vmatpush1.bf16.msra.mxu0 %v5626_v47  ;;  %2045 = vmatpush1.bf16.msra.mxu1 %v5629_v20  ;;  %v5644_v47 = vld [vmem:[#allocation5 + $0x2a4] ss:$16 sps:$4 sm:$0xff]   ;;  %v5647_v20 = vld [vmem:[#allocation5 + $0x2ac] ss:$16 sps:$4 sm:$0xff]  }
 0x40f   :  { %2005 = vmatprep.subr.bf16.mxu0 %v5632_v35  ;;  %2046 = vmatprep.subr.bf16.mxu1 %v5635_v15  ;;  %7161 = vst [vmem:[#allocation73_spill] sm:$0xff] %v5644_v47  ;;  %7162 = vst [vmem:[#allocation17_spill] sm:$0xff] %v5647_v20  ;;  %v5650_v35 = vld [vmem:[#allocation5 + $0x2a0] ss:$16 sps:$4 sm:$0xff]   ;;  %v5653_v15 = vld [vmem:[#allocation5 + $0x2a8] ss:$16 sps:$4 sm:$0xff]  }
 0x410   :  { %7163 = vst [vmem:[#allocation79_spill] sm:$0xff] %v5650_v35  ;;  %7164 = vst [vmem:[#allocation80_spill] sm:$0xff] %v5653_v15 }
 0x412   :  { %2006 = vmatpush1.bf16.msra.mxu0 %v5638_v18  ;;  %2047 = vmatpush1.bf16.msra.mxu1 %v5641_v46  ;;  %v5656_v18 = vld [vmem:[#allocation5 + $0x2c4] ss:$16 sps:$4 sm:$0xff]   ;;  %v5659_v46 = vld [vmem:[#allocation5 + $0x2cc] ss:$16 sps:$4 sm:$0xff]  }
 0x413   :  { %2007 = vmatprep.subr.bf16.mxu0 %v5644_v47  ;;  %2048 = vmatprep.subr.bf16.mxu1 %v5647_v20  ;;  %7165 = vst [vmem:[#allocation22_spill] sm:$0xff] %v5656_v18  ;;  %7166 = vst [vmem:[#allocation23_spill] sm:$0xff] %v5659_v46  ;;  %v5662_v47 = vld [vmem:[#allocation5 + $0x2c0] ss:$16 sps:$4 sm:$0xff]   ;;  %v5665_v20 = vld [vmem:[#allocation5 + $0x2c8] ss:$16 sps:$4 sm:$0xff]  }
 0x414   :  { %7167 = vst [vmem:[#allocation24_spill] sm:$0xff] %v5662_v47  ;;  %7168 = vst [vmem:[#allocation25_spill] sm:$0xff] %v5665_v20 }
 0x416   :  { %2008 = vmatpush1.bf16.msra.mxu0 %v5650_v35  ;;  %2049 = vmatpush1.bf16.msra.mxu1 %v5653_v15  ;;  %v5668_v35 = vld [vmem:[#allocation5 + $0x2e4] ss:$16 sps:$4 sm:$0xff]   ;;  %v5671_v15 = vld [vmem:[#allocation5 + $0x2ec] ss:$16 sps:$4 sm:$0xff]  }
 0x417   :  { %2009 = vmatprep.subr.bf16.mxu0 %v5656_v18  ;;  %2050 = vmatprep.subr.bf16.mxu1 %v5659_v46  ;;  %7169 = vst [vmem:[#allocation26_spill] sm:$0xff] %v5668_v35  ;;  %7170 = vst [vmem:[#allocation27_spill] sm:$0xff] %v5671_v15  ;;  %v5674_v18 = vld [vmem:[#allocation5 + $0x2e0] ss:$16 sps:$4 sm:$0xff]   ;;  %v5677_v46 = vld [vmem:[#allocation5 + $0x2e8] ss:$16 sps:$4 sm:$0xff]  }
 0x418   :  { %7171 = vst [vmem:[#allocation28_spill] sm:$0xff] %v5674_v18  ;;  %7172 = vst [vmem:[#allocation29_spill] sm:$0xff] %v5677_v46 }
 0x41a   :  { %2010 = vmatpush1.bf16.msra.mxu0 %v5662_v47  ;;  %2051 = vmatpush1.bf16.msra.mxu1 %v5665_v20  ;;  %v5680_v47 = vld [vmem:[#allocation5 + $0x304] ss:$16 sps:$4 sm:$0xff]   ;;  %v5683_v20 = vld [vmem:[#allocation5 + $0x30c] ss:$16 sps:$4 sm:$0xff]  }
 0x41b   :  { %2011 = vmatprep.subr.bf16.mxu0 %v5668_v35  ;;  %2052 = vmatprep.subr.bf16.mxu1 %v5671_v15  ;;  %7173 = vst [vmem:[#allocation30_spill] sm:$0xff] %v5680_v47  ;;  %7174 = vst [vmem:[#allocation31_spill] sm:$0xff] %v5683_v20  ;;  %v5686_v35 = vld [vmem:[#allocation5 + $0x300] ss:$16 sps:$4 sm:$0xff]   ;;  %v5689_v15 = vld [vmem:[#allocation5 + $0x308] ss:$16 sps:$4 sm:$0xff]  }
 0x41c   :  { %7175 = vst [vmem:[#allocation32_spill] sm:$0xff] %v5686_v35  ;;  %7176 = vst [vmem:[#allocation33_spill] sm:$0xff] %v5689_v15 }
 0x41e   :  { %2012 = vmatpush1.bf16.msra.mxu0 %v5674_v18  ;;  %2053 = vmatpush1.bf16.msra.mxu1 %v5677_v46  ;;  %v5692_v18 = vld [vmem:[#allocation5 + $0x324] ss:$16 sps:$4 sm:$0xff]   ;;  %v5695_v46 = vld [vmem:[#allocation5 + $0x32c] ss:$16 sps:$4 sm:$0xff]  }
 0x41f   :  { %2013 = vmatprep.subr.bf16.mxu0 %v5680_v47  ;;  %2054 = vmatprep.subr.bf16.mxu1 %v5683_v20  ;;  %7177 = vst [vmem:[#allocation34_spill] sm:$0xff] %v5692_v18  ;;  %7178 = vst [vmem:[#allocation35_spill] sm:$0xff] %v5695_v46  ;;  %v5698_v47 = vld [vmem:[#allocation5 + $0x320] ss:$16 sps:$4 sm:$0xff]   ;;  %v5701_v20 = vld [vmem:[#allocation5 + $0x328] ss:$16 sps:$4 sm:$0xff]  }
 0x420   :  { %7179 = vst [vmem:[#allocation36_spill] sm:$0xff] %v5698_v47  ;;  %7180 = vst [vmem:[#allocation37_spill] sm:$0xff] %v5701_v20 }
 0x422   :  { %2014 = vmatpush1.bf16.msra.mxu0 %v5686_v35  ;;  %2055 = vmatpush1.bf16.msra.mxu1 %v5689_v15  ;;  %v5704_v35 = vld [vmem:[#allocation5 + $0x344] ss:$16 sps:$4 sm:$0xff]   ;;  %v5707_v15 = vld [vmem:[#allocation5 + $0x34c] ss:$16 sps:$4 sm:$0xff]  }
 0x423   :  { %2015 = vmatprep.subr.bf16.mxu0 %v5692_v18  ;;  %2056 = vmatprep.subr.bf16.mxu1 %v5695_v46  ;;  %7181 = vst [vmem:[#allocation38_spill] sm:$0xff] %v5704_v35  ;;  %7182 = vst [vmem:[#allocation40_spill] sm:$0xff] %v5707_v15  ;;  %v5710_v18 = vld [vmem:[#allocation5 + $0x340] ss:$16 sps:$4 sm:$0xff]   ;;  %v5713_v46 = vld [vmem:[#allocation5 + $0x348] ss:$16 sps:$4 sm:$0xff]  }
 0x424   :  { %7183 = vst [vmem:[#allocation83_spill] sm:$0xff] %v5710_v18  ;;  %7184 = vst [vmem:[#allocation84_spill] sm:$0xff] %v5713_v46 }
 0x426   :  { %2016 = vmatpush1.bf16.msra.mxu0 %v5698_v47  ;;  %2057 = vmatpush1.bf16.msra.mxu1 %v5701_v20  ;;  %v5716_v47 = vld [vmem:[#allocation5 + $0x364] ss:$16 sps:$4 sm:$0xff]   ;;  %v5719_v20 = vld [vmem:[#allocation5 + $0x36c] ss:$16 sps:$4 sm:$0xff]  }
 0x427   :  { %2017 = vmatprep.subr.bf16.mxu0 %v5704_v35  ;;  %2058 = vmatprep.subr.bf16.mxu1 %v5707_v15  ;;  %7185 = vst [vmem:[#allocation85_spill] sm:$0xff] %v5716_v47  ;;  %7186 = vst [vmem:[#allocation86_spill] sm:$0xff] %v5719_v20  ;;  %v5722_v35 = vld [vmem:[#allocation5 + $0x360] ss:$16 sps:$4 sm:$0xff]   ;;  %v5725_v15 = vld [vmem:[#allocation5 + $0x368] ss:$16 sps:$4 sm:$0xff]  }
 0x428   :  { %7187 = vst [vmem:[#allocation87_spill] sm:$0xff] %v5722_v35  ;;  %7188 = vst [vmem:[#allocation88_spill] sm:$0xff] %v5725_v15 }
 0x42a   :  { %2018 = vmatpush1.bf16.msra.mxu0 %v5710_v18  ;;  %2059 = vmatpush1.bf16.msra.mxu1 %v5713_v46 }
 0x42b   :  { %2019 = vmatprep.subr.bf16.mxu0 %v5716_v47  ;;  %2060 = vmatprep.subr.bf16.mxu1 %v5719_v20 }
 0x42e   :  { %2020 = vmatpush1.bf16.msra.mxu0 %v5722_v35  ;;  %2061 = vmatpush1.bf16.msra.mxu1 %v5725_v15 }
 0x42f   :  { %2106 = vmatprep.subr.bf16.mxu0 %v7107_v55  ;;  %2147 = vmatprep.subr.bf16.mxu1 %v5508_v56 }
 0x4a4   :  { %v1713_v46 = vpop.f32.mrb[20].mxu0  ;;  %v1754_v18 = vpop.f32.mrb[28].mxu1 }
 0x4a5   :  { %v1714_v47 = vadd.f32 %v1713_v46, %v5275_v25  ;;  %v1715_v45 = vpop.f32.mrb[21].mxu0  ;;  %v1756_v9 = vpop.f32.mrb[29].mxu1  ;;  %v1755_v55 = vadd.f32 %v1754_v18, %v7110_v0 }
 0x4a6   :  { %v1716_v20 = vadd.f32 %v1715_v45, %v7109_v62  ;;  %v1717_v12 = vpop.f32.mrb[22].mxu0  ;;  %v1758_v43 = vpop.f32.mrb[30].mxu1  ;;  %v1757_v56 = vadd.f32 %v1756_v9, %v7111_v32 }
 0x4a7   :  { %v3723_v42 = vmul.f32 -1.442695, %v1714_v47  ;;  %v1718_v35 = vpop.f32.mrb[23].mxu0  ;;  %v1759_v37 = vpop.f32.mrb[31].mxu1  ;;  %v3725_v15 = vmul.f32 -1.442695, %v1755_v55 }
 0x4a8   :  { %v3724_v33 = vmul.f32 -1.442695, %v1716_v20 }
 0x4a9   :  { %4122 = vpow2.f32 %v3723_v42 }
 0x4aa   :  { %4124 = vpow2.f32 %v3724_v33 }
 0x4ab   :  { %4126 = vtanh.f32 %v1757_v56 }
 0x4ac   :  { %4128 = vpow2.f32 %v3725_v15 }
 0x4b3   :  { %v4123_v29 = vpop.eup %4122 }
 0x4b4   :  { %v1770_v27 = vadd.f32 1.0, %v4123_v29  ;;  %v4125_v46 = vpop.eup %4124 }
 0x4b5   :  { %v1771_v45 = vadd.f32 1.0, %v4125_v46  ;;  %v4127_v12 = vpop.eup %4126 }
 0x4b6   :  { %4130 = vrcp.f32 %v1770_v27  ;;  %v4129_v43 = vpop.eup %4128 }
 0x4b7   :  { %4132 = vrcp.f32 %v1771_v45  ;;  %v1772_v42 = vadd.f32 1.0, %v4129_v43 }
 0x4b9   :  { %4134 = vrcp.f32 %v1772_v42 }
 0x4c0   :  { %v4131_v35 = vpop.eup %4130 }
 0x4c1   :  { %v1781_v37 = vmul.f32 %v4131_v35, %v4127_v12  ;;  %v4133_v20 = vpop.eup %4132 }
 0x4c2   :  { %v1780_v33 = vmul.f32 %v4133_v20, %v5516_v54 }
 0x4c4   :  { %v1830_v47 = vpop.f32.mrb[24].mxu0  ;;  %v1871_v18 = vpop.f32.mrb[32].mxu1  ;;  %v5735_v9 = vadd.f32 %v1781_v37, %v1780_v33 }
 0x4c5   :  { %v1882_v55 = vrot.slane %v1830_v47, 5  ;;  %v1886_v29 = vrot.slane %v1830_v47, 6  ;;  %v1832_v56 = vpop.f32.mrb[25].mxu0  ;;  %v1873_v32 = vpop.f32.mrb[33].mxu1  ;;  %v1884_v20 = vrot.slane %v1871_v18, 5  ;;  %v1888_v42 = vrot.slane %v1871_v18, 6 }
 0x4c6   :  { %v1883_v15 = vrot.slane %v1832_v56, 5  ;;  %v1887_v27 = vrot.slane %v1832_v56, 6  ;;  %v1834_v46 = vpop.f32.mrb[26].mxu0  ;;  %v1875_v45 = vpop.f32.mrb[34].mxu1  ;;  %4136 = vtanh.f32 %v5735_v9 }
 0x4c7   :  { %v1898_v12 = vadd.f32 %v1882_v55, %v5124_v22  ;;  %v1902_v43 = vadd.f32 %v1886_v29, %v7112_v7  ;;  %v1835_v54 = vpop.f32.mrb[27].mxu0  ;;  %v1876_v35 = vpop.f32.mrb[35].mxu1  ;;  %v1900_v46 = vadd.f32 %v1884_v20, %v5142_v41  ;;  %v1904_v55 = vadd.f32 %v1888_v42, %v5146_v34 }
 0x4c8   :  { %v1899_v37 = vadd.f32 %v1883_v15, %v7057_v40  ;;  %v1903_v33 = vadd.f32 %v1887_v27, %v7113_v11  ;;  %v1885_v22 = vrot.slane %v1873_v32, 5  ;;  %v1889_v29 = vrot.slane %v1873_v32, 6  ;;  %v4135_v54 = vpop.eup %4134 }
 0x4c9   :  { %v3726_v47 = vmul.f32 -1.442695, %v1898_v12  ;;  %v3729_v0 = vmul.f32 -1.442695, %v1902_v43  ;;  %v3728_v35 = vmul.f32 -1.442695, %v1900_v46 }
 0x4ca   :  { %v3727_v56 = vmul.f32 -1.442695, %v1899_v37  ;;  %v3730_v45 = vmul.f32 -1.442695, %v1903_v33  ;;  %v3731_v40 = vmul.f32 -1.442695, %v1904_v55  ;;  %v1901_v27 = vadd.f32 %v1885_v22, %v7059_v39 }
 0x4cb   :  { %4138 = vpow2.f32 %v3726_v47  ;;  %v1905_v18 = vadd.f32 %v1889_v29, %v7058_v23 }
 0x4cc   :  { %4140 = vpow2.f32 %v3729_v0 }
 0x4cd   :  { %4142 = vpow2.f32 %v3727_v56 }
 0x4ce   :  { %4144 = vpow2.f32 %v3730_v45 }
 0x4cf   :  { %4146 = vpow2.f32 %v3728_v35 }
 0x4d0   :  { %v4137_v15 = vpop.eup %4136  ;;  %4148 = vpow2.f32 %v3731_v40 }
 0x4d1   :  { %v1784_v12 = vmul.f32 %v4137_v15, %v4135_v54  ;;  %4150 = vtanh.f32 %v1901_v27 }
 0x4d2   :  { %4152 = vtanh.f32 %v1905_v18 }
 0x4d3   :  { %v1967_v0 = vrot.slane %v1784_v12, 5 }
 0x4d5   :  { %v4139_v43 = vpop.eup %4138  ;;  %v1970_v33 = vpack.c.bf16 %v1967_v0, %v1967_v0 }
 0x4d6   :  { %v4141_v20 = vpop.eup %4140  ;;  %v1924_v37 = vadd.f32 1.0, %v4139_v43 }
 0x4d7   :  { %v1927_v47 = vadd.f32 1.0, %v4141_v20  ;;  %v1980_v32 = vshrl.u32 %v1970_v33, 16  ;;  %v1983_v42 = vshll.u32 %v1970_v33, 16  ;;  %v4143_v56 = vpop.eup %4142  ;;  %v1946_v20 = vrot.slane %v5529_v63, 7 }
 0x4d8   :  { %4154 = vrcp.f32 %v1924_v37  ;;  %v4145_v46 = vpop.eup %4144  ;;  %v1925_v22 = vadd.f32 1.0, %v4143_v56 }
 0x4d9   :  { %4156 = vrcp.f32 %v1927_v47  ;;  %v1982_v45 = vrot.slane %v1980_v32, 1  ;;  %v1985_v55 = vrot.slane %v1983_v42, 2  ;;  %v1928_v29 = vadd.f32 1.0, %v4145_v46  ;;  %v4147_v40 = vpop.eup %4146 }
 0x4da   :  { %4158 = vrcp.f32 %v1925_v22  ;;  %v4149_v35 = vpop.eup %4148  ;;  %v1926_v37 = vadd.f32 1.0, %v4147_v40  ;;  %v1947_v47 = vrot.slane %v5531_v1, 7 }
 0x4db   :  { %v1986_v54 = vor.u32 %v1985_v55, %v1982_v45  ;;  %4160 = vrcp.f32 %v1928_v29  ;;  %v4151_v15 = vpop.eup %4150  ;;  %v1929_v32 = vadd.f32 1.0, %v4149_v35 }
 0x4dc   :  { %v4153_v27 = vpop.eup %4152  ;;  %4162 = vrcp.f32 %v1926_v37 }
 0x4dd   :  { %2021 = vmatprep.mubr.bf16.mxu0 %v1986_v54  ;;  %2062 = vmatprep.mubr.bf16.mxu1 %v1986_v54  ;;  %4164 = vrcp.f32 %v1929_v32 }
 0x4e2   :  { %v4155_v12 = vpop.eup %4154 }
 0x4e3   :  { %v4157_v18 = vpop.eup %4156  ;;  %v1952_v0 = vmul.f32 %v4155_v12, %v4151_v15 }
 0x4e4   :  { %v1953_v43 = vmul.f32 %v4157_v18, %v4153_v27  ;;  %v4159_v33 = vpop.eup %4158 }
 0x4e5   :  { %v4161_v42 = vpop.eup %4160  ;;  %v1950_v56 = vmul.f32 %v4159_v33, %v1946_v20 }
 0x4e6   :  { %v1951_v46 = vmul.f32 %v4161_v42, %v1947_v47  ;;  %v4163_v55 = vpop.eup %4162 }
 0x4e7   :  { %v5748_v22 = vadd.f32 %v1952_v0, %v1950_v56  ;;  %v4165_v63 = vpop.eup %4164 }
 0x4e8   :  { %v5750_v45 = vadd.f32 %v1953_v43, %v1951_v46 }
 0x4e9   :  { %4166 = vtanh.f32 %v5748_v22 }
 0x4ea   :  { %4168 = vtanh.f32 %v5750_v45 }
 0x4f3   :  { %v4167_v29 = vpop.eup %4166 }
 0x4f4   :  { %v4169_v54 = vpop.eup %4168  ;;  %v1958_v40 = vmul.f32 %v4167_v29, %v4163_v55  ;;  %v7219_v55 = vld [vmem:[#allocation68_spill] sm:$0xff]  ;;  %v7221_v29 = vld [vmem:[#allocation70_spill] sm:$0xff] }
 0x4f5   :  { %v1959_v1 = vmul.f32 %v4169_v54, %v4165_v63  ;;  %v7220_v63 = vld [vmem:[#allocation69_spill] sm:$0xff]  ;;  %v7222_v54 = vld [vmem:[#allocation71_spill] sm:$0xff] }
 0x4f6   :  { %v2095_v35 = vpack.c.bf16 %v1958_v40, %v1958_v40 }
 0x4f7   :  { %v1962_v15 = vrot.slane %v1959_v1, 7  ;;  %v2096_v27 = vpack.c.bf16 %v1959_v1, %v1959_v1  ;;  %v7224_v1 = vld [vmem:[#allocation73_spill] sm:$0xff] }
 0x4f8   :  { %v2099_v12 = vunpack.c.l.b16 %v2095_v35  ;;  %v7225_v35 = vld [vmem:[#allocation17_spill] sm:$0xff] }
 0x4f9   :  { %v1964_v18 = vsel %vm1963_vm4, %v1962_v15, %v1958_v40  ;;  %v2100_v0 = vunpack.c.l.b16 %v2096_v27  ;;  %v7223_v40 = vld [vmem:[#allocation72_spill] sm:$0xff]  ;;  %v7226_v15 = vld [vmem:[#allocation79_spill] sm:$0xff] }
 0x4fa   :  { %v1969_v20 = vpack.c.bf16 %v1964_v18, %v1964_v18  ;;  %v2101_v43 = vrot.slane %v2099_v12, 3  ;;  %v7227_v27 = vld [vmem:[#allocation80_spill] sm:$0xff]  ;;  %v7228_v12 = vld [vmem:[#allocation22_spill] sm:$0xff]  ;;  %v7229_v18 = vld [vmem:[#allocation23_spill] sm:$0xff] }
 0x4fb   :  { %v2102_v37 = vrot.slane %v2100_v0, 2  ;;  %v7230_v0 = vld [vmem:[#allocation24_spill] sm:$0xff] }
 0x4fc   :  { %v1972_v33 = vshrl.u32 %v1969_v20, 16  ;;  %v1975_v47 = vshll.u32 %v1969_v20, 16  ;;  %v7231_v20 = vld [vmem:[#allocation25_spill] sm:$0xff] }
 0x4fd   :  { %v2103_v32 = vsel %vm424_vm1, %v2102_v37, %v2101_v43  ;;  %v7232_v43 = vld [vmem:[#allocation26_spill] sm:$0xff]  ;;  %v7233_v37 = vld [vmem:[#allocation27_spill] sm:$0xff] }
 0x4fe   :  { %v1974_v42 = vrot.slane %v1972_v33, 1  ;;  %v1977_v56 = vrot.slane %v1975_v47, 2  ;;  %v7234_v33 = vld [vmem:[#allocation28_spill] sm:$0xff]  ;;  %v7235_v47 = vld [vmem:[#allocation29_spill] sm:$0xff] }
 0x500   :  { %v1978_v46 = vor.u32 %v1977_v56, %v1974_v42  ;;  %v7237_v42 = vld [vmem:[#allocation31_spill] sm:$0xff]  ;;  %v7238_v56 = vld [vmem:[#allocation32_spill] sm:$0xff] }
 0x502   :  { %2022 = vmatmul.mubr.bf16.vlgmr.msra.gmra.mrb[28].mxu0 %v1978_v46  ;;  %2063 = vmatmul.mubr.bf16.vlgmr.msra.gmra.mrb[36].mxu1 %v1978_v46  ;;  %v7239_v46 = vld [vmem:[#allocation33_spill] sm:$0xff] }
 0x503   :  { %2107 = vmatpush1.bf16.msra.mxu0 %v5317_v26  ;;  %2148 = vmatpush1.bf16.msra.mxu1 %v5320_v21  ;;  %v7189_v26 = vld [vmem:[#allocation39_spill] sm:$0xff]  ;;  %v2104_v21 = vpack.c.b16 %v2103_v32, %v2103_v32  ;;  %v7236_v32 = vld [vmem:[#allocation30_spill] sm:$0xff] }
 0x504   :  { %2108 = vmatprep.subr.bf16.mxu0 %v5323_v24  ;;  %2149 = vmatprep.subr.bf16.mxu1 %v5326_v13  ;;  %v7190_v24 = vld [vmem:[#allocation41_spill] sm:$0xff]  ;;  %v7191_v13 = vld [vmem:[#allocation42_spill] sm:$0xff] }
 0x505   :  { %2138 = vmatprep.mubr.bf16.mxu0 %v6989_v31  ;;  %2179 = vmatprep.mubr.bf16.mxu1 %v6989_v31 }
 0x507   :  { %2109 = vmatpush1.bf16.msra.mxu0 %v5331_v8  ;;  %2150 = vmatpush1.bf16.msra.mxu1 %v5334_v17  ;;  %v7192_v8 = vld [vmem:[#allocation43_spill] sm:$0xff]  ;;  %v7193_v17 = vld [vmem:[#allocation44_spill] sm:$0xff] }
 0x508   :  { %2110 = vmatprep.subr.bf16.mxu0 %v5337_v28  ;;  %2151 = vmatprep.subr.bf16.mxu1 %v5340_v19  ;;  %v7194_v28 = vld [vmem:[#allocation45_spill] sm:$0xff]  ;;  %v7195_v19 = vld [vmem:[#allocation46_spill] sm:$0xff] }
 0x50b   :  { %2111 = vmatpush1.bf16.msra.mxu0 %v5343_v30  ;;  %2152 = vmatpush1.bf16.msra.mxu1 %v5346_v14  ;;  %v7196_v30 = vld [vmem:[#allocation47_spill] sm:$0xff]  ;;  %v7197_v14 = vld [vmem:[#allocation48_spill] sm:$0xff] }
 0x50c   :  { %2112 = vmatprep.subr.bf16.mxu0 %v5349_v38  ;;  %2153 = vmatprep.subr.bf16.mxu1 %v5352_v16  ;;  %v7198_v38 = vld [vmem:[#allocation49_spill] sm:$0xff]  ;;  %v7199_v16 = vld [vmem:[#allocation50_spill] sm:$0xff] }
 0x50f   :  { %2113 = vmatpush1.bf16.msra.mxu0 %v7114_v48  ;;  %2154 = vmatpush1.bf16.msra.mxu1 %v7115_v49  ;;  %v7201_v48 = vld [vmem:[#allocation52_spill] sm:$0xff]  ;;  %v7202_v49 = vld [vmem:[#allocation53_spill] sm:$0xff] }
 0x510   :  { %2114 = vmatprep.subr.bf16.mxu0 %v7116_v50  ;;  %2155 = vmatprep.subr.bf16.mxu1 %v7117_v51  ;;  %v7203_v50 = vld [vmem:[#allocation54_spill] sm:$0xff]  ;;  %v7204_v51 = vld [vmem:[#allocation56_spill] sm:$0xff] }
 0x513   :  { %2115 = vmatpush1.bf16.msra.mxu0 %v7118_v52  ;;  %2156 = vmatpush1.bf16.msra.mxu1 %v7119_v57  ;;  %v7205_v52 = vld [vmem:[#allocation57_spill] sm:$0xff]  ;;  %v7206_v57 = vld [vmem:[#allocation58_spill] sm:$0xff] }
 0x514   :  { %2116 = vmatprep.subr.bf16.mxu0 %v7120_v58  ;;  %2157 = vmatprep.subr.bf16.mxu1 %v7121_v59  ;;  %v7207_v58 = vld [vmem:[#allocation59_spill] sm:$0xff]  ;;  %v7208_v59 = vld [vmem:[#allocation16_spill] sm:$0xff] }
 0x517   :  { %2117 = vmatpush1.bf16.msra.mxu0 %v7122_v61  ;;  %2158 = vmatpush1.bf16.msra.mxu1 %v7123_v53  ;;  %v7209_v61 = vld [vmem:[#allocation82_spill] sm:$0xff]  ;;  %v7210_v53 = vld [vmem:[#allocation81_spill] sm:$0xff] }
 0x518   :  { %2118 = vmatprep.subr.bf16.mxu0 %v7124_v3  ;;  %2159 = vmatprep.subr.bf16.mxu1 %v7125_v36  ;;  %v7211_v3 = vld [vmem:[#allocation60_spill] sm:$0xff]  ;;  %v7212_v36 = vld [vmem:[#allocation61_spill] sm:$0xff] }
 0x51b   :  { %2119 = vmatpush1.bf16.msra.mxu0 %v7126_v5  ;;  %2160 = vmatpush1.bf16.msra.mxu1 %v7127_v2  ;;  %v7213_v5 = vld [vmem:[#allocation62_spill] sm:$0xff]  ;;  %v7214_v2 = vld [vmem:[#allocation63_spill] sm:$0xff] }
 0x51c   :  { %2120 = vmatprep.subr.bf16.mxu0 %v7128_v10  ;;  %2161 = vmatprep.subr.bf16.mxu1 %v7129_v4  ;;  %v7215_v10 = vld [vmem:[#allocation64_spill] sm:$0xff]  ;;  %v7216_v4 = vld [vmem:[#allocation65_spill] sm:$0xff] }
 0x51f   :  { %2121 = vmatpush1.bf16.msra.mxu0 %v7130_v60  ;;  %2162 = vmatpush1.bf16.msra.mxu1 %v7189_v26  ;;  %v7217_v60 = vld [vmem:[#allocation66_spill] sm:$0xff] }
 0x520   :  { %2287 = vmatprep.subr.bf16.mxu0 %v7132_v44  ;;  %2328 = vmatprep.subr.bf16.mxu1 %v5414_v6  ;;  %v7200_v6 = vld [vmem:[#allocation51_spill] sm:$0xff]  ;;  %v7240_v26 = vld [vmem:[#allocation34_spill] sm:$0xff] }
 0x521   :  { %v7218_v44 = vld [vmem:[#allocation67_spill] sm:$0xff] }
 0x522   :  { %2139 = vmatmul.mubr.bf16.vlgmr.msra.gmra.mrb[32].mxu0 %v2104_v21  ;;  %2180 = vmatmul.mubr.bf16.vlgmr.msra.gmra.mrb[40].mxu1 %v2104_v21  ;;  %v7241_v21 = vld [vmem:[#allocation35_spill] sm:$0xff] }
 0x523   :  { %2288 = vmatpush1.bf16.msra.mxu0 %v7190_v24  ;;  %2329 = vmatpush1.bf16.msra.mxu1 %v7191_v13  ;;  %v7242_v24 = vld [vmem:[#allocation36_spill] sm:$0xff]  ;;  %v7243_v13 = vld [vmem:[#allocation37_spill] sm:$0xff] }
 0x524   :  { %2289 = vmatprep.subr.bf16.mxu0 %v7192_v8  ;;  %2330 = vmatprep.subr.bf16.mxu1 %v7193_v17  ;;  %v7244_v8 = vld [vmem:[#allocation38_spill] sm:$0xff]  ;;  %v7245_v17 = vld [vmem:[#allocation40_spill] sm:$0xff] }
 0x527   :  { %2290 = vmatpush1.bf16.msra.mxu0 %v7194_v28  ;;  %2331 = vmatpush1.bf16.msra.mxu1 %v7195_v19  ;;  %v7246_v28 = vld [vmem:[#allocation83_spill] sm:$0xff]  ;;  %v7247_v19 = vld [vmem:[#allocation84_spill] sm:$0xff] }
 0x528   :  { %2291 = vmatprep.subr.bf16.mxu0 %v7196_v30  ;;  %2332 = vmatprep.subr.bf16.mxu1 %v7197_v14  ;;  %v7248_v30 = vld [vmem:[#allocation85_spill] sm:$0xff]  ;;  %v7249_v14 = vld [vmem:[#allocation86_spill] sm:$0xff] }
 0x52b   :  { %2292 = vmatpush1.bf16.msra.mxu0 %v7198_v38  ;;  %2333 = vmatpush1.bf16.msra.mxu1 %v7199_v16  ;;  %v7250_v38 = vld [vmem:[#allocation87_spill] sm:$0xff]  ;;  %v7251_v16 = vld [vmem:[#allocation88_spill] sm:$0xff] }
 0x52c   :  { %2293 = vmatprep.subr.bf16.mxu0 %v7200_v6  ;;  %2334 = vmatprep.subr.bf16.mxu1 %v7201_v48  ;;  %v5851_v6 = vld [vmem:[#allocation5 + $0x84] ss:$16 sps:$4 sm:$0xff]  }
 0x52d   :  { %7252 = vst [vmem:[#allocation39_spill] sm:$0xff] %v5851_v6  ;;  %v7253_v48 = vld [vmem:[#allocation55_spill] sm:$0xff] }
 0x52f   :  { %2294 = vmatpush1.bf16.msra.mxu0 %v7202_v49  ;;  %2335 = vmatpush1.bf16.msra.mxu1 %v7203_v50 }
 0x530   :  { %2295 = vmatprep.subr.bf16.mxu0 %v7204_v51  ;;  %2336 = vmatprep.subr.bf16.mxu1 %v7205_v52 }
 0x533   :  { %2296 = vmatpush1.bf16.msra.mxu0 %v7206_v57  ;;  %2337 = vmatpush1.bf16.msra.mxu1 %v7207_v58 }
 0x534   :  { %2297 = vmatprep.subr.bf16.mxu0 %v7208_v59  ;;  %2338 = vmatprep.subr.bf16.mxu1 %v7209_v61 }
 0x537   :  { %2298 = vmatpush1.bf16.msra.mxu0 %v7210_v53  ;;  %2339 = vmatpush1.bf16.msra.mxu1 %v7211_v3 }
 0x538   :  { %2299 = vmatprep.subr.bf16.mxu0 %v7212_v36  ;;  %2340 = vmatprep.subr.bf16.mxu1 %v7213_v5 }
 0x53b   :  { %2300 = vmatpush1.bf16.msra.mxu0 %v7214_v2  ;;  %2341 = vmatpush1.bf16.msra.mxu1 %v7215_v10 }
 0x53c   :  { %2301 = vmatprep.subr.bf16.mxu0 %v7216_v4  ;;  %2342 = vmatprep.subr.bf16.mxu1 %v7217_v60 }
 0x53f   :  { %2302 = vmatpush1.bf16.msra.mxu0 %v7218_v44  ;;  %2343 = vmatpush1.bf16.msra.mxu1 %v7219_v55 }
 0x540   :  { %2303 = vmatprep.subr.bf16.mxu0 %v7220_v63  ;;  %2344 = vmatprep.subr.bf16.mxu1 %v7221_v29 }
 0x543   :  { %2304 = vmatpush1.bf16.msra.mxu0 %v7222_v54  ;;  %2345 = vmatpush1.bf16.msra.mxu1 %v7223_v40 }
 0x544   :  { %2305 = vmatprep.subr.bf16.mxu0 %v7224_v1  ;;  %2346 = vmatprep.subr.bf16.mxu1 %v7225_v35 }
 0x547   :  { %2306 = vmatpush1.bf16.msra.mxu0 %v7226_v15  ;;  %2347 = vmatpush1.bf16.msra.mxu1 %v7227_v27 }
 0x548   :  { %2307 = vmatprep.subr.bf16.mxu0 %v7228_v12  ;;  %2348 = vmatprep.subr.bf16.mxu1 %v7229_v18 }
 0x54b   :  { %2308 = vmatpush1.bf16.msra.mxu0 %v7230_v0  ;;  %2349 = vmatpush1.bf16.msra.mxu1 %v7231_v20 }
 0x54c   :  { %2309 = vmatprep.subr.bf16.mxu0 %v7232_v43  ;;  %2350 = vmatprep.subr.bf16.mxu1 %v7233_v37 }
 0x54f   :  { %2310 = vmatpush1.bf16.msra.mxu0 %v7234_v33  ;;  %2351 = vmatpush1.bf16.msra.mxu1 %v7235_v47 }
 0x550   :  { %2311 = vmatprep.subr.bf16.mxu0 %v7236_v32  ;;  %2352 = vmatprep.subr.bf16.mxu1 %v7237_v42 }
 0x553   :  { %2312 = vmatpush1.bf16.msra.mxu0 %v7238_v56  ;;  %2353 = vmatpush1.bf16.msra.mxu1 %v7239_v46 }
 0x554   :  { %2313 = vmatprep.subr.bf16.mxu0 %v7240_v26  ;;  %2354 = vmatprep.subr.bf16.mxu1 %v7241_v21  ;;  %v7254_v21 = vld [vmem:[#allocation20_spill] sm:$0xff]  ;;  %v7255_v26 = vld [vmem:[#allocation21_spill] sm:$0xff] }
 0x557   :  { %2314 = vmatpush1.bf16.msra.mxu0 %v7242_v24  ;;  %2355 = vmatpush1.bf16.msra.mxu1 %v7243_v13 }
 0x558   :  { %2315 = vmatprep.subr.bf16.mxu0 %v7244_v8  ;;  %2356 = vmatprep.subr.bf16.mxu1 %v7245_v17 }
 0x55b   :  { %2316 = vmatpush1.bf16.msra.mxu0 %v7246_v28  ;;  %2357 = vmatpush1.bf16.msra.mxu1 %v7247_v19 }
 0x55c   :  { %2317 = vmatprep.subr.bf16.mxu0 %v7248_v30  ;;  %2358 = vmatprep.subr.bf16.mxu1 %v7249_v14 }
 0x55f   :  { %2318 = vmatpush1.bf16.msra.mxu0 %v7250_v38  ;;  %2359 = vmatpush1.bf16.msra.mxu1 %v7251_v16 }
 0x560   :  { %2404 = vmatprep.subr.bf16.mxu0 %v5851_v6  ;;  %2445 = vmatprep.subr.bf16.mxu1 %v7253_v48 }
 0x5d5   :  { %v2023_v49 = vpop.f32.mrb[28].mxu0  ;;  %v2064_v50 = vpop.f32.mrb[36].mxu1 }
 0x5d6   :  { %v2024_v28 = vadd.f32 %v2023_v49, %v5275_v25  ;;  %v2025_v17 = vpop.f32.mrb[29].mxu0  ;;  %v2066_v19 = vpop.f32.mrb[37].mxu1  ;;  %v2065_v6 = vadd.f32 %v2064_v50, %v7254_v21 }
 0x5d7   :  { %v2026_v30 = vadd.f32 %v2025_v17, %v7109_v62  ;;  %v2027_v8 = vpop.f32.mrb[30].mxu0  ;;  %v2068_v14 = vpop.f32.mrb[38].mxu1  ;;  %v2067_v48 = vadd.f32 %v2066_v19, %v7255_v26 }
 0x5d8   :  { %v3732_v13 = vmul.f32 -1.442695, %v2024_v28  ;;  %v2028_v38 = vpop.f32.mrb[31].mxu0  ;;  %v2069_v24 = vpop.f32.mrb[39].mxu1  ;;  %v3734_v46 = vmul.f32 -1.442695, %v2065_v6 }
 0x5d9   :  { %v3733_v16 = vmul.f32 -1.442695, %v2026_v30 }
 0x5da   :  { %4170 = vpow2.f32 %v3732_v13 }
 0x5db   :  { %4172 = vpow2.f32 %v3733_v16 }
 0x5dc   :  { %4174 = vtanh.f32 %v2067_v48 }
 0x5dd   :  { %4176 = vpow2.f32 %v3734_v46 }
 0x5e4   :  { %v4171_v56 = vpop.eup %4170 }
 0x5e5   :  { %v2080_v42 = vadd.f32 1.0, %v4171_v56  ;;  %v4173_v49 = vpop.eup %4172 }
 0x5e6   :  { %v2081_v17 = vadd.f32 1.0, %v4173_v49  ;;  %v4175_v8 = vpop.eup %4174 }
 0x5e7   :  { %4178 = vrcp.f32 %v2080_v42  ;;  %v4177_v28 = vpop.eup %4176 }
 0x5e8   :  { %4180 = vrcp.f32 %v2081_v17  ;;  %v2082_v13 = vadd.f32 1.0, %v4177_v28 }
 0x5ea   :  { %4182 = vrcp.f32 %v2082_v13 }
 0x5f1   :  { %v4179_v14 = vpop.eup %4178 }
 0x5f2   :  { %v2091_v24 = vmul.f32 %v4179_v14, %v4175_v8  ;;  %v4181_v30 = vpop.eup %4180  ;;  %v7256_v8 = vld [vmem:[#allocation77_spill] sm:$0xff] }
 0x5f3   :  { %v2090_v38 = vmul.f32 %v4181_v30, %v5735_v9 }
 0x5f5   :  { %v2140_v16 = vpop.f32.mrb[32].mxu0  ;;  %v2181_v50 = vpop.f32.mrb[40].mxu1  ;;  %v5860_v19 = vadd.f32 %v2091_v24, %v2090_v38  ;;  %v7257_v24 = vld [vmem:[#allocation78_spill] sm:$0xff] }
 0x5f6   :  { %v2192_v6 = vrot.slane %v2140_v16, 4  ;;  %v2196_v56 = vrot.slane %v2140_v16, 5  ;;  %v2142_v48 = vpop.f32.mrb[33].mxu0  ;;  %v2183_v26 = vpop.f32.mrb[41].mxu1  ;;  %v2194_v21 = vrot.slane %v2181_v50, 4  ;;  %v2198_v13 = vrot.slane %v2181_v50, 5 }
 0x5f7   :  { %v2193_v42 = vrot.slane %v2142_v48, 4  ;;  %v2197_v46 = vrot.slane %v2142_v48, 5  ;;  %v2144_v49 = vpop.f32.mrb[34].mxu0  ;;  %v2185_v17 = vpop.f32.mrb[42].mxu1  ;;  %4184 = vtanh.f32 %v5860_v19 }
 0x5f8   :  { %v2208_v14 = vadd.f32 %v2192_v6, %v7256_v8  ;;  %v2212_v28 = vadd.f32 %v2196_v56, %v7112_v7  ;;  %v2145_v9 = vpop.f32.mrb[35].mxu0  ;;  %v2186_v30 = vpop.f32.mrb[43].mxu1  ;;  %v2210_v49 = vadd.f32 %v2194_v21, %v5142_v41  ;;  %v2214_v6 = vadd.f32 %v2198_v13, %v5146_v34 }
 0x5f9   :  { %v2209_v38 = vadd.f32 %v2193_v42, %v7257_v24  ;;  %v2213_v16 = vadd.f32 %v2197_v46, %v7113_v11  ;;  %v2195_v8 = vrot.slane %v2183_v26, 4  ;;  %v2199_v56 = vrot.slane %v2183_v26, 5  ;;  %v4183_v9 = vpop.eup %4182 }
 0x5fa   :  { %v3735_v62 = vmul.f32 -1.442695, %v2208_v14  ;;  %v3738_v25 = vmul.f32 -1.442695, %v2212_v28  ;;  %v3737_v30 = vmul.f32 -1.442695, %v2210_v49 }
 0x5fb   :  { %v3736_v48 = vmul.f32 -1.442695, %v2209_v38  ;;  %v3739_v17 = vmul.f32 -1.442695, %v2213_v16  ;;  %v3740_v24 = vmul.f32 -1.442695, %v2214_v6  ;;  %v2211_v46 = vadd.f32 %v2195_v8, %v7059_v39 }
 0x5fc   :  { %4186 = vpow2.f32 %v3735_v62  ;;  %v2215_v62 = vadd.f32 %v2199_v56, %v7058_v23 }
 0x5fd   :  { %4188 = vpow2.f32 %v3738_v25 }
 0x5fe   :  { %4190 = vpow2.f32 %v3736_v48 }
 0x5ff   :  { %4192 = vpow2.f32 %v3739_v17 }
 0x600   :  { %4194 = vpow2.f32 %v3737_v30 }
 0x601   :  { %v4185_v42 = vpop.eup %4184  ;;  %4196 = vpow2.f32 %v3740_v24 }
 0x602   :  { %v2094_v14 = vmul.f32 %v4185_v42, %v4183_v9  ;;  %4198 = vtanh.f32 %v2211_v46 }
 0x603   :  { %4200 = vtanh.f32 %v2215_v62 }
 0x604   :  { %v2277_v25 = vrot.slane %v2094_v14, 4  ;;  %v2256_v14 = vrot.slane %v5748_v22, 7 }
 0x606   :  { %v4187_v50 = vpop.eup %4186  ;;  %v2280_v38 = vpack.c.bf16 %v2277_v25, %v2277_v25 }
 0x607   :  { %v4189_v21 = vpop.eup %4188  ;;  %v2234_v28 = vadd.f32 1.0, %v4187_v50  ;;  %v2257_v50 = vrot.slane %v5750_v45, 7 }
 0x608   :  { %v2237_v16 = vadd.f32 1.0, %v4189_v21  ;;  %v2284_v26 = vrot.slane %v2280_v38, 2  ;;  %v4191_v13 = vpop.eup %4190 }
 0x609   :  { %4202 = vrcp.f32 %v2234_v28  ;;  %v4193_v48 = vpop.eup %4192  ;;  %v2235_v49 = vadd.f32 1.0, %v4191_v13 }
 0x60a   :  { %4204 = vrcp.f32 %v2237_v16  ;;  %2319 = vmatprep.mubr.bf16.mxu0 %v2284_v26  ;;  %2360 = vmatprep.mubr.bf16.mxu1 %v2284_v26  ;;  %v2238_v8 = vadd.f32 1.0, %v4193_v48  ;;  %v4195_v17 = vpop.eup %4194 }
 0x60b   :  { %4206 = vrcp.f32 %v2235_v49  ;;  %v4197_v6 = vpop.eup %4196  ;;  %v2236_v62 = vadd.f32 1.0, %v4195_v17 }
 0x60c   :  { %4208 = vrcp.f32 %v2238_v8  ;;  %v4199_v24 = vpop.eup %4198  ;;  %v2239_v21 = vadd.f32 1.0, %v4197_v6 }
 0x60d   :  { %v4201_v56 = vpop.eup %4200  ;;  %4210 = vrcp.f32 %v2236_v62 }
 0x60e   :  { %4212 = vrcp.f32 %v2239_v21  ;;  %v5882_v21 = vld [vmem:[#allocation5 + $0x80] ss:$16 sps:$4 sm:$0xff]  }
 0x613   :  { %v4203_v9 = vpop.eup %4202 }
 0x614   :  { %v4205_v30 = vpop.eup %4204  ;;  %v2262_v42 = vmul.f32 %v4203_v9, %v4199_v24 }
 0x615   :  { %v2263_v46 = vmul.f32 %v4205_v30, %v4201_v56  ;;  %v4207_v25 = vpop.eup %4206 }
 0x616   :  { %v4209_v28 = vpop.eup %4208  ;;  %v2260_v38 = vmul.f32 %v4207_v25, %v2256_v14 }
 0x617   :  { %v2261_v16 = vmul.f32 %v4209_v28, %v2257_v50  ;;  %v4211_v48 = vpop.eup %4210  ;;  %v5885_v28 = vld [vmem:[#allocation5 + $0x88] ss:$16 sps:$4 sm:$0xff]  }
 0x618   :  { %v5873_v26 = vadd.f32 %v2262_v42, %v2260_v38  ;;  %v4213_v22 = vpop.eup %4212  ;;  %v5888_v38 = vld [vmem:[#allocation5 + $0xa4] ss:$16 sps:$4 sm:$0xff]  }
 0x619   :  { %v5875_v13 = vadd.f32 %v2263_v46, %v2261_v16  ;;  %v5891_v16 = vld [vmem:[#allocation5 + $0xac] ss:$16 sps:$4 sm:$0xff]  }
 0x61a   :  { %4214 = vtanh.f32 %v5873_v26 }
 0x61b   :  { %4216 = vtanh.f32 %v5875_v13 }
 0x624   :  { %v4215_v49 = vpop.eup %4214 }
 0x625   :  { %v4217_v8 = vpop.eup %4216  ;;  %v2268_v17 = vmul.f32 %v4215_v49, %v4211_v48  ;;  %v5896_v48 = vld [vmem:[#allocation5 + $0xa0] ss:$16 sps:$4 sm:$0xff]   ;;  %v5902_v49 = vld [vmem:[#allocation5 + $0xc4] ss:$16 sps:$4 sm:$0xff]  }
 0x626   :  { %v2269_v45 = vmul.f32 %v4217_v8, %v4213_v22  ;;  %v5899_v22 = vld [vmem:[#allocation5 + $0xa8] ss:$16 sps:$4 sm:$0xff]   ;;  %v5905_v8 = vld [vmem:[#allocation5 + $0xcc] ss:$16 sps:$4 sm:$0xff]  }
 0x627   :  { %v2393_v6 = vpack.c.bf16 %v2268_v17, %v2268_v17 }
 0x628   :  { %v2272_v24 = vrot.slane %v2269_v45, 7  ;;  %v2394_v56 = vpack.c.bf16 %v2269_v45, %v2269_v45  ;;  %v5911_v45 = vld [vmem:[#allocation5 + $0xc8] ss:$16 sps:$4 sm:$0xff]  }
 0x629   :  { %v2397_v9 = vunpack.c.l.b16 %v2393_v6  ;;  %v5914_v6 = vld [vmem:[#allocation5 + $0xe4] ss:$16 sps:$4 sm:$0xff]  }
 0x62a   :  { %v2274_v30 = vsel %vm2273_vm5, %v2272_v24, %v2268_v17  ;;  %v2398_v42 = vunpack.c.l.b16 %v2394_v56  ;;  %v5908_v17 = vld [vmem:[#allocation5 + $0xc0] ss:$16 sps:$4 sm:$0xff]   ;;  %v5917_v24 = vld [vmem:[#allocation5 + $0xec] ss:$16 sps:$4 sm:$0xff]  }
 0x62b   :  { %v2279_v14 = vpack.c.bf16 %v2274_v30, %v2274_v30  ;;  %v2399_v46 = vrot.slane %v2397_v9, 4  ;;  %v5920_v56 = vld [vmem:[#allocation5 + $0xe0] ss:$16 sps:$4 sm:$0xff]   ;;  %v5923_v9 = vld [vmem:[#allocation5 + $0xe8] ss:$16 sps:$4 sm:$0xff]  }
 0x62c   :  { %v2400_v62 = vrot.slane %v2398_v42, 3  ;;  %v5926_v30 = vld [vmem:[#allocation5 + $0x104] ss:$16 sps:$4 sm:$0xff]   ;;  %v5929_v42 = vld [vmem:[#allocation5 + $0x10c] ss:$16 sps:$4 sm:$0xff]  }
 0x62d   :  { %v2283_v25 = vrot.slane %v2279_v14, 2  ;;  %7258 = vst [vmem:[#allocation41_spill] sm:$0xff] %v5926_v30  ;;  %7259 = vst [vmem:[#allocation42_spill] sm:$0xff] %v5929_v42  ;;  %v5932_v14 = vld [vmem:[#allocation5 + $0x100] ss:$16 sps:$4 sm:$0xff]  }
 0x62e   :  { %v5880_v50 = vsel %vm424_vm1, %v2400_v62, %v2399_v46  ;;  %7260 = vst [vmem:[#allocation43_spill] sm:$0xff] %v5932_v14  ;;  %v5935_v46 = vld [vmem:[#allocation5 + $0x108] ss:$16 sps:$4 sm:$0xff]   ;;  %v5938_v62 = vld [vmem:[#allocation5 + $0x124] ss:$16 sps:$4 sm:$0xff]  }
 0x62f   :  { %2320 = vmatmul.mubr.bf16.vlgmr.msra.gmra.mrb[36].mxu0 %v2283_v25  ;;  %2361 = vmatmul.mubr.bf16.vlgmr.msra.gmra.mrb[44].mxu1 %v2283_v25  ;;  %7261 = vst [vmem:[#allocation44_spill] sm:$0xff] %v5935_v46  ;;  %7262 = vst [vmem:[#allocation45_spill] sm:$0xff] %v5938_v62  ;;  %v5941_v25 = vld [vmem:[#allocation5 + $0x12c] ss:$16 sps:$4 sm:$0xff]  }
 0x630   :  { %2405 = vmatpush1.bf16.msra.mxu0 %v5882_v21  ;;  %2446 = vmatpush1.bf16.msra.mxu1 %v5885_v28  ;;  %7263 = vst [vmem:[#allocation46_spill] sm:$0xff] %v5941_v25 }
 0x631   :  { %2406 = vmatprep.subr.bf16.mxu0 %v5888_v38  ;;  %2447 = vmatprep.subr.bf16.mxu1 %v5891_v16 }
 0x632   :  { %2436 = vmatprep.mubr.bf16.mxu0 %v6989_v31  ;;  %2477 = vmatprep.mubr.bf16.mxu1 %v6989_v31 }
 0x634   :  { %2407 = vmatpush1.bf16.msra.mxu0 %v5896_v48  ;;  %2448 = vmatpush1.bf16.msra.mxu1 %v5899_v22 }
 0x635   :  { %2408 = vmatprep.subr.bf16.mxu0 %v5902_v49  ;;  %2449 = vmatprep.subr.bf16.mxu1 %v5905_v8 }
 0x638   :  { %2409 = vmatpush1.bf16.msra.mxu0 %v5908_v17  ;;  %2450 = vmatpush1.bf16.msra.mxu1 %v5911_v45 }
 0x639   :  { %2410 = vmatprep.subr.bf16.mxu0 %v5914_v6  ;;  %2451 = vmatprep.subr.bf16.mxu1 %v5917_v24 }
 0x63c   :  { %2411 = vmatpush1.bf16.msra.mxu0 %v5920_v56  ;;  %2452 = vmatpush1.bf16.msra.mxu1 %v5923_v9 }
 0x63d   :  { %2412 = vmatprep.subr.bf16.mxu0 %v5926_v30  ;;  %2453 = vmatprep.subr.bf16.mxu1 %v5929_v42  ;;  %v5944_v30 = vld [vmem:[#allocation5 + $0x120] ss:$16 sps:$4 sm:$0xff]   ;;  %v5947_v42 = vld [vmem:[#allocation5 + $0x128] ss:$16 sps:$4 sm:$0xff]  }
 0x63e   :  { %7264 = vst [vmem:[#allocation47_spill] sm:$0xff] %v5944_v30  ;;  %7265 = vst [vmem:[#allocation48_spill] sm:$0xff] %v5947_v42 }
 0x640   :  { %2413 = vmatpush1.bf16.msra.mxu0 %v5932_v14  ;;  %2454 = vmatpush1.bf16.msra.mxu1 %v5935_v46  ;;  %v5950_v14 = vld [vmem:[#allocation5 + $0x144] ss:$16 sps:$4 sm:$0xff]   ;;  %v5953_v46 = vld [vmem:[#allocation5 + $0x14c] ss:$16 sps:$4 sm:$0xff]  }
 0x641   :  { %2414 = vmatprep.subr.bf16.mxu0 %v5938_v62  ;;  %2455 = vmatprep.subr.bf16.mxu1 %v5941_v25  ;;  %7266 = vst [vmem:[#allocation49_spill] sm:$0xff] %v5950_v14  ;;  %7267 = vst [vmem:[#allocation50_spill] sm:$0xff] %v5953_v46  ;;  %v5956_v62 = vld [vmem:[#allocation5 + $0x140] ss:$16 sps:$4 sm:$0xff]   ;;  %v5959_v25 = vld [vmem:[#allocation5 + $0x148] ss:$16 sps:$4 sm:$0xff]  }
 0x642   :  { %7268 = vst [vmem:[#allocation51_spill] sm:$0xff] %v5956_v62  ;;  %7269 = vst [vmem:[#allocation52_spill] sm:$0xff] %v5959_v25 }
 0x644   :  { %2415 = vmatpush1.bf16.msra.mxu0 %v5944_v30  ;;  %2456 = vmatpush1.bf16.msra.mxu1 %v5947_v42  ;;  %v5962_v30 = vld [vmem:[#allocation5 + $0x164] ss:$16 sps:$4 sm:$0xff]   ;;  %v5965_v42 = vld [vmem:[#allocation5 + $0x16c] ss:$16 sps:$4 sm:$0xff]  }
 0x645   :  { %2416 = vmatprep.subr.bf16.mxu0 %v5950_v14  ;;  %2457 = vmatprep.subr.bf16.mxu1 %v5953_v46  ;;  %7270 = vst [vmem:[#allocation53_spill] sm:$0xff] %v5962_v30  ;;  %7271 = vst [vmem:[#allocation54_spill] sm:$0xff] %v5965_v42  ;;  %v5968_v14 = vld [vmem:[#allocation5 + $0x160] ss:$16 sps:$4 sm:$0xff]   ;;  %v5971_v46 = vld [vmem:[#allocation5 + $0x168] ss:$16 sps:$4 sm:$0xff]  }
 0x646   :  { %7272 = vst [vmem:[#allocation56_spill] sm:$0xff] %v5968_v14  ;;  %7273 = vst [vmem:[#allocation57_spill] sm:$0xff] %v5971_v46 }
 0x648   :  { %2417 = vmatpush1.bf16.msra.mxu0 %v5956_v62  ;;  %2458 = vmatpush1.bf16.msra.mxu1 %v5959_v25  ;;  %v2402_v62 = vpack.c.b16 %v5880_v50, %v5880_v50  ;;  %v5976_v25 = vld [vmem:[#allocation5 + $0x184] ss:$16 sps:$4 sm:$0xff]   ;;  %v5991_v50 = vld [vmem:[#allocation5 + $0x1ac] ss:$16 sps:$4 sm:$0xff]  }
 0x649   :  { %2418 = vmatprep.subr.bf16.mxu0 %v5962_v30  ;;  %2459 = vmatprep.subr.bf16.mxu1 %v5965_v42  ;;  %7274 = vst [vmem:[#allocation58_spill] sm:$0xff] %v5976_v25  ;;  %v5979_v30 = vld [vmem:[#allocation5 + $0x18c] ss:$16 sps:$4 sm:$0xff]   ;;  %v5982_v42 = vld [vmem:[#allocation5 + $0x180] ss:$16 sps:$4 sm:$0xff]   ;;  %7278 = vst [vmem:[#allocation81_spill] sm:$0xff] %v5991_v50 }
 0x64a   :  { %7275 = vst [vmem:[#allocation59_spill] sm:$0xff] %v5982_v42 }
 0x64c   :  { %2419 = vmatpush1.bf16.msra.mxu0 %v5968_v14  ;;  %2460 = vmatpush1.bf16.msra.mxu1 %v5971_v46  ;;  %v5985_v14 = vld [vmem:[#allocation5 + $0x188] ss:$16 sps:$4 sm:$0xff]   ;;  %v5988_v46 = vld [vmem:[#allocation5 + $0x1a4] ss:$16 sps:$4 sm:$0xff]  }
 0x64d   :  { %2597 = vmatprep.subr.bf16.mxu0 %v5976_v25  ;;  %2638 = vmatprep.subr.bf16.mxu1 %v5979_v30  ;;  %7276 = vst [vmem:[#allocation16_spill] sm:$0xff] %v5985_v14  ;;  %7277 = vst [vmem:[#allocation82_spill] sm:$0xff] %v5988_v46  ;;  %v5994_v25 = vld [vmem:[#allocation5 + $0x1a0] ss:$16 sps:$4 sm:$0xff]  }
 0x64e   :  { %7279 = vst [vmem:[#allocation60_spill] sm:$0xff] %v5994_v25 }
 0x64f   :  { %2437 = vmatmul.mubr.bf16.vlgmr.msra.gmra.mrb[40].mxu0 %v2402_v62  ;;  %2478 = vmatmul.mubr.bf16.vlgmr.msra.gmra.mrb[48].mxu1 %v2402_v62  ;;  %v5997_v62 = vld [vmem:[#allocation5 + $0x1a8] ss:$16 sps:$4 sm:$0xff]  }
 0x650   :  { %2598 = vmatpush1.bf16.msra.mxu0 %v5982_v42  ;;  %2639 = vmatpush1.bf16.msra.mxu1 %v5985_v14  ;;  %7280 = vst [vmem:[#allocation61_spill] sm:$0xff] %v5997_v62  ;;  %v6000_v42 = vld [vmem:[#allocation5 + $0x1c4] ss:$16 sps:$4 sm:$0xff]   ;;  %v6003_v14 = vld [vmem:[#allocation5 + $0x1cc] ss:$16 sps:$4 sm:$0xff]  }
 0x651   :  { %2599 = vmatprep.subr.bf16.mxu0 %v5988_v46  ;;  %2640 = vmatprep.subr.bf16.mxu1 %v5991_v50  ;;  %7281 = vst [vmem:[#allocation62_spill] sm:$0xff] %v6000_v42  ;;  %7282 = vst [vmem:[#allocation63_spill] sm:$0xff] %v6003_v14  ;;  %v6006_v46 = vld [vmem:[#allocation5 + $0x1c0] ss:$16 sps:$4 sm:$0xff]   ;;  %v6009_v50 = vld [vmem:[#allocation5 + $0x1c8] ss:$16 sps:$4 sm:$0xff]  }
 0x652   :  { %7283 = vst [vmem:[#allocation64_spill] sm:$0xff] %v6006_v46  ;;  %7284 = vst [vmem:[#allocation65_spill] sm:$0xff] %v6009_v50 }
 0x654   :  { %2600 = vmatpush1.bf16.msra.mxu0 %v5994_v25  ;;  %2641 = vmatpush1.bf16.msra.mxu1 %v5997_v62  ;;  %v6012_v25 = vld [vmem:[#allocation5 + $0x1e4] ss:$16 sps:$4 sm:$0xff]   ;;  %v6015_v62 = vld [vmem:[#allocation5 + $0x1ec] ss:$16 sps:$4 sm:$0xff]  }
 0x655   :  { %2601 = vmatprep.subr.bf16.mxu0 %v6000_v42  ;;  %2642 = vmatprep.subr.bf16.mxu1 %v6003_v14  ;;  %7285 = vst [vmem:[#allocation66_spill] sm:$0xff] %v6012_v25  ;;  %7286 = vst [vmem:[#allocation67_spill] sm:$0xff] %v6015_v62  ;;  %v6018_v42 = vld [vmem:[#allocation5 + $0x1e0] ss:$16 sps:$4 sm:$0xff]   ;;  %v6021_v14 = vld [vmem:[#allocation5 + $0x1e8] ss:$16 sps:$4 sm:$0xff]  }
 0x656   :  { %7287 = vst [vmem:[#allocation68_spill] sm:$0xff] %v6018_v42  ;;  %7288 = vst [vmem:[#allocation69_spill] sm:$0xff] %v6021_v14 }
 0x658   :  { %2602 = vmatpush1.bf16.msra.mxu0 %v6006_v46  ;;  %2643 = vmatpush1.bf16.msra.mxu1 %v6009_v50 }
 0x659   :  { %2603 = vmatprep.subr.bf16.mxu0 %v6012_v25  ;;  %2644 = vmatprep.subr.bf16.mxu1 %v6015_v62 }
 0x65c   :  { %2604 = vmatpush1.bf16.msra.mxu0 %v6018_v42  ;;  %2645 = vmatpush1.bf16.msra.mxu1 %v6021_v14 }
 0x65d   :  { %2605 = vmatprep.subr.bf16.mxu0 %v7204_v51  ;;  %2646 = vmatprep.subr.bf16.mxu1 %v7205_v52  ;;  %v7289_v51 = vld [vmem:[#allocation31_spill] sm:$0xff]  ;;  %v7290_v52 = vld [vmem:[#allocation32_spill] sm:$0xff] }
 0x660   :  { %2606 = vmatpush1.bf16.msra.mxu0 %v7206_v57  ;;  %2647 = vmatpush1.bf16.msra.mxu1 %v7207_v58  ;;  %v7291_v57 = vld [vmem:[#allocation33_spill] sm:$0xff]  ;;  %v7292_v58 = vld [vmem:[#allocation34_spill] sm:$0xff] }
 0x661   :  { %2607 = vmatprep.subr.bf16.mxu0 %v7208_v59  ;;  %2648 = vmatprep.subr.bf16.mxu1 %v7209_v61  ;;  %v7293_v59 = vld [vmem:[#allocation35_spill] sm:$0xff]  ;;  %v7294_v61 = vld [vmem:[#allocation36_spill] sm:$0xff] }
 0x664   :  { %2608 = vmatpush1.bf16.msra.mxu0 %v7210_v53  ;;  %2649 = vmatpush1.bf16.msra.mxu1 %v7211_v3  ;;  %v7295_v53 = vld [vmem:[#allocation37_spill] sm:$0xff]  ;;  %v7296_v3 = vld [vmem:[#allocation38_spill] sm:$0xff] }
 0x665   :  { %2609 = vmatprep.subr.bf16.mxu0 %v7212_v36  ;;  %2650 = vmatprep.subr.bf16.mxu1 %v7213_v5  ;;  %v7297_v36 = vld [vmem:[#allocation40_spill] sm:$0xff]  ;;  %v7298_v5 = vld [vmem:[#allocation83_spill] sm:$0xff] }
 0x668   :  { %2610 = vmatpush1.bf16.msra.mxu0 %v7214_v2  ;;  %2651 = vmatpush1.bf16.msra.mxu1 %v7215_v10  ;;  %v7299_v2 = vld [vmem:[#allocation84_spill] sm:$0xff]  ;;  %v7300_v10 = vld [vmem:[#allocation85_spill] sm:$0xff] }
 0x669   :  { %2611 = vmatprep.subr.bf16.mxu0 %v7216_v4  ;;  %2652 = vmatprep.subr.bf16.mxu1 %v7217_v60  ;;  %v7301_v4 = vld [vmem:[#allocation86_spill] sm:$0xff]  ;;  %v7302_v60 = vld [vmem:[#allocation87_spill] sm:$0xff] }
 0x66c   :  { %2612 = vmatpush1.bf16.msra.mxu0 %v7218_v44  ;;  %2653 = vmatpush1.bf16.msra.mxu1 %v7219_v55  ;;  %v7303_v44 = vld [vmem:[#allocation88_spill] sm:$0xff]  ;;  %v7304_v55 = vld [vmem:[#allocation39_spill] sm:$0xff] }
 0x66d   :  { %2613 = vmatprep.subr.bf16.mxu0 %v7220_v63  ;;  %2654 = vmatprep.subr.bf16.mxu1 %v7221_v29  ;;  %v6073_v63 = vld [vmem:[#allocation5 + $0x8c] ss:$16 sps:$4 sm:$0xff]  }
 0x670   :  { %2614 = vmatpush1.bf16.msra.mxu0 %v7222_v54  ;;  %2655 = vmatpush1.bf16.msra.mxu1 %v7223_v40  ;;  %v7305_v40 = vld [vmem:[#allocation18_spill] sm:$0xff] }
 0x671   :  { %2615 = vmatprep.subr.bf16.mxu0 %v7224_v1  ;;  %2656 = vmatprep.subr.bf16.mxu1 %v7225_v35 }
 0x674   :  { %2616 = vmatpush1.bf16.msra.mxu0 %v7226_v15  ;;  %2657 = vmatpush1.bf16.msra.mxu1 %v7227_v27  ;;  %v7306_v27 = vld [vmem:[#allocation19_spill] sm:$0xff] }
 0x675   :  { %2617 = vmatprep.subr.bf16.mxu0 %v7228_v12  ;;  %2658 = vmatprep.subr.bf16.mxu1 %v7229_v18 }
 0x678   :  { %2618 = vmatpush1.bf16.msra.mxu0 %v7230_v0  ;;  %2659 = vmatpush1.bf16.msra.mxu1 %v7231_v20 }
 0x679   :  { %2619 = vmatprep.subr.bf16.mxu0 %v7232_v43  ;;  %2660 = vmatprep.subr.bf16.mxu1 %v7233_v37 }
 0x67c   :  { %2620 = vmatpush1.bf16.msra.mxu0 %v7234_v33  ;;  %2661 = vmatpush1.bf16.msra.mxu1 %v7235_v47  ;;  %v7307_v47 = vld [vmem:[#allocation20_spill] sm:$0xff] }
 0x67d   :  { %2621 = vmatprep.subr.bf16.mxu0 %v7236_v32  ;;  %2662 = vmatprep.subr.bf16.mxu1 %v7289_v51  ;;  %v7308_v51 = vld [vmem:[#allocation21_spill] sm:$0xff] }
 0x680   :  { %2622 = vmatpush1.bf16.msra.mxu0 %v7290_v52  ;;  %2663 = vmatpush1.bf16.msra.mxu1 %v7291_v57 }
 0x681   :  { %2623 = vmatprep.subr.bf16.mxu0 %v7292_v58  ;;  %2664 = vmatprep.subr.bf16.mxu1 %v7293_v59 }
 0x684   :  { %2624 = vmatpush1.bf16.msra.mxu0 %v7294_v61  ;;  %2665 = vmatpush1.bf16.msra.mxu1 %v7295_v53 }
 0x685   :  { %2625 = vmatprep.subr.bf16.mxu0 %v7296_v3  ;;  %2666 = vmatprep.subr.bf16.mxu1 %v7297_v36 }
 0x688   :  { %2626 = vmatpush1.bf16.msra.mxu0 %v7298_v5  ;;  %2667 = vmatpush1.bf16.msra.mxu1 %v7299_v2 }
 0x689   :  { %2627 = vmatprep.subr.bf16.mxu0 %v7300_v10  ;;  %2668 = vmatprep.subr.bf16.mxu1 %v7301_v4 }
 0x68c   :  { %2628 = vmatpush1.bf16.msra.mxu0 %v7302_v60  ;;  %2669 = vmatpush1.bf16.msra.mxu1 %v7303_v44 }
 0x68d   :  { %2714 = vmatprep.subr.bf16.mxu0 %v7304_v55  ;;  %2755 = vmatprep.subr.bf16.mxu1 %v6073_v63 }
 0x702   :  { %v2321_v29 = vpop.f32.mrb[36].mxu0  ;;  %v2362_v54 = vpop.f32.mrb[44].mxu1 }
 0x703   :  { %v2322_v1 = vadd.f32 %v2321_v29, %v7305_v40  ;;  %v2323_v35 = vpop.f32.mrb[37].mxu0  ;;  %v2364_v15 = vpop.f32.mrb[45].mxu1  ;;  %v2363_v32 = vadd.f32 %v2362_v54, %v7307_v47 }
 0x704   :  { %v2324_v12 = vadd.f32 %v2323_v35, %v7306_v27  ;;  %v2325_v18 = vpop.f32.mrb[38].mxu0  ;;  %v2366_v0 = vpop.f32.mrb[46].mxu1  ;;  %v2365_v52 = vadd.f32 %v2364_v15, %v7308_v51 }
 0x705   :  { %v3741_v20 = vmul.f32 -1.442695, %v2322_v1  ;;  %v2326_v43 = vpop.f32.mrb[39].mxu0  ;;  %v2367_v37 = vpop.f32.mrb[47].mxu1  ;;  %v3743_v57 = vmul.f32 -1.442695, %v2363_v32 }
 0x706   :  { %v3742_v33 = vmul.f32 -1.442695, %v2324_v12  ;;  %v7309_v37 = vld [vmem:[#allocation77_spill] sm:$0xff] }
 0x707   :  { %4218 = vpow2.f32 %v3741_v20 }
 0x708   :  { %4220 = vpow2.f32 %v3742_v33 }
 0x709   :  { %4222 = vtanh.f32 %v2365_v52 }
 0x70a   :  { %4224 = vpow2.f32 %v3743_v57 }
 0x711   :  { %v4219_v58 = vpop.eup %4218 }
 0x712   :  { %v2378_v59 = vadd.f32 1.0, %v4219_v58  ;;  %v4221_v61 = vpop.eup %4220  ;;  %v7310_v58 = vld [vmem:[#allocation78_spill] sm:$0xff] }
 0x713   :  { %v2379_v53 = vadd.f32 1.0, %v4221_v61  ;;  %v4223_v3 = vpop.eup %4222 }
 0x714   :  { %4226 = vrcp.f32 %v2378_v59  ;;  %v4225_v36 = vpop.eup %4224 }
 0x715   :  { %4228 = vrcp.f32 %v2379_v53  ;;  %v2380_v4 = vadd.f32 1.0, %v4225_v36 }
 0x717   :  { %4230 = vrcp.f32 %v2380_v4 }
 0x71e   :  { %v4227_v5 = vpop.eup %4226 }
 0x71f   :  { %v2389_v2 = vmul.f32 %v4227_v5, %v4223_v3  ;;  %v4229_v10 = vpop.eup %4228 }
 0x720   :  { %v2388_v60 = vmul.f32 %v4229_v10, %v5860_v19 }
 0x722   :  { %v2438_v44 = vpop.f32.mrb[40].mxu0  ;;  %v2479_v29 = vpop.f32.mrb[48].mxu1  ;;  %v6081_v54 = vadd.f32 %v2389_v2, %v2388_v60 }
 0x723   :  { %v2490_v1 = vrot.slane %v2438_v44, 3  ;;  %v2494_v35 = vrot.slane %v2438_v44, 4  ;;  %v2440_v15 = vpop.f32.mrb[41].mxu0  ;;  %v2481_v12 = vpop.f32.mrb[49].mxu1  ;;  %v2492_v57 = vrot.slane %v2479_v29, 3  ;;  %v2496_v36 = vrot.slane %v2479_v29, 4 }
 0x724   :  { %v2491_v18 = vrot.slane %v2440_v15, 3  ;;  %v2495_v0 = vrot.slane %v2440_v15, 4  ;;  %v2442_v20 = vpop.f32.mrb[42].mxu0  ;;  %v2483_v43 = vpop.f32.mrb[50].mxu1  ;;  %4232 = vtanh.f32 %v6081_v54  ;;  %v2493_v60 = vrot.slane %v2481_v12, 3 }
 0x725   :  { %v2506_v33 = vadd.f32 %v2490_v1, %v7309_v37  ;;  %v2510_v32 = vadd.f32 %v2494_v35, %v7112_v7  ;;  %v2443_v19 = vpop.f32.mrb[43].mxu0  ;;  %v2484_v52 = vpop.f32.mrb[51].mxu1  ;;  %v2508_v2 = vadd.f32 %v2492_v57, %v5142_v41  ;;  %v2512_v4 = vadd.f32 %v2496_v36, %v5146_v34 }
 0x726   :  { %v2507_v59 = vadd.f32 %v2491_v18, %v7310_v58  ;;  %v2511_v61 = vadd.f32 %v2495_v0, %v7113_v11  ;;  %v2497_v44 = vrot.slane %v2481_v12, 4  ;;  %v4231_v1 = vpop.eup %4230  ;;  %v2509_v0 = vadd.f32 %v2493_v60, %v7059_v39 }
 0x727   :  { %v3744_v53 = vmul.f32 -1.442695, %v2506_v33  ;;  %v3747_v3 = vmul.f32 -1.442695, %v2510_v32  ;;  %v3746_v35 = vmul.f32 -1.442695, %v2508_v2 }
 0x728   :  { %v3745_v5 = vmul.f32 -1.442695, %v2507_v59  ;;  %v3748_v10 = vmul.f32 -1.442695, %v2511_v61  ;;  %v3749_v18 = vmul.f32 -1.442695, %v2512_v4  ;;  %v2513_v29 = vadd.f32 %v2497_v44, %v7058_v23 }
 0x729   :  { %4234 = vpow2.f32 %v3744_v53 }
 0x72a   :  { %4236 = vpow2.f32 %v3747_v3 }
 0x72b   :  { %4238 = vpow2.f32 %v3745_v5 }
 0x72c   :  { %4240 = vpow2.f32 %v3748_v10 }
 0x72d   :  { %4242 = vpow2.f32 %v3746_v35 }
 0x72e   :  { %v4233_v15 = vpop.eup %4232  ;;  %4244 = vpow2.f32 %v3749_v18 }
 0x72f   :  { %v2392_v20 = vmul.f32 %v4233_v15, %v4231_v1  ;;  %4246 = vtanh.f32 %v2509_v0 }
 0x730   :  { %4248 = vtanh.f32 %v2513_v29 }
 0x731   :  { %v2575_v43 = vrot.slane %v2392_v20, 3  ;;  %v2554_v20 = vrot.slane %v5873_v26, 7 }
 0x733   :  { %v4235_v33 = vpop.eup %4234  ;;  %v2578_v52 = vpack.c.bf16 %v2575_v43, %v2575_v43 }
 0x734   :  { %v4237_v32 = vpop.eup %4236  ;;  %v2532_v19 = vadd.f32 1.0, %v4235_v33  ;;  %v2555_v33 = vrot.slane %v5875_v13, 7 }
 0x735   :  { %v2535_v57 = vadd.f32 1.0, %v4237_v32  ;;  %v2588_v12 = vshrl.u32 %v2578_v52, 16  ;;  %v2591_v59 = vshll.u32 %v2578_v52, 16  ;;  %v4239_v61 = vpop.eup %4238 }
 0x736   :  { %4250 = vrcp.f32 %v2532_v19  ;;  %v4241_v53 = vpop.eup %4240  ;;  %v2533_v3 = vadd.f32 1.0, %v4239_v61 }
 0x737   :  { %4252 = vrcp.f32 %v2535_v57  ;;  %v2590_v36 = vrot.slane %v2588_v12, 2  ;;  %v2593_v5 = vrot.slane %v2591_v59, 3  ;;  %v2536_v2 = vadd.f32 1.0, %v4241_v53  ;;  %v4243_v4 = vpop.eup %4242 }
 0x738   :  { %4254 = vrcp.f32 %v2533_v3  ;;  %v4245_v60 = vpop.eup %4244  ;;  %v2534_v29 = vadd.f32 1.0, %v4243_v4 }
 0x739   :  { %v2594_v10 = vor.u32 %v2593_v5, %v2590_v36  ;;  %4256 = vrcp.f32 %v2536_v2  ;;  %v4247_v44 = vpop.eup %4246  ;;  %v2537_v32 = vadd.f32 1.0, %v4245_v60 }
 0x73a   :  { %v4249_v1 = vpop.eup %4248  ;;  %4258 = vrcp.f32 %v2534_v29 }
 0x73b   :  { %2629 = vmatprep.mubr.bf16.mxu0 %v2594_v10  ;;  %2670 = vmatprep.mubr.bf16.mxu1 %v2594_v10  ;;  %4260 = vrcp.f32 %v2537_v32  ;;  %v7311_v32 = vld [vmem:[#allocation41_spill] sm:$0xff] }
 0x740   :  { %v4251_v35 = vpop.eup %4250 }
 0x741   :  { %v4253_v15 = vpop.eup %4252  ;;  %v2560_v18 = vmul.f32 %v4251_v35, %v4247_v44 }
 0x742   :  { %v2561_v0 = vmul.f32 %v4253_v15, %v4249_v1  ;;  %v4255_v43 = vpop.eup %4254 }
 0x743   :  { %v4257_v19 = vpop.eup %4256  ;;  %v2558_v52 = vmul.f32 %v4255_v43, %v2554_v20 }
 0x744   :  { %v2559_v57 = vmul.f32 %v4257_v19, %v2555_v33  ;;  %v4259_v61 = vpop.eup %4258  ;;  %v7312_v19 = vld [vmem:[#allocation42_spill] sm:$0xff] }
 0x745   :  { %v6094_v12 = vadd.f32 %v2560_v18, %v2558_v52  ;;  %v4261_v26 = vpop.eup %4260  ;;  %v7313_v52 = vld [vmem:[#allocation43_spill] sm:$0xff] }
 0x746   :  { %v6096_v59 = vadd.f32 %v2561_v0, %v2559_v57  ;;  %v7314_v57 = vld [vmem:[#allocation44_spill] sm:$0xff] }
 0x747   :  { %4262 = vtanh.f32 %v6094_v12 }
 0x748   :  { %4264 = vtanh.f32 %v6096_v59 }
 0x751   :  { %v4263_v53 = vpop.eup %4262 }
 0x752   :  { %v4265_v3 = vpop.eup %4264  ;;  %v2566_v36 = vmul.f32 %v4263_v53, %v4259_v61  ;;  %v7315_v61 = vld [vmem:[#allocation45_spill] sm:$0xff]  ;;  %v7317_v53 = vld [vmem:[#allocation47_spill] sm:$0xff] }
 0x753   :  { %v2567_v13 = vmul.f32 %v4265_v3, %v4261_v26  ;;  %v7316_v26 = vld [vmem:[#allocation46_spill] sm:$0xff]  ;;  %v7318_v3 = vld [vmem:[#allocation48_spill] sm:$0xff] }
 0x754   :  { %v2703_v5 = vpack.c.bf16 %v2566_v36, %v2566_v36 }
 0x755   :  { %v2570_v2 = vrot.slane %v2567_v13, 7  ;;  %v2704_v10 = vpack.c.bf16 %v2567_v13, %v2567_v13  ;;  %v7320_v13 = vld [vmem:[#allocation50_spill] sm:$0xff] }
 0x756   :  { %v2707_v4 = vunpack.c.l.b16 %v2703_v5  ;;  %v7321_v5 = vld [vmem:[#allocation51_spill] sm:$0xff] }
 0x757   :  { %v2572_v60 = vsel %vm2571_vm6, %v2570_v2, %v2566_v36  ;;  %v2708_v44 = vunpack.c.l.b16 %v2704_v10  ;;  %v7319_v36 = vld [vmem:[#allocation49_spill] sm:$0xff]  ;;  %v7322_v2 = vld [vmem:[#allocation52_spill] sm:$0xff] }
 0x758   :  { %v2577_v1 = vpack.c.bf16 %v2572_v60, %v2572_v60  ;;  %v2709_v35 = vrot.slane %v2707_v4, 5  ;;  %v7323_v10 = vld [vmem:[#allocation53_spill] sm:$0xff]  ;;  %v7324_v4 = vld [vmem:[#allocation54_spill] sm:$0xff]  ;;  %v7325_v60 = vld [vmem:[#allocation56_spill] sm:$0xff] }
 0x759   :  { %v2710_v15 = vrot.slane %v2708_v44, 4  ;;  %v7326_v44 = vld [vmem:[#allocation57_spill] sm:$0xff] }
 0x75a   :  { %v2580_v18 = vshrl.u32 %v2577_v1, 16  ;;  %v2583_v0 = vshll.u32 %v2577_v1, 16 }
 0x75b   :  { %v2711_v20 = vsel %vm424_vm1, %v2710_v15, %v2709_v35  ;;  %v7327_v35 = vld [vmem:[#allocation58_spill] sm:$0xff]  ;;  %v7328_v15 = vld [vmem:[#allocation59_spill] sm:$0xff] }
 0x75c   :  { %v2582_v29 = vrot.slane %v2580_v18, 2  ;;  %v2585_v43 = vrot.slane %v2583_v0, 3  ;;  %v2712_v1 = vpack.c.b16 %v2711_v20, %v2711_v20  ;;  %v7329_v18 = vld [vmem:[#allocation16_spill] sm:$0xff]  ;;  %v7330_v0 = vld [vmem:[#allocation82_spill] sm:$0xff]  ;;  %v7335_v20 = vld [vmem:[#allocation63_spill] sm:$0xff] }
 0x75e   :  { %v2586_v33 = vor.u32 %v2585_v43, %v2582_v29  ;;  %v7331_v29 = vld [vmem:[#allocation81_spill] sm:$0xff]  ;;  %v7332_v43 = vld [vmem:[#allocation60_spill] sm:$0xff] }
 0x760   :  { %2630 = vmatmul.mubr.bf16.vlgmr.msra.gmra.mrb[44].mxu0 %v2586_v33  ;;  %2671 = vmatmul.mubr.bf16.vlgmr.msra.gmra.mrb[52].mxu1 %v2586_v33  ;;  %v7333_v33 = vld [vmem:[#allocation61_spill] sm:$0xff] }
 0x761   :  { %2715 = vmatpush1.bf16.msra.mxu0 %v5882_v21  ;;  %2756 = vmatpush1.bf16.msra.mxu1 %v5885_v28 }
 0x762   :  { %2716 = vmatprep.subr.bf16.mxu0 %v5888_v38  ;;  %2757 = vmatprep.subr.bf16.mxu1 %v5891_v16 }
 0x763   :  { %2746 = vmatprep.mubr.bf16.mxu0 %v6989_v31  ;;  %2787 = vmatprep.mubr.bf16.mxu1 %v6989_v31 }
 0x765   :  { %2717 = vmatpush1.bf16.msra.mxu0 %v5896_v48  ;;  %2758 = vmatpush1.bf16.msra.mxu1 %v5899_v22 }
 0x766   :  { %2718 = vmatprep.subr.bf16.mxu0 %v5902_v49  ;;  %2759 = vmatprep.subr.bf16.mxu1 %v5905_v8 }
 0x769   :  { %2719 = vmatpush1.bf16.msra.mxu0 %v5908_v17  ;;  %2760 = vmatpush1.bf16.msra.mxu1 %v5911_v45 }
 0x76a   :  { %2720 = vmatprep.subr.bf16.mxu0 %v5914_v6  ;;  %2761 = vmatprep.subr.bf16.mxu1 %v5917_v24 }
 0x76d   :  { %2721 = vmatpush1.bf16.msra.mxu0 %v5920_v56  ;;  %2762 = vmatpush1.bf16.msra.mxu1 %v5923_v9 }
 0x76e   :  { %2722 = vmatprep.subr.bf16.mxu0 %v7311_v32  ;;  %2763 = vmatprep.subr.bf16.mxu1 %v7312_v19 }
 0x771   :  { %2723 = vmatpush1.bf16.msra.mxu0 %v7313_v52  ;;  %2764 = vmatpush1.bf16.msra.mxu1 %v7314_v57 }
 0x772   :  { %2724 = vmatprep.subr.bf16.mxu0 %v7315_v61  ;;  %2765 = vmatprep.subr.bf16.mxu1 %v7316_v26 }
 0x775   :  { %2725 = vmatpush1.bf16.msra.mxu0 %v7317_v53  ;;  %2766 = vmatpush1.bf16.msra.mxu1 %v7318_v3 }
 0x776   :  { %2726 = vmatprep.subr.bf16.mxu0 %v7319_v36  ;;  %2767 = vmatprep.subr.bf16.mxu1 %v7320_v13 }
 0x779   :  { %2727 = vmatpush1.bf16.msra.mxu0 %v7321_v5  ;;  %2768 = vmatpush1.bf16.msra.mxu1 %v7322_v2 }
 0x77a   :  { %2728 = vmatprep.subr.bf16.mxu0 %v7323_v10  ;;  %2769 = vmatprep.subr.bf16.mxu1 %v7324_v4 }
 0x77d   :  { %2729 = vmatpush1.bf16.msra.mxu0 %v7325_v60  ;;  %2770 = vmatpush1.bf16.msra.mxu1 %v7326_v44  ;;  %v7334_v44 = vld [vmem:[#allocation62_spill] sm:$0xff] }
 0x77e   :  { %2895 = vmatprep.subr.bf16.mxu0 %v7327_v35  ;;  %2936 = vmatprep.subr.bf16.mxu1 %v5979_v30 }
 0x780   :  { %2747 = vmatmul.mubr.bf16.vlgmr.msra.gmra.mrb[48].mxu0 %v2712_v1  ;;  %2788 = vmatmul.mubr.bf16.vlgmr.msra.gmra.mrb[56].mxu1 %v2712_v1  ;;  %v6149_v1 = vld [vmem:[#allocation5 + $0x204] ss:$16 sps:$4 sm:$0xff]  }
 0x781   :  { %2896 = vmatpush1.bf16.msra.mxu0 %v7328_v15  ;;  %2937 = vmatpush1.bf16.msra.mxu1 %v7329_v18  ;;  %7336 = vst [vmem:[#allocation70_spill] sm:$0xff] %v6149_v1 }
 0x782   :  { %2897 = vmatprep.subr.bf16.mxu0 %v7330_v0  ;;  %2938 = vmatprep.subr.bf16.mxu1 %v7331_v29 }
 0x785   :  { %2898 = vmatpush1.bf16.msra.mxu0 %v7332_v43  ;;  %2939 = vmatpush1.bf16.msra.mxu1 %v7333_v33  ;;  %v6152_v33 = vld [vmem:[#allocation5 + $0x20c] ss:$16 sps:$4 sm:$0xff]  }
 0x786   :  { %2899 = vmatprep.subr.bf16.mxu0 %v7334_v44  ;;  %2940 = vmatprep.subr.bf16.mxu1 %v7335_v20  ;;  %7337 = vst [vmem:[#allocation71_spill] sm:$0xff] %v6152_v33  ;;  %v6155_v20 = vld [vmem:[#allocation5 + $0x200] ss:$16 sps:$4 sm:$0xff]  }
 0x787   :  { %7338 = vst [vmem:[#allocation72_spill] sm:$0xff] %v6155_v20 }
 0x789   :  { %2900 = vmatpush1.bf16.msra.mxu0 %v6006_v46  ;;  %2941 = vmatpush1.bf16.msra.mxu1 %v6009_v50  ;;  %v6158_v50 = vld [vmem:[#allocation5 + $0x208] ss:$16 sps:$4 sm:$0xff]  }
 0x78a   :  { %2901 = vmatprep.subr.bf16.mxu0 %v6012_v25  ;;  %2942 = vmatprep.subr.bf16.mxu1 %v6015_v62  ;;  %7339 = vst [vmem:[#allocation73_spill] sm:$0xff] %v6158_v50  ;;  %v6161_v62 = vld [vmem:[#allocation5 + $0x224] ss:$16 sps:$4 sm:$0xff]  }
 0x78b   :  { %7340 = vst [vmem:[#allocation17_spill] sm:$0xff] %v6161_v62 }
 0x78d   :  { %2902 = vmatpush1.bf16.msra.mxu0 %v6018_v42  ;;  %2943 = vmatpush1.bf16.msra.mxu1 %v6021_v14  ;;  %v6164_v14 = vld [vmem:[#allocation5 + $0x22c] ss:$16 sps:$4 sm:$0xff]  }
 0x78e   :  { %2903 = vmatprep.subr.bf16.mxu0 %v6149_v1  ;;  %2944 = vmatprep.subr.bf16.mxu1 %v6152_v33  ;;  %7341 = vst [vmem:[#allocation79_spill] sm:$0xff] %v6164_v14  ;;  %v6167_v1 = vld [vmem:[#allocation5 + $0x220] ss:$16 sps:$4 sm:$0xff]   ;;  %v6170_v33 = vld [vmem:[#allocation5 + $0x228] ss:$16 sps:$4 sm:$0xff]  }
 0x78f   :  { %7342 = vst [vmem:[#allocation80_spill] sm:$0xff] %v6167_v1  ;;  %7343 = vst [vmem:[#allocation22_spill] sm:$0xff] %v6170_v33 }
 0x791   :  { %2904 = vmatpush1.bf16.msra.mxu0 %v6155_v20  ;;  %2945 = vmatpush1.bf16.msra.mxu1 %v6158_v50  ;;  %v6173_v20 = vld [vmem:[#allocation5 + $0x244] ss:$16 sps:$4 sm:$0xff]   ;;  %v6176_v50 = vld [vmem:[#allocation5 + $0x24c] ss:$16 sps:$4 sm:$0xff]  }
 0x792   :  { %2905 = vmatprep.subr.bf16.mxu0 %v6161_v62  ;;  %2946 = vmatprep.subr.bf16.mxu1 %v6164_v14  ;;  %7344 = vst [vmem:[#allocation23_spill] sm:$0xff] %v6173_v20  ;;  %7345 = vst [vmem:[#allocation24_spill] sm:$0xff] %v6176_v50  ;;  %v6179_v62 = vld [vmem:[#allocation5 + $0x240] ss:$16 sps:$4 sm:$0xff]   ;;  %v6182_v14 = vld [vmem:[#allocation5 + $0x248] ss:$16 sps:$4 sm:$0xff]  }
 0x793   :  { %7346 = vst [vmem:[#allocation25_spill] sm:$0xff] %v6179_v62  ;;  %7347 = vst [vmem:[#allocation26_spill] sm:$0xff] %v6182_v14 }
 0x795   :  { %2906 = vmatpush1.bf16.msra.mxu0 %v6167_v1  ;;  %2947 = vmatpush1.bf16.msra.mxu1 %v6170_v33  ;;  %v6185_v1 = vld [vmem:[#allocation5 + $0x264] ss:$16 sps:$4 sm:$0xff]   ;;  %v6188_v33 = vld [vmem:[#allocation5 + $0x26c] ss:$16 sps:$4 sm:$0xff]  }
 0x796   :  { %2907 = vmatprep.subr.bf16.mxu0 %v6173_v20  ;;  %2948 = vmatprep.subr.bf16.mxu1 %v6176_v50  ;;  %7348 = vst [vmem:[#allocation27_spill] sm:$0xff] %v6185_v1  ;;  %7349 = vst [vmem:[#allocation28_spill] sm:$0xff] %v6188_v33  ;;  %v6191_v20 = vld [vmem:[#allocation5 + $0x260] ss:$16 sps:$4 sm:$0xff]   ;;  %v6194_v50 = vld [vmem:[#allocation5 + $0x268] ss:$16 sps:$4 sm:$0xff]  }
 0x797   :  { %7350 = vst [vmem:[#allocation29_spill] sm:$0xff] %v6191_v20  ;;  %7351 = vst [vmem:[#allocation30_spill] sm:$0xff] %v6194_v50 }
 0x799   :  { %2908 = vmatpush1.bf16.msra.mxu0 %v6179_v62  ;;  %2949 = vmatpush1.bf16.msra.mxu1 %v6182_v14  ;;  %v6197_v62 = vld [vmem:[#allocation5 + $0x284] ss:$16 sps:$4 sm:$0xff]   ;;  %v6200_v14 = vld [vmem:[#allocation5 + $0x28c] ss:$16 sps:$4 sm:$0xff]  }
 0x79a   :  { %2909 = vmatprep.subr.bf16.mxu0 %v6185_v1  ;;  %2950 = vmatprep.subr.bf16.mxu1 %v6188_v33  ;;  %7352 = vst [vmem:[#allocation55_spill] sm:$0xff] %v6197_v62  ;;  %7353 = vst [vmem:[#allocation31_spill] sm:$0xff] %v6200_v14  ;;  %v6203_v1 = vld [vmem:[#allocation5 + $0x280] ss:$16 sps:$4 sm:$0xff]   ;;  %v6206_v33 = vld [vmem:[#allocation5 + $0x288] ss:$16 sps:$4 sm:$0xff]  }
 0x79b   :  { %7354 = vst [vmem:[#allocation32_spill] sm:$0xff] %v6203_v1  ;;  %7355 = vst [vmem:[#allocation33_spill] sm:$0xff] %v6206_v33 }
 0x79d   :  { %2910 = vmatpush1.bf16.msra.mxu0 %v6191_v20  ;;  %2951 = vmatpush1.bf16.msra.mxu1 %v6194_v50  ;;  %v6209_v20 = vld [vmem:[#allocation5 + $0x2a4] ss:$16 sps:$4 sm:$0xff]   ;;  %v6212_v50 = vld [vmem:[#allocation5 + $0x2ac] ss:$16 sps:$4 sm:$0xff]  }
 0x79e   :  { %2911 = vmatprep.subr.bf16.mxu0 %v6197_v62  ;;  %2952 = vmatprep.subr.bf16.mxu1 %v6200_v14  ;;  %7356 = vst [vmem:[#allocation34_spill] sm:$0xff] %v6209_v20  ;;  %7357 = vst [vmem:[#allocation35_spill] sm:$0xff] %v6212_v50  ;;  %v6215_v62 = vld [vmem:[#allocation5 + $0x2a0] ss:$16 sps:$4 sm:$0xff]   ;;  %v6218_v14 = vld [vmem:[#allocation5 + $0x2a8] ss:$16 sps:$4 sm:$0xff]  }
 0x79f   :  { %7358 = vst [vmem:[#allocation36_spill] sm:$0xff] %v6215_v62  ;;  %7359 = vst [vmem:[#allocation37_spill] sm:$0xff] %v6218_v14 }
 0x7a1   :  { %2912 = vmatpush1.bf16.msra.mxu0 %v6203_v1  ;;  %2953 = vmatpush1.bf16.msra.mxu1 %v6206_v33  ;;  %v6221_v1 = vld [vmem:[#allocation5 + $0x2c4] ss:$16 sps:$4 sm:$0xff]   ;;  %v6224_v33 = vld [vmem:[#allocation5 + $0x2cc] ss:$16 sps:$4 sm:$0xff]  }
 0x7a2   :  { %2913 = vmatprep.subr.bf16.mxu0 %v6209_v20  ;;  %2954 = vmatprep.subr.bf16.mxu1 %v6212_v50  ;;  %7360 = vst [vmem:[#allocation38_spill] sm:$0xff] %v6221_v1  ;;  %7361 = vst [vmem:[#allocation40_spill] sm:$0xff] %v6224_v33  ;;  %v6227_v20 = vld [vmem:[#allocation5 + $0x2c0] ss:$16 sps:$4 sm:$0xff]   ;;  %v6230_v50 = vld [vmem:[#allocation5 + $0x2c8] ss:$16 sps:$4 sm:$0xff]  }
 0x7a3   :  { %7362 = vst [vmem:[#allocation83_spill] sm:$0xff] %v6227_v20  ;;  %7363 = vst [vmem:[#allocation84_spill] sm:$0xff] %v6230_v50 }
 0x7a5   :  { %2914 = vmatpush1.bf16.msra.mxu0 %v6215_v62  ;;  %2955 = vmatpush1.bf16.msra.mxu1 %v6218_v14  ;;  %v6233_v62 = vld [vmem:[#allocation5 + $0x2e4] ss:$16 sps:$4 sm:$0xff]   ;;  %v6236_v14 = vld [vmem:[#allocation5 + $0x2ec] ss:$16 sps:$4 sm:$0xff]  }
 0x7a6   :  { %2915 = vmatprep.subr.bf16.mxu0 %v6221_v1  ;;  %2956 = vmatprep.subr.bf16.mxu1 %v6224_v33  ;;  %7364 = vst [vmem:[#allocation85_spill] sm:$0xff] %v6233_v62  ;;  %7365 = vst [vmem:[#allocation86_spill] sm:$0xff] %v6236_v14  ;;  %v6239_v1 = vld [vmem:[#allocation5 + $0x2e0] ss:$16 sps:$4 sm:$0xff]   ;;  %v6242_v33 = vld [vmem:[#allocation5 + $0x2e8] ss:$16 sps:$4 sm:$0xff]  }
 0x7a7   :  { %7366 = vst [vmem:[#allocation87_spill] sm:$0xff] %v6239_v1  ;;  %7367 = vst [vmem:[#allocation88_spill] sm:$0xff] %v6242_v33 }
 0x7a9   :  { %2916 = vmatpush1.bf16.msra.mxu0 %v6227_v20  ;;  %2957 = vmatpush1.bf16.msra.mxu1 %v6230_v50  ;;  %v6245_v20 = vld [vmem:[#allocation5 + $0x304] ss:$16 sps:$4 sm:$0xff]   ;;  %v6248_v50 = vld [vmem:[#allocation5 + $0x30c] ss:$16 sps:$4 sm:$0xff]  }
 0x7aa   :  { %2917 = vmatprep.subr.bf16.mxu0 %v6233_v62  ;;  %2958 = vmatprep.subr.bf16.mxu1 %v6236_v14  ;;  %7368 = vst [vmem:[#allocation39_spill] sm:$0xff] %v6245_v20  ;;  %7369 = vst [vmem:[#allocation18_spill] sm:$0xff] %v6248_v50  ;;  %v6251_v62 = vld [vmem:[#allocation5 + $0x300] ss:$16 sps:$4 sm:$0xff]   ;;  %v6254_v14 = vld [vmem:[#allocation5 + $0x308] ss:$16 sps:$4 sm:$0xff]  }
 0x7ab   :  { %7370 = vst [vmem:[#allocation19_spill] sm:$0xff] %v6251_v62  ;;  %7371 = vst [vmem:[#allocation41_spill] sm:$0xff] %v6254_v14 }
 0x7ad   :  { %2918 = vmatpush1.bf16.msra.mxu0 %v6239_v1  ;;  %2959 = vmatpush1.bf16.msra.mxu1 %v6242_v33  ;;  %v6257_v1 = vld [vmem:[#allocation5 + $0x324] ss:$16 sps:$4 sm:$0xff]   ;;  %v6260_v33 = vld [vmem:[#allocation5 + $0x32c] ss:$16 sps:$4 sm:$0xff]  }
 0x7ae   :  { %2919 = vmatprep.subr.bf16.mxu0 %v6245_v20  ;;  %2960 = vmatprep.subr.bf16.mxu1 %v6248_v50  ;;  %7372 = vst [vmem:[#allocation42_spill] sm:$0xff] %v6257_v1  ;;  %7373 = vst [vmem:[#allocation43_spill] sm:$0xff] %v6260_v33  ;;  %v6263_v20 = vld [vmem:[#allocation5 + $0x320] ss:$16 sps:$4 sm:$0xff]   ;;  %v6266_v50 = vld [vmem:[#allocation5 + $0x328] ss:$16 sps:$4 sm:$0xff]  }
 0x7af   :  { %7374 = vst [vmem:[#allocation44_spill] sm:$0xff] %v6263_v20  ;;  %7375 = vst [vmem:[#allocation45_spill] sm:$0xff] %v6266_v50 }
 0x7b1   :  { %2920 = vmatpush1.bf16.msra.mxu0 %v6251_v62  ;;  %2961 = vmatpush1.bf16.msra.mxu1 %v6254_v14  ;;  %v6269_v62 = vld [vmem:[#allocation5 + $0x344] ss:$16 sps:$4 sm:$0xff]   ;;  %v6272_v14 = vld [vmem:[#allocation5 + $0x34c] ss:$16 sps:$4 sm:$0xff]  }
 0x7b2   :  { %2921 = vmatprep.subr.bf16.mxu0 %v6257_v1  ;;  %2962 = vmatprep.subr.bf16.mxu1 %v6260_v33  ;;  %7376 = vst [vmem:[#allocation46_spill] sm:$0xff] %v6269_v62  ;;  %7377 = vst [vmem:[#allocation47_spill] sm:$0xff] %v6272_v14  ;;  %v6275_v1 = vld [vmem:[#allocation5 + $0x340] ss:$16 sps:$4 sm:$0xff]   ;;  %v6278_v33 = vld [vmem:[#allocation5 + $0x348] ss:$16 sps:$4 sm:$0xff]  }
 0x7b3   :  { %7378 = vst [vmem:[#allocation48_spill] sm:$0xff] %v6275_v1  ;;  %7379 = vst [vmem:[#allocation49_spill] sm:$0xff] %v6278_v33 }
 0x7b5   :  { %2922 = vmatpush1.bf16.msra.mxu0 %v6263_v20  ;;  %2963 = vmatpush1.bf16.msra.mxu1 %v6266_v50  ;;  %v6281_v20 = vld [vmem:[#allocation5 + $0x364] ss:$16 sps:$4 sm:$0xff]   ;;  %v6284_v50 = vld [vmem:[#allocation5 + $0x36c] ss:$16 sps:$4 sm:$0xff]  }
 0x7b6   :  { %2923 = vmatprep.subr.bf16.mxu0 %v6269_v62  ;;  %2964 = vmatprep.subr.bf16.mxu1 %v6272_v14  ;;  %7380 = vst [vmem:[#allocation50_spill] sm:$0xff] %v6281_v20  ;;  %7381 = vst [vmem:[#allocation51_spill] sm:$0xff] %v6284_v50  ;;  %v6287_v62 = vld [vmem:[#allocation5 + $0x360] ss:$16 sps:$4 sm:$0xff]   ;;  %v6290_v14 = vld [vmem:[#allocation5 + $0x368] ss:$16 sps:$4 sm:$0xff]  }
 0x7b7   :  { %7382 = vst [vmem:[#allocation52_spill] sm:$0xff] %v6287_v62  ;;  %7383 = vst [vmem:[#allocation53_spill] sm:$0xff] %v6290_v14 }
 0x7b9   :  { %2924 = vmatpush1.bf16.msra.mxu0 %v6275_v1  ;;  %2965 = vmatpush1.bf16.msra.mxu1 %v6278_v33 }
 0x7ba   :  { %2925 = vmatprep.subr.bf16.mxu0 %v6281_v20  ;;  %2966 = vmatprep.subr.bf16.mxu1 %v6284_v50 }
 0x7bd   :  { %2926 = vmatpush1.bf16.msra.mxu0 %v6287_v62  ;;  %2967 = vmatpush1.bf16.msra.mxu1 %v6290_v14 }
 0x7be   :  { %3012 = vmatprep.subr.bf16.mxu0 %v7304_v55  ;;  %3053 = vmatprep.subr.bf16.mxu1 %v6073_v63 }
 0x833   :  { %v2631_v33 = vpop.f32.mrb[44].mxu0  ;;  %v2672_v1 = vpop.f32.mrb[52].mxu1 }
 0x834   :  { %v2632_v20 = vadd.f32 %v2631_v33, %v7305_v40  ;;  %v2633_v42 = vpop.f32.mrb[45].mxu0  ;;  %v2674_v25 = vpop.f32.mrb[53].mxu1  ;;  %v2673_v55 = vadd.f32 %v2672_v1, %v7307_v47 }
 0x835   :  { %v2634_v50 = vadd.f32 %v2633_v42, %v7306_v27  ;;  %v2635_v46 = vpop.f32.mrb[46].mxu0  ;;  %v2676_v44 = vpop.f32.mrb[54].mxu1  ;;  %v2675_v63 = vadd.f32 %v2674_v25, %v7308_v51 }
 0x836   :  { %v3750_v43 = vmul.f32 -1.442695, %v2632_v20  ;;  %v2636_v62 = vpop.f32.mrb[47].mxu0  ;;  %v2677_v29 = vpop.f32.mrb[55].mxu1  ;;  %v3752_v14 = vmul.f32 -1.442695, %v2673_v55 }
 0x837   :  { %v3751_v0 = vmul.f32 -1.442695, %v2634_v50 }
 0x838   :  { %4266 = vpow2.f32 %v3750_v43 }
 0x839   :  { %4268 = vpow2.f32 %v3751_v0 }
 0x83a   :  { %4270 = vtanh.f32 %v2675_v63 }
 0x83b   :  { %4272 = vpow2.f32 %v3752_v14 }
 0x842   :  { %v4267_v18 = vpop.eup %4266 }
 0x843   :  { %v2688_v15 = vadd.f32 1.0, %v4267_v18  ;;  %v4269_v33 = vpop.eup %4268 }
 0x844   :  { %v2689_v42 = vadd.f32 1.0, %v4269_v33  ;;  %v4271_v46 = vpop.eup %4270 }
 0x845   :  { %4274 = vrcp.f32 %v2688_v15  ;;  %v4273_v44 = vpop.eup %4272 }
 0x846   :  { %4276 = vrcp.f32 %v2689_v42  ;;  %v2690_v43 = vadd.f32 1.0, %v4273_v44 }
 0x848   :  { %4278 = vrcp.f32 %v2690_v43 }
 0x84f   :  { %v4275_v62 = vpop.eup %4274 }
 0x850   :  { %v2699_v29 = vmul.f32 %v4275_v62, %v4271_v46  ;;  %v4277_v50 = vpop.eup %4276 }
 0x851   :  { %v2698_v0 = vmul.f32 %v4277_v50, %v6081_v54 }
 0x853   :  { %v2748_v20 = vpop.f32.mrb[48].mxu0  ;;  %v2789_v1 = vpop.f32.mrb[56].mxu1  ;;  %v6300_v25 = vadd.f32 %v2699_v29, %v2698_v0 }
 0x854   :  { %v2800_v55 = vrot.slane %v2748_v20, 2  ;;  %v2804_v18 = vrot.slane %v2748_v20, 3  ;;  %v2750_v63 = vpop.f32.mrb[49].mxu0  ;;  %v2791_v51 = vpop.f32.mrb[57].mxu1  ;;  %v2802_v50 = vrot.slane %v2789_v1, 2  ;;  %v2806_v43 = vrot.slane %v2789_v1, 3 }
 0x855   :  { %v2801_v14 = vrot.slane %v2750_v63, 2  ;;  %v2805_v15 = vrot.slane %v2750_v63, 3  ;;  %v2752_v33 = vpop.f32.mrb[50].mxu0  ;;  %v2793_v42 = vpop.f32.mrb[58].mxu1  ;;  %4280 = vtanh.f32 %v6300_v25 }
 0x856   :  { %v2816_v46 = vadd.f32 %v2800_v55, %v7309_v37  ;;  %v2820_v44 = vadd.f32 %v2804_v18, %v7112_v7  ;;  %v2753_v54 = vpop.f32.mrb[51].mxu0  ;;  %v2794_v62 = vpop.f32.mrb[59].mxu1  ;;  %v2818_v33 = vadd.f32 %v2802_v50, %v5142_v41  ;;  %v2822_v55 = vadd.f32 %v2806_v43, %v5146_v34 }
 0x857   :  { %v2817_v29 = vadd.f32 %v2801_v14, %v7310_v58  ;;  %v2821_v0 = vadd.f32 %v2805_v15, %v7113_v11  ;;  %v2803_v37 = vrot.slane %v2791_v51, 2  ;;  %v2807_v18 = vrot.slane %v2791_v51, 3  ;;  %v4279_v54 = vpop.eup %4278 }
 0x858   :  { %v3753_v20 = vmul.f32 -1.442695, %v2816_v46  ;;  %v3756_v47 = vmul.f32 -1.442695, %v2820_v44  ;;  %v3755_v62 = vmul.f32 -1.442695, %v2818_v33 }
 0x859   :  { %v3754_v63 = vmul.f32 -1.442695, %v2817_v29  ;;  %v3757_v42 = vmul.f32 -1.442695, %v2821_v0  ;;  %v3758_v58 = vmul.f32 -1.442695, %v2822_v55  ;;  %v2819_v15 = vadd.f32 %v2803_v37, %v7059_v39 }
 0x85a   :  { %4282 = vpow2.f32 %v3753_v20  ;;  %v2823_v1 = vadd.f32 %v2807_v18, %v7058_v23 }
 0x85b   :  { %4284 = vpow2.f32 %v3756_v47 }
 0x85c   :  { %4286 = vpow2.f32 %v3754_v63 }
 0x85d   :  { %4288 = vpow2.f32 %v3757_v42 }
 0x85e   :  { %4290 = vpow2.f32 %v3755_v62 }
 0x85f   :  { %v4281_v14 = vpop.eup %4280  ;;  %4292 = vpow2.f32 %v3758_v58 }
 0x860   :  { %v2702_v46 = vmul.f32 %v4281_v14, %v4279_v54  ;;  %4294 = vtanh.f32 %v2819_v15 }
 0x861   :  { %4296 = vtanh.f32 %v2823_v1 }
 0x862   :  { %v2885_v47 = vrot.slane %v2702_v46, 2  ;;  %v2864_v46 = vrot.slane %v6094_v12, 7 }
 0x864   :  { %v4283_v44 = vpop.eup %4282  ;;  %v2888_v0 = vpack.c.bf16 %v2885_v47, %v2885_v47 }
 0x865   :  { %v4285_v50 = vpop.eup %4284  ;;  %v2842_v29 = vadd.f32 1.0, %v4283_v44  ;;  %v2865_v44 = vrot.slane %v6096_v59, 7 }
 0x866   :  { %v2845_v20 = vadd.f32 1.0, %v4285_v50  ;;  %v2892_v51 = vrot.slane %v2888_v0, 3  ;;  %v4287_v43 = vpop.eup %4286 }
 0x867   :  { %4298 = vrcp.f32 %v2842_v29  ;;  %v4289_v63 = vpop.eup %4288  ;;  %v2843_v33 = vadd.f32 1.0, %v4287_v43 }
 0x868   :  { %4300 = vrcp.f32 %v2845_v20  ;;  %2927 = vmatprep.mubr.bf16.mxu0 %v2892_v51  ;;  %2968 = vmatprep.mubr.bf16.mxu1 %v2892_v51  ;;  %v2846_v37 = vadd.f32 1.0, %v4289_v63  ;;  %v4291_v42 = vpop.eup %4290 }
 0x869   :  { %4302 = vrcp.f32 %v2843_v33  ;;  %v4293_v55 = vpop.eup %4292  ;;  %v2844_v1 = vadd.f32 1.0, %v4291_v42 }
 0x86a   :  { %4304 = vrcp.f32 %v2846_v37  ;;  %v4295_v58 = vpop.eup %4294  ;;  %v2847_v50 = vadd.f32 1.0, %v4293_v55 }
 0x86b   :  { %v4297_v18 = vpop.eup %4296  ;;  %4306 = vrcp.f32 %v2844_v1 }
 0x86c   :  { %4308 = vrcp.f32 %v2847_v50  ;;  %v7414_v50 = vld [vmem:[#allocation30_spill] sm:$0xff] }
 0x871   :  { %v4299_v54 = vpop.eup %4298 }
 0x872   :  { %v4301_v62 = vpop.eup %4300  ;;  %v2870_v14 = vmul.f32 %v4299_v54, %v4295_v58 }
 0x873   :  { %v2871_v15 = vmul.f32 %v4301_v62, %v4297_v18  ;;  %v4303_v47 = vpop.eup %4302 }
 0x874   :  { %v4305_v29 = vpop.eup %4304  ;;  %v2868_v0 = vmul.f32 %v4303_v47, %v2864_v46 }
 0x875   :  { %v2869_v20 = vmul.f32 %v4305_v29, %v2865_v44  ;;  %v4307_v63 = vpop.eup %4306  ;;  %v7415_v29 = vld [vmem:[#allocation55_spill] sm:$0xff] }
 0x876   :  { %v6313_v51 = vadd.f32 %v2870_v14, %v2868_v0  ;;  %v4309_v12 = vpop.eup %4308  ;;  %v7416_v0 = vld [vmem:[#allocation31_spill] sm:$0xff] }
 0x877   :  { %v6315_v43 = vadd.f32 %v2871_v15, %v2869_v20  ;;  %v7417_v20 = vld [vmem:[#allocation32_spill] sm:$0xff] }
 0x878   :  { %4310 = vtanh.f32 %v6313_v51 }
 0x879   :  { %4312 = vtanh.f32 %v6315_v43 }
 0x882   :  { %v4311_v33 = vpop.eup %4310 }
 0x883   :  { %v4313_v37 = vpop.eup %4312  ;;  %v2876_v42 = vmul.f32 %v4311_v33, %v4307_v63  ;;  %v7418_v63 = vld [vmem:[#allocation33_spill] sm:$0xff]  ;;  %v7420_v33 = vld [vmem:[#allocation35_spill] sm:$0xff] }
 0x884   :  { %v2877_v59 = vmul.f32 %v4313_v37, %v4309_v12  ;;  %v7419_v12 = vld [vmem:[#allocation34_spill] sm:$0xff]  ;;  %v7421_v37 = vld [vmem:[#allocation36_spill] sm:$0xff] }
 0x885   :  { %v3001_v55 = vpack.c.bf16 %v2876_v42, %v2876_v42 }
 0x886   :  { %v2880_v58 = vrot.slane %v2877_v59, 7  ;;  %v3002_v18 = vpack.c.bf16 %v2877_v59, %v2877_v59  ;;  %v7423_v59 = vld [vmem:[#allocation38_spill] sm:$0xff] }
 0x887   :  { %v3005_v54 = vunpack.c.l.b16 %v3001_v55  ;;  %v7424_v55 = vld [vmem:[#allocation40_spill] sm:$0xff] }
 0x888   :  { %v2882_v62 = vsel %vm2881_vm7, %v2880_v58, %v2876_v42  ;;  %v3006_v14 = vunpack.c.l.b16 %v3002_v18  ;;  %v7422_v42 = vld [vmem:[#allocation37_spill] sm:$0xff]  ;;  %v7425_v58 = vld [vmem:[#allocation83_spill] sm:$0xff]  ;;  %v7426_v18 = vld [vmem:[#allocation84_spill] sm:$0xff] }
 0x889   :  { %v2887_v46 = vpack.c.bf16 %v2882_v62, %v2882_v62  ;;  %v3007_v15 = vrot.slane %v3005_v54, 6  ;;  %v7427_v54 = vld [vmem:[#allocation85_spill] sm:$0xff]  ;;  %v7428_v62 = vld [vmem:[#allocation86_spill] sm:$0xff] }
 0x88a   :  { %v3008_v1 = vrot.slane %v3006_v14, 5  ;;  %v7429_v14 = vld [vmem:[#allocation87_spill] sm:$0xff] }
 0x88b   :  { %v2891_v47 = vrot.slane %v2887_v46, 3  ;;  %v7430_v46 = vld [vmem:[#allocation88_spill] sm:$0xff] }
 0x88c   :  { %v3009_v44 = vsel %vm424_vm1, %v3008_v1, %v3007_v15  ;;  %v7431_v15 = vld [vmem:[#allocation39_spill] sm:$0xff]  ;;  %v7432_v1 = vld [vmem:[#allocation18_spill] sm:$0xff] }
 0x88d   :  { %2928 = vmatmul.mubr.bf16.vlgmr.msra.gmra.mrb[52].mxu0 %v2891_v47  ;;  %2969 = vmatmul.mubr.bf16.vlgmr.msra.gmra.mrb[60].mxu1 %v2891_v47  ;;  %v7433_v47 = vld [vmem:[#allocation19_spill] sm:$0xff] }
 0x88e   :  { %3013 = vmatpush1.bf16.msra.mxu0 %v5882_v21  ;;  %3054 = vmatpush1.bf16.msra.mxu1 %v5885_v28  ;;  %v7384_v21 = vld [vmem:[#allocation57_spill] sm:$0xff]  ;;  %v3010_v28 = vpack.c.b16 %v3009_v44, %v3009_v44 }
 0x88f   :  { %3014 = vmatprep.subr.bf16.mxu0 %v5888_v38  ;;  %3055 = vmatprep.subr.bf16.mxu1 %v5891_v16  ;;  %v7385_v38 = vld [vmem:[#allocation59_spill] sm:$0xff]  ;;  %v7386_v16 = vld [vmem:[#allocation16_spill] sm:$0xff]  ;;  %v7434_v44 = vld [vmem:[#allocation41_spill] sm:$0xff] }
 0x890   :  { %3044 = vmatprep.mubr.bf16.mxu0 %v6989_v31  ;;  %3085 = vmatprep.mubr.bf16.mxu1 %v6989_v31 }
 0x892   :  { %3015 = vmatpush1.bf16.msra.mxu0 %v5896_v48  ;;  %3056 = vmatpush1.bf16.msra.mxu1 %v5899_v22  ;;  %v7387_v48 = vld [vmem:[#allocation82_spill] sm:$0xff]  ;;  %v7388_v22 = vld [vmem:[#allocation81_spill] sm:$0xff] }
 0x893   :  { %3016 = vmatprep.subr.bf16.mxu0 %v5902_v49  ;;  %3057 = vmatprep.subr.bf16.mxu1 %v5905_v8  ;;  %v7389_v49 = vld [vmem:[#allocation60_spill] sm:$0xff]  ;;  %v7390_v8 = vld [vmem:[#allocation61_spill] sm:$0xff] }
 0x896   :  { %3017 = vmatpush1.bf16.msra.mxu0 %v5908_v17  ;;  %3058 = vmatpush1.bf16.msra.mxu1 %v5911_v45  ;;  %v7391_v17 = vld [vmem:[#allocation62_spill] sm:$0xff]  ;;  %v7392_v45 = vld [vmem:[#allocation63_spill] sm:$0xff] }
 0x897   :  { %3018 = vmatprep.subr.bf16.mxu0 %v5914_v6  ;;  %3059 = vmatprep.subr.bf16.mxu1 %v5917_v24  ;;  %v7393_v6 = vld [vmem:[#allocation64_spill] sm:$0xff]  ;;  %v7394_v24 = vld [vmem:[#allocation65_spill] sm:$0xff] }
 0x89a   :  { %3019 = vmatpush1.bf16.msra.mxu0 %v5920_v56  ;;  %3060 = vmatpush1.bf16.msra.mxu1 %v5923_v9  ;;  %v7395_v56 = vld [vmem:[#allocation66_spill] sm:$0xff]  ;;  %v7396_v9 = vld [vmem:[#allocation67_spill] sm:$0xff] }
 0x89b   :  { %3020 = vmatprep.subr.bf16.mxu0 %v7311_v32  ;;  %3061 = vmatprep.subr.bf16.mxu1 %v7312_v19  ;;  %v7398_v32 = vld [vmem:[#allocation69_spill] sm:$0xff]  ;;  %v7399_v19 = vld [vmem:[#allocation70_spill] sm:$0xff] }
 0x89e   :  { %3021 = vmatpush1.bf16.msra.mxu0 %v7313_v52  ;;  %3062 = vmatpush1.bf16.msra.mxu1 %v7314_v57  ;;  %v7400_v52 = vld [vmem:[#allocation71_spill] sm:$0xff]  ;;  %v7401_v57 = vld [vmem:[#allocation72_spill] sm:$0xff] }
 0x89f   :  { %3022 = vmatprep.subr.bf16.mxu0 %v7315_v61  ;;  %3063 = vmatprep.subr.bf16.mxu1 %v7316_v26  ;;  %v7402_v61 = vld [vmem:[#allocation73_spill] sm:$0xff] }
 0x8a0   :  { %v7403_v26 = vld [vmem:[#allocation17_spill] sm:$0xff] }
 0x8a2   :  { %3023 = vmatpush1.bf16.msra.mxu0 %v7317_v53  ;;  %3064 = vmatpush1.bf16.msra.mxu1 %v7318_v3  ;;  %v7404_v53 = vld [vmem:[#allocation79_spill] sm:$0xff]  ;;  %v7405_v3 = vld [vmem:[#allocation80_spill] sm:$0xff] }
 0x8a3   :  { %3024 = vmatprep.subr.bf16.mxu0 %v7319_v36  ;;  %3065 = vmatprep.subr.bf16.mxu1 %v7320_v13  ;;  %v7406_v36 = vld [vmem:[#allocation22_spill] sm:$0xff]  ;;  %v7407_v13 = vld [vmem:[#allocation23_spill] sm:$0xff] }
 0x8a6   :  { %3025 = vmatpush1.bf16.msra.mxu0 %v7321_v5  ;;  %3066 = vmatpush1.bf16.msra.mxu1 %v7322_v2  ;;  %v7408_v5 = vld [vmem:[#allocation24_spill] sm:$0xff]  ;;  %v7409_v2 = vld [vmem:[#allocation25_spill] sm:$0xff] }
 0x8a7   :  { %3026 = vmatprep.subr.bf16.mxu0 %v7323_v10  ;;  %3067 = vmatprep.subr.bf16.mxu1 %v7324_v4  ;;  %v7410_v10 = vld [vmem:[#allocation26_spill] sm:$0xff]  ;;  %v7411_v4 = vld [vmem:[#allocation27_spill] sm:$0xff] }
 0x8aa   :  { %3027 = vmatpush1.bf16.msra.mxu0 %v7325_v60  ;;  %3068 = vmatpush1.bf16.msra.mxu1 %v7384_v21  ;;  %v7412_v60 = vld [vmem:[#allocation28_spill] sm:$0xff]  ;;  %v7435_v21 = vld [vmem:[#allocation42_spill] sm:$0xff] }
 0x8ab   :  { %3204 = vmatprep.subr.bf16.mxu0 %v7327_v35  ;;  %3245 = vmatprep.subr.bf16.mxu1 %v5979_v30  ;;  %v7397_v30 = vld [vmem:[#allocation68_spill] sm:$0xff]  ;;  %v7413_v35 = vld [vmem:[#allocation29_spill] sm:$0xff] }
 0x8ad   :  { %3045 = vmatmul.mubr.bf16.vlgmr.msra.gmra.mrb[56].mxu0 %v3010_v28  ;;  %3086 = vmatmul.mubr.bf16.vlgmr.msra.gmra.mrb[64].mxu1 %v3010_v28  ;;  %v7436_v28 = vld [vmem:[#allocation43_spill] sm:$0xff] }
 0x8ae   :  { %3205 = vmatpush1.bf16.msra.mxu0 %v7385_v38  ;;  %3246 = vmatpush1.bf16.msra.mxu1 %v7386_v16  ;;  %v7437_v38 = vld [vmem:[#allocation44_spill] sm:$0xff]  ;;  %v7438_v16 = vld [vmem:[#allocation45_spill] sm:$0xff] }
 0x8af   :  { %3206 = vmatprep.subr.bf16.mxu0 %v7387_v48  ;;  %3247 = vmatprep.subr.bf16.mxu1 %v7388_v22  ;;  %v7439_v48 = vld [vmem:[#allocation46_spill] sm:$0xff]  ;;  %v7440_v22 = vld [vmem:[#allocation47_spill] sm:$0xff] }
 0x8b2   :  { %3207 = vmatpush1.bf16.msra.mxu0 %v7389_v49  ;;  %3248 = vmatpush1.bf16.msra.mxu1 %v7390_v8  ;;  %v7441_v49 = vld [vmem:[#allocation48_spill] sm:$0xff]  ;;  %v7442_v8 = vld [vmem:[#allocation49_spill] sm:$0xff] }
 0x8b3   :  { %3208 = vmatprep.subr.bf16.mxu0 %v7391_v17  ;;  %3249 = vmatprep.subr.bf16.mxu1 %v7392_v45  ;;  %v7443_v17 = vld [vmem:[#allocation50_spill] sm:$0xff]  ;;  %v7444_v45 = vld [vmem:[#allocation51_spill] sm:$0xff] }
 0x8b6   :  { %3209 = vmatpush1.bf16.msra.mxu0 %v7393_v6  ;;  %3250 = vmatpush1.bf16.msra.mxu1 %v7394_v24  ;;  %v7445_v6 = vld [vmem:[#allocation52_spill] sm:$0xff]  ;;  %v7446_v24 = vld [vmem:[#allocation53_spill] sm:$0xff] }
 0x8b7   :  { %3210 = vmatprep.subr.bf16.mxu0 %v7395_v56  ;;  %3251 = vmatprep.subr.bf16.mxu1 %v7396_v9 }
 0x8ba   :  { %3211 = vmatpush1.bf16.msra.mxu0 %v7397_v30  ;;  %3252 = vmatpush1.bf16.msra.mxu1 %v7398_v32 }
 0x8bb   :  { %3212 = vmatprep.subr.bf16.mxu0 %v7399_v19  ;;  %3253 = vmatprep.subr.bf16.mxu1 %v7400_v52 }
 0x8be   :  { %3213 = vmatpush1.bf16.msra.mxu0 %v7401_v57  ;;  %3254 = vmatpush1.bf16.msra.mxu1 %v7402_v61 }
 0x8bf   :  { %3214 = vmatprep.subr.bf16.mxu0 %v7403_v26  ;;  %3255 = vmatprep.subr.bf16.mxu1 %v7404_v53 }
 0x8c2   :  { %3215 = vmatpush1.bf16.msra.mxu0 %v7405_v3  ;;  %3256 = vmatpush1.bf16.msra.mxu1 %v7406_v36 }
 0x8c3   :  { %3216 = vmatprep.subr.bf16.mxu0 %v7407_v13  ;;  %3257 = vmatprep.subr.bf16.mxu1 %v7408_v5  ;;  %v7447_v13 = vld [vmem:[#allocation20_spill] sm:$0xff] }
 0x8c6   :  { %3217 = vmatpush1.bf16.msra.mxu0 %v7409_v2  ;;  %3258 = vmatpush1.bf16.msra.mxu1 %v7410_v10  ;;  %v7448_v2 = vld [vmem:[#allocation21_spill] sm:$0xff] }
 0x8c7   :  { %3218 = vmatprep.subr.bf16.mxu0 %v7411_v4  ;;  %3259 = vmatprep.subr.bf16.mxu1 %v7412_v60 }
 0x8ca   :  { %3219 = vmatpush1.bf16.msra.mxu0 %v7413_v35  ;;  %3260 = vmatpush1.bf16.msra.mxu1 %v7414_v50 }
 0x8cb   :  { %3220 = vmatprep.subr.bf16.mxu0 %v7415_v29  ;;  %3261 = vmatprep.subr.bf16.mxu1 %v7416_v0 }
 0x8ce   :  { %3221 = vmatpush1.bf16.msra.mxu0 %v7417_v20  ;;  %3262 = vmatpush1.bf16.msra.mxu1 %v7418_v63 }
 0x8cf   :  { %3222 = vmatprep.subr.bf16.mxu0 %v7419_v12  ;;  %3263 = vmatprep.subr.bf16.mxu1 %v7420_v33 }
 0x8d2   :  { %3223 = vmatpush1.bf16.msra.mxu0 %v7421_v37  ;;  %3264 = vmatpush1.bf16.msra.mxu1 %v7422_v42 }
 0x8d3   :  { %3224 = vmatprep.subr.bf16.mxu0 %v7423_v59  ;;  %3265 = vmatprep.subr.bf16.mxu1 %v7424_v55 }
 0x8d6   :  { %3225 = vmatpush1.bf16.msra.mxu0 %v7425_v58  ;;  %3266 = vmatpush1.bf16.msra.mxu1 %v7426_v18 }
 0x8d7   :  { %3226 = vmatprep.subr.bf16.mxu0 %v7427_v54  ;;  %3267 = vmatprep.subr.bf16.mxu1 %v7428_v62 }
 0x8da   :  { %3227 = vmatpush1.bf16.msra.mxu0 %v7429_v14  ;;  %3268 = vmatpush1.bf16.msra.mxu1 %v7430_v46 }
 0x8db   :  { %3228 = vmatprep.subr.bf16.mxu0 %v7431_v15  ;;  %3269 = vmatprep.subr.bf16.mxu1 %v7432_v1 }
 0x8de   :  { %3229 = vmatpush1.bf16.msra.mxu0 %v7433_v47  ;;  %3270 = vmatpush1.bf16.msra.mxu1 %v7434_v44  ;;  %v7449_v44 = vld [vmem:[#allocation77_spill] sm:$0xff] }
 0x8df   :  { %3230 = vmatprep.subr.bf16.mxu0 %v7435_v21  ;;  %3271 = vmatprep.subr.bf16.mxu1 %v7436_v28 }
 0x8e2   :  { %3231 = vmatpush1.bf16.msra.mxu0 %v7437_v38  ;;  %3272 = vmatpush1.bf16.msra.mxu1 %v7438_v16 }
 0x8e3   :  { %3232 = vmatprep.subr.bf16.mxu0 %v7439_v48  ;;  %3273 = vmatprep.subr.bf16.mxu1 %v7440_v22  ;;  %v7450_v48 = vld [vmem:[#allocation78_spill] sm:$0xff] }
 0x8e6   :  { %3233 = vmatpush1.bf16.msra.mxu0 %v7441_v49  ;;  %3274 = vmatpush1.bf16.msra.mxu1 %v7442_v8 }
 0x8e7   :  { %3234 = vmatprep.subr.bf16.mxu0 %v7443_v17  ;;  %3275 = vmatprep.subr.bf16.mxu1 %v7444_v45 }
 0x8ea   :  { %3235 = vmatpush1.bf16.msra.mxu0 %v7445_v6  ;;  %3276 = vmatpush1.bf16.msra.mxu1 %v7446_v24 }
 0x960   :  { %v2929_v56 = vpop.f32.mrb[52].mxu0  ;;  %v2970_v9 = vpop.f32.mrb[60].mxu1 }
 0x961   :  { %v2930_v30 = vadd.f32 %v2929_v56, %v7305_v40  ;;  %v2931_v32 = vpop.f32.mrb[53].mxu0  ;;  %v2972_v19 = vpop.f32.mrb[61].mxu1  ;;  %v2971_v5 = vadd.f32 %v2970_v9, %v7447_v13 }
 0x962   :  { %v2932_v52 = vadd.f32 %v2931_v32, %v7306_v27  ;;  %v2933_v57 = vpop.f32.mrb[54].mxu0  ;;  %v2974_v61 = vpop.f32.mrb[62].mxu1  ;;  %v2973_v10 = vadd.f32 %v2972_v19, %v7448_v2 }
 0x963   :  { %v3759_v26 = vmul.f32 -1.442695, %v2930_v30  ;;  %v2934_v53 = vpop.f32.mrb[55].mxu0  ;;  %v2975_v3 = vpop.f32.mrb[63].mxu1  ;;  %v3761_v4 = vmul.f32 -1.442695, %v2971_v5 }
 0x964   :  { %v3760_v36 = vmul.f32 -1.442695, %v2932_v52 }
 0x965   :  { %4314 = vpow2.f32 %v3759_v26 }
 0x966   :  { %4316 = vpow2.f32 %v3760_v36 }
 0x967   :  { %4318 = vtanh.f32 %v2973_v10 }
 0x968   :  { %4320 = vpow2.f32 %v3761_v4 }
 0x96f   :  { %v4315_v60 = vpop.eup %4314 }
 0x970   :  { %v2986_v35 = vadd.f32 1.0, %v4315_v60  ;;  %v4317_v50 = vpop.eup %4316 }
 0x971   :  { %v2987_v29 = vadd.f32 1.0, %v4317_v50  ;;  %v4319_v0 = vpop.eup %4318 }
 0x972   :  { %4322 = vrcp.f32 %v2986_v35  ;;  %v4321_v20 = vpop.eup %4320 }
 0x973   :  { %4324 = vrcp.f32 %v2987_v29  ;;  %v2988_v37 = vadd.f32 1.0, %v4321_v20 }
 0x975   :  { %4326 = vrcp.f32 %v2988_v37 }
 0x97c   :  { %v4323_v63 = vpop.eup %4322 }
 0x97d   :  { %v2997_v12 = vmul.f32 %v4323_v63, %v4319_v0  ;;  %v4325_v33 = vpop.eup %4324 }
 0x97e   :  { %v2996_v42 = vmul.f32 %v4325_v33, %v6300_v25 }
 0x97f   :  { %v4327_v32 = vpop.eup %4326 }
 0x980   :  { %v3046_v59 = vpop.f32.mrb[56].mxu0  ;;  %v3087_v55 = vpop.f32.mrb[64].mxu1  ;;  %v6421_v58 = vadd.f32 %v2997_v12, %v2996_v42 }
 0x981   :  { %v3098_v18 = vrot.slane %v3046_v59, 1  ;;  %v3102_v54 = vrot.slane %v3046_v59, 2  ;;  %v3048_v62 = vpop.f32.mrb[57].mxu0  ;;  %v3089_v14 = vpop.f32.mrb[65].mxu1  ;;  %v3100_v16 = vrot.slane %v3087_v55, 1  ;;  %v3104_v45 = vrot.slane %v3087_v55, 2 }
 0x982   :  { %v3099_v46 = vrot.slane %v3048_v62, 1  ;;  %v3103_v15 = vrot.slane %v3048_v62, 2  ;;  %v3050_v1 = vpop.f32.mrb[58].mxu0  ;;  %v3091_v47 = vpop.f32.mrb[66].mxu1  ;;  %4328 = vtanh.f32 %v6421_v58  ;;  %v3101_v30 = vrot.slane %v3089_v14, 1 }
 0x983   :  { %v3114_v21 = vadd.f32 %v3098_v18, %v7449_v44  ;;  %v3118_v28 = vadd.f32 %v3102_v54, %v7112_v7  ;;  %v3051_v25 = vpop.f32.mrb[59].mxu0  ;;  %v3092_v38 = vpop.f32.mrb[67].mxu1  ;;  %v3116_v24 = vadd.f32 %v3100_v16, %v5142_v41  ;;  %v3120_v9 = vadd.f32 %v3104_v45, %v5146_v34 }
 0x984   :  { %v3115_v22 = vadd.f32 %v3099_v46, %v7450_v48  ;;  %v3119_v49 = vadd.f32 %v3103_v15, %v7113_v11  ;;  %v3105_v7 = vrot.slane %v3089_v14, 2  ;;  %v3117_v11 = vadd.f32 %v3101_v30, %v7059_v39  ;;  %v3973_v30 = vld [vmem:[#allocation5 + $0x3a0] ss:$16 sps:$4 sm:$0xff]  }
 0x985   :  { %v3762_v8 = vmul.f32 -1.442695, %v3114_v21  ;;  %v3765_v17 = vmul.f32 -1.442695, %v3118_v28  ;;  %v3764_v19 = vmul.f32 -1.442695, %v3116_v24 }
 0x986   :  { %v3763_v6 = vmul.f32 -1.442695, %v3115_v22  ;;  %v3766_v56 = vmul.f32 -1.442695, %v3119_v49  ;;  %v3767_v57 = vmul.f32 -1.442695, %v3120_v9  ;;  %v3121_v26 = vadd.f32 %v3105_v7, %v7058_v23 }
 0x987   :  { %4330 = vpow2.f32 %v3762_v8  ;;  %v3162_v18 = vrot.slane %v6313_v51, 7  ;;  %v3163_v14 = vrot.slane %v6315_v43, 7  ;;  %v3972_v24 = vld [vmem:[#allocation5 + $0x384] ss:$16 sps:$4 sm:$0xff]  }
 0x988   :  { %4332 = vpow2.f32 %v3765_v17  ;;  %3402 = vmatprep.subr.bf16.mxu0 %v3972_v24  ;;  %v3975_v9 = vld [vmem:[#allocation5 + $0x3a4] ss:$16 sps:$4 sm:$0xff]  }
 0x989   :  { %4334 = vpow2.f32 %v3763_v6  ;;  %v3978_v7 = vld [vmem:[#allocation5 + $0x3c4] ss:$16 sps:$4 sm:$0xff]  }
 0x98a   :  { %4336 = vpow2.f32 %v3766_v56  ;;  %v3970_v56 = vld [vmem:[#allocation5 + $0x380] ss:$16 sps:$4 sm:$0xff]  }
 0x98b   :  { %4338 = vpow2.f32 %v3764_v19  ;;  %v3981_v19 = vld [vmem:[#allocation5 + $0x3e4] ss:$16 sps:$4 sm:$0xff]  }
 0x98c   :  { %v4329_v52 = vpop.eup %4328  ;;  %4340 = vpow2.f32 %v3767_v57  ;;  %v3984_v57 = vld [vmem:[#allocation5 + $0x404] ss:$16 sps:$4 sm:$0xff]  }
 0x98d   :  { %v3000_v61 = vmul.f32 %v4329_v52, %v4327_v32  ;;  %4342 = vtanh.f32 %v3117_v11  ;;  %v3976_v32 = vld [vmem:[#allocation5 + $0x3c0] ss:$16 sps:$4 sm:$0xff]  }
 0x98e   :  { %4344 = vtanh.f32 %v3121_v26  ;;  %v3979_v52 = vld [vmem:[#allocation5 + $0x3e0] ss:$16 sps:$4 sm:$0xff]   ;;  %v3990_v26 = vld [vmem:[#allocation5 + $0x444] ss:$16 sps:$4 sm:$0xff]  }
 0x98f   :  { %v3182_v53 = vrot.slane %v3000_v61, 1  ;;  %v3982_v11 = vld [vmem:[#allocation5 + $0x400] ss:$16 sps:$4 sm:$0xff]  }
 0x990   :  { %v3985_v61 = vld [vmem:[#allocation5 + $0x420] ss:$16 sps:$4 sm:$0xff]  }
 0x991   :  { %v4331_v3 = vpop.eup %4330  ;;  %v3185_v34 = vpack.c.bf16 %v3182_v53, %v3182_v53  ;;  %v3988_v53 = vld [vmem:[#allocation5 + $0x440] ss:$16 sps:$4 sm:$0xff]  }
 0x992   :  { %v4333_v41 = vpop.eup %4332  ;;  %v3140_v36 = vadd.f32 1.0, %v4331_v3  ;;  %v3993_v3 = vld [vmem:[#allocation5 + $0x464] ss:$16 sps:$4 sm:$0xff]  }
 0x993   :  { %v3143_v5 = vadd.f32 1.0, %v4333_v41  ;;  %v3195_v10 = vshrl.u32 %v3185_v34, 16  ;;  %v3198_v4 = vshll.u32 %v3185_v34, 16  ;;  %v4335_v60 = vpop.eup %4334  ;;  %v3991_v41 = vld [vmem:[#allocation5 + $0x460] ss:$16 sps:$4 sm:$0xff]  }
 0x994   :  { %4346 = vrcp.f32 %v3140_v36  ;;  %v4337_v35 = vpop.eup %4336  ;;  %v3141_v39 = vadd.f32 1.0, %v4335_v60 }
 0x995   :  { %4348 = vrcp.f32 %v3143_v5  ;;  %v3197_v50 = vrot.slane %v3195_v10, 3  ;;  %v3200_v29 = vrot.slane %v3198_v4, 4  ;;  %v3144_v23 = vadd.f32 1.0, %v4337_v35  ;;  %v4339_v20 = vpop.eup %4338 }
 0x996   :  { %4350 = vrcp.f32 %v3141_v39  ;;  %v4341_v63 = vpop.eup %4340  ;;  %v3142_v54 = vadd.f32 1.0, %v4339_v20 }
 0x997   :  { %v3201_v0 = vor.u32 %v3200_v29, %v3197_v50  ;;  %4352 = vrcp.f32 %v3144_v23  ;;  %v4343_v12 = vpop.eup %4342  ;;  %v3145_v46 = vadd.f32 1.0, %v4341_v63 }
 0x998   :  { %v4345_v33 = vpop.eup %4344  ;;  %4354 = vrcp.f32 %v3142_v54 }
 0x999   :  { %3236 = vmatprep.mubr.bf16.mxu0 %v3201_v0  ;;  %3277 = vmatprep.mubr.bf16.mxu1 %v3201_v0  ;;  %4356 = vrcp.f32 %v3145_v46 }
 0x99e   :  { %v4347_v37 = vpop.eup %4346 }
 0x99f   :  { %v4349_v42 = vpop.eup %4348  ;;  %v3168_v59 = vmul.f32 %v4347_v37, %v4343_v12 }
 0x9a0   :  { %v3169_v55 = vmul.f32 %v4349_v42, %v4345_v33  ;;  %v4351_v62 = vpop.eup %4350  ;;  %v4718_v42 = vmov 1966171168  }
 0x9a1   :  { %v4353_v15 = vpop.eup %4352  ;;  %v3166_v1 = vmul.f32 %v4351_v62, %v3162_v18 }
 0x9a2   :  { %v3167_v47 = vmul.f32 %v4353_v15, %v3163_v14  ;;  %v4355_v28 = vpop.eup %4354  ;;  %v7451_v15 = vld [vmem:[#allocation74_spill] sm:$0xff] }
 0x9a3   :  { %v6434_v44 = vadd.f32 %v3168_v59, %v3166_v1  ;;  %v4357_v51 = vpop.eup %4356  ;;  %v3457_v59 = vunpack.c.l.s4 %v4718_v42 }
 0x9a4   :  { %v6436_v21 = vadd.f32 %v3169_v55, %v3167_v47 }
 0x9a5   :  { %4358 = vtanh.f32 %v6434_v44  ;;  %v3458_v54 = vunpack.c.0.s8 %v3457_v59 }
 0x9a6   :  { %4360 = vtanh.f32 %v6436_v21 }
 0x9a7   :  { %v3461_v1 = vsub.s32 %v3458_v54, %v7451_v15 }
 0x9af   :  { %v4359_v25 = vpop.eup %4358 }
 0x9b0   :  { %v4361_v38 = vpop.eup %4360  ;;  %v6440_v16 = vmul.f32 %v4359_v25, %v4355_v28 }
 0x9b1   :  { %v6442_v43 = vmul.f32 %v4361_v38, %v4357_v51 }
 0x9b3   :  { %v3178_v48 = vrot.slane %v6442_v43, 7 }
 0x9b5   :  { %v3184_v22 = vpack.c.bf16 %v3178_v48, %v6440_v16 }
 0x9b7   :  { %v3187_v49 = vshrl.u32 %v3184_v22, 16  ;;  %v3190_v8 = vshll.u32 %v3184_v22, 16  ;;  %v3520_v22 = vrot.slane %v6434_v44, 7 }
 0x9b9   :  { %v3189_v17 = vrot.slane %v3187_v49, 3  ;;  %v3192_v45 = vrot.slane %v3190_v8, 4  ;;  %v7452_v49 = vld [vmem:[#allocation75_spill] sm:$0xff] }
 0x9bb   :  { %v3193_v6 = vor.u32 %v3192_v45, %v3189_v17  ;;  %v3521_v17 = vrot.slane %v6436_v21, 7 }
 0x9bd   :  { %3237 = vmatmul.mubr.bf16.vlgmr.msra.gmra.mrb[60].mxu0 %v3193_v6  ;;  %3278 = vmatmul.mubr.bf16.vlgmr.msra.gmra.mrb[68].mxu1 %v3193_v6 }
 0x9be   :  { %3434 = vmatprep.mubr.bf16.mxu0 %v6989_v31  ;;  %3403 = vmatpush1.bf16.msra.mxu0 %v3970_v56  ;;  %v3987_v31 = vld [vmem:[#allocation5 + $0x424] ss:$16 sps:$4 sm:$0xff]  }
 0x9bf   :  { %3404 = vmatprep.subr.bf16.mxu0 %v3975_v9 }
 0x9c2   :  { %3405 = vmatpush1.bf16.msra.mxu0 %v3973_v30 }
 0x9c3   :  { %3406 = vmatprep.subr.bf16.mxu0 %v3978_v7 }
 0x9c6   :  { %3407 = vmatpush1.bf16.msra.mxu0 %v3976_v32 }
 0x9c7   :  { %3408 = vmatprep.subr.bf16.mxu0 %v3981_v19 }
 0x9ca   :  { %3409 = vmatpush1.bf16.msra.mxu0 %v3979_v52  ;;  %v3478_v52 = vrot.slane %v6440_v16, 7 }
 0x9cb   :  { %3410 = vmatprep.subr.bf16.mxu0 %v3984_v57 }
 0x9ce   :  { %3411 = vmatpush1.bf16.msra.mxu0 %v3982_v11 }
 0x9cf   :  { %3412 = vmatprep.subr.bf16.mxu0 %v3987_v31 }
 0x9d2   :  { %3413 = vmatpush1.bf16.msra.mxu0 %v3985_v61 }
 0x9d3   :  { %3414 = vmatprep.subr.bf16.mxu0 %v3990_v26 }
 0x9d6   :  { %3415 = vmatpush1.bf16.msra.mxu0 %v3988_v53 }
 0x9d7   :  { %3416 = vmatprep.subr.bf16.mxu0 %v3993_v3 }
 0x9da   :  { %3417 = vmatpush1.bf16.msra.mxu0 %v3991_v41 }
 0xa90   :  { %v3238_v36 = vpop.f32.mrb[60].mxu0  ;;  %v3279_v34 = vpop.f32.mrb[68].mxu1 }
 0xa91   :  { %v3239_v5 = vadd.f32 %v3238_v36, %v7305_v40  ;;  %v3240_v10 = vpop.f32.mrb[61].mxu0  ;;  %v3281_v4 = vpop.f32.mrb[69].mxu1  ;;  %v3280_v20 = vadd.f32 %v3279_v34, %v7447_v13 }
 0xa92   :  { %v3241_v60 = vadd.f32 %v3240_v10, %v7306_v27  ;;  %v3242_v35 = vpop.f32.mrb[62].mxu0  ;;  %v3283_v39 = vpop.f32.mrb[70].mxu1  ;;  %v3282_v63 = vadd.f32 %v3281_v4, %v7448_v2 }
 0xa93   :  { %v3768_v50 = vmul.f32 -1.442695, %v3239_v5  ;;  %v3243_v29 = vpop.f32.mrb[63].mxu0  ;;  %v3284_v23 = vpop.f32.mrb[71].mxu1  ;;  %v3770_v12 = vmul.f32 -1.442695, %v3280_v20 }
 0xa94   :  { %v3769_v0 = vmul.f32 -1.442695, %v3241_v60 }
 0xa95   :  { %4362 = vpow2.f32 %v3768_v50 }
 0xa96   :  { %4364 = vpow2.f32 %v3769_v0 }
 0xa97   :  { %4366 = vtanh.f32 %v3282_v63 }
 0xa98   :  { %4368 = vpow2.f32 %v3770_v12 }
 0xa9f   :  { %v4363_v33 = vpop.eup %4362 }
 0xaa0   :  { %v3295_v37 = vadd.f32 1.0, %v4363_v33  ;;  %v4365_v40 = vpop.eup %4364 }
 0xaa1   :  { %v3296_v27 = vadd.f32 1.0, %v4365_v40  ;;  %v4367_v55 = vpop.eup %4366 }
 0xaa2   :  { %4370 = vrcp.f32 %v3295_v37  ;;  %v4369_v18 = vpop.eup %4368 }
 0xaa3   :  { %4372 = vrcp.f32 %v3296_v27  ;;  %v3297_v13 = vadd.f32 1.0, %v4369_v18 }
 0xaa5   :  { %4374 = vrcp.f32 %v3297_v13 }
 0xaac   :  { %v4371_v62 = vpop.eup %4370 }
 0xaad   :  { %v3306_v14 = vmul.f32 %v4371_v62, %v4367_v55  ;;  %v4373_v46 = vpop.eup %4372 }
 0xaae   :  { %v3305_v2 = vmul.f32 %v4373_v46, %v6421_v58 }
 0xaaf   :  { %v4375_v24 = vpop.eup %4374 }
 0xab0   :  { %v3307_v47 = vadd.f32 %v3306_v14, %v3305_v2 }
 0xab2   :  { %4376 = vtanh.f32 %v3307_v47  ;;  %v3502_v28 = vrot.slane %v3307_v47, %v3461_v1 }
 0xab4   :  { %v3503_v51 = vcombine.high %v3502_v28, %v3502_v28  ;;  %v3510_v25 = vrot.slane %v3502_v28, %v3461_v1 }
 0xab6   :  { %v3517_v38 = vrot.slane %v3503_v51, %v3461_v1  ;;  %v3527_v8 = vrot.slane %v3510_v25, %v7452_v49 }
 0xab8   :  { %v3531_v45 = vrot.slane %v3517_v38, %v7452_v49  ;;  %v3534_v58 = vsel %vm3490_vm8, %v3520_v22, %v3527_v8 }
 0xab9   :  { %3536 = vst [vmem:[#allocation11] sm:$0x3] %v3534_v58 }
 0xaba   :  { %v3535_v6 = vsel %vm3490_vm8, %v3521_v17, %v3531_v45 }
 0xabb   :  { %3537 = vst [vmem:[#allocation11 + $0x2] sm:$0x3] %v3535_v6 }
 0xabc   :  { %v4377_v56 = vpop.eup %4376 }
 0xabd   :  { %v3309_v9 = vmul.f32 %v4377_v56, %v4375_v24 }
 0xabf   :  { %v3310_v30 = vpack.c.bf16 %v3309_v9, %v3309_v9  ;;  %v3462_v7 = vrot.slane %v3309_v9, %v3461_v1 }
 0xac1   :  { %3435 = vmatmul.mubr.bf16.vlgmr.msra.gmra.mrb[64].mxu0 %v3310_v30  ;;  %v3463_v32 = vcombine.high %v3462_v7, %v3462_v7  ;;  %v3470_v44 = vrot.slane %v3462_v7, %v3461_v1 }
 0xac3   :  { %v3477_v19 = vrot.slane %v3463_v32, %v3461_v1  ;;  %v3483_v21 = vrot.slane %v3470_v44, %v7452_v49 }
 0xac5   :  { %v3487_v57 = vrot.slane %v3477_v19, %v7452_v49  ;;  %v3491_v11 = vsel %vm3490_vm8, %v3478_v52, %v3483_v21 }
 0xac6   :  { %3493 = vst [vmem:[#allocation9] sm:$0x3] %v3491_v11 }
 0xac7   :  { %v3492_v31 = vsel %vm3490_vm8, %v3178_v48, %v3487_v57 }
 0xac8   :  { %3494 = vst [vmem:[#allocation9 + $0x2] sm:$0x3] %v3492_v31 }
 0xac9   :  { %4647 = shalt.err (!%p4644_p0)
}
 0xaca   :  { %s4648_s25 = scalar_lea.hbm %s6512_s6, 64 }
 0xacb   :  { %p4649_p1 = scmp.ne.s32.totalorder %s6512_s6, %s4648_s25  ;;  %p4652_p2 = scmp.lt.u32.totalorder %s4648_s25, %s6512_s6 }
 0xacd   :  { %p4654_p3 = pnand %p4652_p2, %p4649_p1 }
 0xacf   :  { %4657 = shalt.err (!%p4654_p3)
}
 0xad0   :  { %s4720_s30 = smov 32   ;;  %s4721_s8 = smov 2  }
 0xad1   :  { %3559 = dma.vmem_to_hbm [thread:$0]  %s3554_s22, 64, %s6512_s6, [#allocation10], %s4720_s30, %s4720_s30, %s4721_s8  }
 0xad2   :  { %s4722_s11 = smov [#allocation11]  }
 0xad3   :  { %s3565_s12 = sshll.u32 %s4722_s11, 4  ;;  %s3566_s12 = int_to_ptr.vmem [resolvable:$true] %s3565_s12 }
 0xad4   :  { %s4658_s13 = scalar_lea.vmem %s3566_s12, 64  ;;  %p4663_p5 = scmp.lt.s32.totalorder %s3566_s12, %s3566_s12 }
 0xad5   :  { %p4659_p4 = scmp.ne.s32.totalorder %s3566_s12, %s4658_s13  ;;  %p4664_p6 = scmp.lt.s32.totalorder %s4658_s13, %s4658_s13 }
 0xad7   :  { %p4665_p7 = por %p4664_p6, %p4663_p5 }
 0xad9   :  { %p4666_p8 = pnand %p4665_p7, %p4659_p4 }
 0xadb   :  { %4669 = shalt.err (!%p4666_p8)
}
 0xadc   :  { %s4670_s15 = scalar_lea.hbm %s6513_s7, 64 }
 0xadd   :  { %p4671_p9 = scmp.ne.s32.totalorder %s6513_s7, %s4670_s15  ;;  %p4674_p10 = scmp.lt.u32.totalorder %s4670_s15, %s6513_s7 }
 0xadf   :  { %p4676_p11 = pnand %p4674_p10, %p4671_p9 }
 0xae1   :  { %4679 = shalt.err (!%p4676_p11)
}
 0xae2   :  { %3571 = dma.vmem_to_hbm [thread:$0]  %s3566_s12, 64, %s6513_s7, [#allocation10], %s4720_s30, %s4720_s30, %s4721_s8   ;;  %v218_v16 = vld [vmem:[#allocation7 + $0x2] ss:$4 sm:$0x3] }
 0xae3   :  { %v3315_v43 = vrot.slane %v218_v16, %v7452_v49  ;;  %v7453_v48 = vld [vmem:[#allocation76_spill] sm:$0xff]  ;;  %s4723_s19 = smov [#allocation8]  }
 0xae4   :  { %v3319_v61 = vrot.slane %v218_v16, %v7453_v48  ;;  %s3544_s20 = sshll.u32 %s4723_s19, 4  ;;  %s3545_s20 = int_to_ptr.vmem [resolvable:$true] %s3544_s20 }
 0xae5   :  { %s4680_s21 = scalar_lea.vmem %s3545_s20, 64  ;;  %p4685_p13 = scmp.lt.s32.totalorder %s3545_s20, %s3545_s20 }
 0xae6   :  { %p4681_p12 = scmp.ne.s32.totalorder %s3545_s20, %s4680_s21  ;;  %p4686_p0 = scmp.lt.s32.totalorder %s4680_s21, %s4680_s21 }
 0xae8   :  { %p4687_p1 = por %p4686_p0, %p4685_p13 }
 0xaea   :  { %p4688_p2 = pnand %p4687_p1, %p4681_p12 }
 0xb94   :  { %v3436_v26 = vpop.f32.mrb[64].mxu0 }
 0xb95   :  { %v3437_v53 = vadd.f32 %v3436_v26, %v3315_v43  ;;  %v3438_v3 = vpop.f32.mrb[65].mxu0 }
 0xb96   :  { %v3439_v41 = vadd.f32 %v3438_v3, %v3319_v61  ;;  %v3440_v36 = vpop.f32.mrb[66].mxu0 }
 0xb97   :  { %v3441_v34 = vpop.f32.mrb[67].mxu0 }
 0xb98   :  { %v3445_v5 = vcombine.low %v3437_v53, %v3439_v41 }
 0xb9a   :  { %3787 = vst.sshfl [vmem:[#allocation8] sm:$0x33 pattern:$0x76325410] %v3445_v5 }
 0xb9b   :  { %4691 = shalt.err (!%p4688_p2)
}
 0xb9c   :  { %s4692_s22 = scalar_lea.hbm %s6511_s5, 64 }
 0xb9d   :  { %p4693_p3 = scmp.ne.s32.totalorder %s6511_s5, %s4692_s22  ;;  %p4696_p4 = scmp.lt.u32.totalorder %s4692_s22, %s6511_s5 }
 0xb9f   :  { %p4698_p5 = pnand %p4696_p4, %p4693_p3 }
 0xba1   :  { %4701 = shalt.err (!%p4698_p5)
}
 0xba2   :  { %3547 = dma.vmem_to_hbm [thread:$0]  %s3545_s20, 64, %s6511_s5, [#allocation4]  }
 0xba3   :  { %4706 = dma.done.wait [#allocation4], 64  }
 0xba4   :  { %4707 = vsyncadd [#allocation4], 4294967232 }
 0xba5   :  { %4708 = dma.done.wait [#allocation10], 128  }
 0xba6   :  { %4709 = vsyncadd [#allocation10], 4294967168 }
 0xba7   :  { %3581 = vsyncpa [#allocation3], 1 }
 0xba8   :  { %3582 = vsyncpa [#allocation6], 1 }
 0xba9   :  { %3583 = vsyncpa [#allocation4], 1 }
 0xbaa   :  { %3584 = vsyncpa [#allocation10], 1 }

</bundles_post_ra>
